<compile_context>
chip_gen: v7x
topology: tpu7x:2x2x1
jax: 0.10.0
libtpu: 0.0.40
codegen_flags: <defaults>
</compile_context>

<pallas_src>
import functools

import jax
import jax.numpy as jnp
from jax.experimental import pallas as pl
from jax.experimental.pallas import tpu as pltpu

EPS = 1e-5      # PyTorch BatchNorm2d default
LANE = 128      # TPU lane width


# ---------------------------------------------------------------------------
# In-kernel helpers
# ---------------------------------------------------------------------------
def _im2col(xp, Ho, Wo, stride):
    """xp: (nb, Hp, Wp, Cp) bf16 padded tile -> (nb*Ho*Wo, 9*Cp) im2col matrix."""
    nb, Hp, Wp, Cp = xp.shape
    cols = []
    for kh in range(3):
        for kw in range(3):
            cols.append(jax.lax.slice(
                xp,
                (0, kh, kw, 0),
                (nb, kh + (Ho - 1) * stride + 1, kw + (Wo - 1) * stride + 1, Cp),
                (1, stride, stride, 1)))
    # Lane-aligned concat (each piece is Cp-wide, Cp % 128 == 0).
    return jnp.concatenate(cols, axis=-1).reshape(nb * Ho * Wo, 9 * Cp)


def _partial_stats(acc, Cp):
    """acc: (M, Cp) f32 -> (1, 8, Cp) partial [sum; sum_sq; 0...] block."""
    s = jnp.sum(acc, axis=0, keepdims=True)
    s2 = jnp.sum(acc * acc, axis=0, keepdims=True)
    pad = jnp.zeros((6, Cp), jnp.float32)
    return jnp.concatenate([s, s2, pad], axis=0)[None, :, :]


# ---------------------------------------------------------------------------
# Kernels (each runs per batch-tile of nb samples)
# ---------------------------------------------------------------------------
def conv1_stats_kernel(xp_ref, w_ref, y_ref, st_ref, *, stride):
    """conv1 (im2col matmul, bf16 operands / f32 acc) + per-tile BN1 partial stats."""
    nb, Ho, Wo, Cp = y_ref.shape
    col = _im2col(xp_ref[...], Ho, Wo, stride)                 # bf16 (M, 9*Cpi)
    acc = jnp.dot(col, w_ref[...], preferred_element_type=jnp.float32)
    st_ref[...] = _partial_stats(acc, Cp)
    y_ref[...] = acc.reshape(nb, Ho, Wo, Cp).astype(y_ref.dtype)


def bn1_relu_conv2_stats_kernel(y1_ref, p1_ref, w_ref, y2_ref, st_ref):
    """Fused bn1(scale/shift) -> ReLU -> conv2 (+ per-tile BN2 partial stats)."""
    nb, Ho, Wo, Cp = y2_ref.shape
    m = nb * Ho * Wo
    x = y1_ref[...].reshape(m, Cp).astype(jnp.float32)
    scale1 = p1_ref[0:1, :]
    shift1 = p1_ref[1:2, :]
    a = jnp.maximum(x * scale1 + shift1, 0.0)                  # bn1 + relu, f32
    # 1-px spatial halo built in VMEM (no wrapper-side HBM pad copy).
    ap = jnp.pad(a.astype(jnp.bfloat16).reshape(nb, Ho, Wo, Cp),
                 ((0, 0), (1, 1), (1, 1), (0, 0)))
    col = _im2col(ap, Ho, Wo, 1)                               # bf16 (M, 9*Cp)
    acc = jnp.dot(col, w_ref[...], preferred_element_type=jnp.float32)
    st_ref[...] = _partial_stats(acc, Cp)
    y2_ref[...] = acc.reshape(nb, Ho, Wo, Cp).astype(y2_ref.dtype)


def bn2_add_relu_kernel(y2_ref, p2_ref, sc_ref, out_ref):
    """bn2(scale/shift) -> + shortcut -> ReLU."""
    nb, Ho, Wo, Cp = out_ref.shape
    m = nb * Ho * Wo
    y = y2_ref[...].reshape(m, Cp).astype(jnp.float32)
    sc = sc_ref[...].reshape(m, Cp).astype(jnp.float32)
    scale2 = p2_ref[0:1, :]
    shift2 = p2_ref[1:2, :]
    out = jnp.maximum(y * scale2 + shift2 + sc, 0.0)
    out_ref[...] = out.reshape(nb, Ho, Wo, Cp).astype(out_ref.dtype)


# ---------------------------------------------------------------------------
# Wrapper helpers
# ---------------------------------------------------------------------------
def _round_up(n, m):
    return ((n + m - 1) // m) * m


def _vmem_limit_bytes():
    """~85% of physical VMEM: ~54 MiB on v7x, ~108 MiB on v5e/v6e."""
    try:
        cap = int(pltpu.get_tpu_info().vmem_capacity_bytes)
    except Exception:
        cap = 128 * 1024 * 1024
    return max(int(cap * 0.85), 32 * 1024 * 1024)


def _pick_batch_block(N, per_sample_bytes, budget_bytes):
    """Largest divisor of N whose tile fits the budget; keep >=2 grid steps."""
    max_nb = max(1, budget_bytes // max(per_sample_bytes, 1))
    if N >= 2:
        max_nb = min(max_nb, max(1, N // 2))
    nb = 1
    for d in range(1, N + 1):
        if N % d == 0 and d <= max_nb:
            nb = d
    return nb


def _prep_w(w, cpi, cpo):
    """(3,3,ci,co) f32 -> (9*cpi, cpo) bf16 with zero-padded channels."""
    ci, co = w.shape[2], w.shape[3]
    wp = jnp.zeros((3, 3, cpi, cpo), jnp.float32).at[:, :, :ci, :co].set(w)
    return wp.reshape(9 * cpi, cpo).astype(jnp.bfloat16)


def _bn_affine(stats, count, gamma, beta, Cp):
    """Reduce per-tile partial stats -> (8, Cp) f32 [scale; shift; 0...]."""
    s = jnp.sum(stats[:, 0, :], axis=0)
    s2 = jnp.sum(stats[:, 1, :], axis=0)
    mean = s / count
    # One-pass biased variance from f32 partial sums (clamped); a two-pass /
    # Welford reduction would be more robust if tolerances tighten.
    var = jnp.maximum(s2 / count - mean * mean, 0.0)
    g = jnp.ones((Cp,), jnp.float32).at[: gamma.shape[0]].set(gamma)
    b = jnp.zeros((Cp,), jnp.float32).at[: beta.shape[0]].set(beta)
    scale = g * jax.lax.rsqrt(var + EPS)
    shift = b - mean * scale
    pad = jnp.zeros((6, Cp), jnp.float32)
    return jnp.concatenate([scale[None, :], shift[None, :], pad], axis=0)


# ---------------------------------------------------------------------------
# BasicBlock forward
# ---------------------------------------------------------------------------
def basic_block_forward(x_nchw, params, *, in_planes, planes, stride=1, option="A"):
    """BasicBlock.forward. x_nchw: (N, Cin, H, W) float32."""
    x = jnp.transpose(x_nchw, (0, 2, 3, 1)).astype(jnp.float32)   # NCHW -> NHWC
    N, H, W, Cin = x.shape
    Cpi = _round_up(in_planes, LANE)           # conv1 input channels (lane-padded)
    Cp = _round_up(planes, LANE)               # output / intermediate channels
    Ho = (H + 2 - 3) // stride + 1
    Wo = (W + 2 - 3) // stride + 1

    vmem_limit = _vmem_limit_bytes()
    cparams = pltpu.CompilerParams(
        dimension_semantics=("parallel",),     # megacore split on v7x
        vmem_limit_bytes=vmem_limit)

    # Batch tile: largest divisor of N whose working set (col + buffers) fits
    # roughly half the VMEM budget; >=2 grid steps for DMA/compute overlap.
    per_sample = Ho * Wo * max(Cp, Cpi) * 40   # bytes, conservative estimate
    nb = _pick_batch_block(N, per_sample, vmem_limit // 2)
    G = N // nb

    # ---- operands (bf16 activations; one combined spatial+channel pad) -----
    xp = jnp.pad(x.astype(jnp.bfloat16),
                 ((0, 0), (1, 1), (1, 1), (0, Cpi - Cin)))
    w1 = _prep_w(params["w1"], Cpi, Cp)
    w2 = _prep_w(params["w2"], Cp, Cp)

    resident = lambda shape: pl.BlockSpec(shape, lambda i: (0,) * len(shape))
    tile4 = lambda shp: pl.BlockSpec((nb,) + shp, lambda i: (i, 0, 0, 0))
    stats_spec = pl.BlockSpec((1, 8, Cp), lambda i: (i, 0, 0))
    stats_shape = jax.ShapeDtypeStruct((G, 8, Cp), jnp.float32)

    # ---- pass 1: conv1 + partial BN1 stats ---------------------------------
    y1, st1 = pl.pallas_call(
        functools.partial(conv1_stats_kernel, stride=stride),
        out_shape=(jax.ShapeDtypeStruct((N, Ho, Wo, Cp), jnp.bfloat16),
                   stats_shape),
        grid=(G,),
        in_specs=[tile4((H + 2, W + 2, Cpi)),
                  resident(w1.shape)],                 # weights stay in VMEM
        out_specs=(tile4((Ho, Wo, Cp)), stats_spec),
        compiler_params=cparams,
    )(xp, w1)
    p1 = _bn_affine(st1, float(N * Ho * Wo), params["g1"], params["b1"], Cp)

    # ---- pass 2: bn1 + relu + conv2 + partial BN2 stats --------------------
    y2, st2 = pl.pallas_call(
        bn1_relu_conv2_stats_kernel,
        out_shape=(jax.ShapeDtypeStruct((N, Ho, Wo, Cp), jnp.bfloat16),
                   stats_shape),
        grid=(G,),
        in_specs=[tile4((Ho, Wo, Cp)),
                  resident((8, Cp)),                    # bn1 scale/shift
                  resident(w2.shape)],
        out_specs=(tile4((Ho, Wo, Cp)), stats_spec),
        compiler_params=cparams,
    )(y1, p1, w2)
    p2 = _bn_affine(st2, float(N * Ho * Wo), params["g2"], params["b2"], Cp)

    # ---- shortcut (wrapper-side data movement, then bf16) ------------------
    if stride != 1 or in_planes != planes:
        if option == "A":
            sc = x[:, ::2, ::2, :]
            p = planes // 4
            sc = jnp.pad(sc, ((0, 0), (0, 0), (0, 0), (p, p)))
        else:
            raise NotImplementedError("option B shortcut not implemented")
    else:
        sc = x
    sc = jnp.pad(sc.astype(jnp.bfloat16),
                 ((0, 0), (0, 0), (0, 0), (0, Cp - sc.shape[-1])))

    # ---- pass 3: bn2 + add shortcut + relu ---------------------------------
    out = pl.pallas_call(
        bn2_add_relu_kernel,
        out_shape=jax.ShapeDtypeStruct((N, Ho, Wo, Cp), jnp.float32),
        grid=(G,),
        in_specs=[tile4((Ho, Wo, Cp)),
                  resident((8, Cp)),
                  tile4((Ho, Wo, Cp))],
        out_specs=tile4((Ho, Wo, Cp)),
        compiler_params=cparams,
    )(y2, p2, sc)

    out = out[:, :, :, :planes]                                  # drop lane padding
    return jnp.transpose(out, (0, 3, 1, 2))                      # NHWC -> NCHW


# ---------------------------------------------------------------------------
# Pure-JAX f32 reference (true module semantics, for correctness check)
# ---------------------------------------------------------------------------
def _ref_conv(x_nhwc, w, stride):
    return jax.lax.conv_general_dilated(
        x_nhwc, w, window_strides=(stride, stride), padding=((1, 1), (1, 1)),
        dimension_numbers=("NHWC", "HWIO", "NHWC"))


def _ref_bn(y, gamma, beta):
    mean = jnp.mean(y, axis=(0, 1, 2), keepdims=True)
    var = jnp.mean((y - mean) ** 2, axis=(0, 1, 2), keepdims=True)
    return (y - mean) * jax.lax.rsqrt(var + EPS) * gamma + beta


def basic_block_reference(x_nchw, params, *, in_planes, planes, stride=1):
    x = jnp.transpose(x_nchw, (0, 2, 3, 1))
    out = jax.nn.relu(_ref_bn(_ref_conv(x, params["w1"], stride),
                              params["g1"], params["b1"]))
    out = _ref_bn(_ref_conv(out, params["w2"], 1), params["g2"], params["b2"])
    if stride != 1 or in_planes != planes:
        sc = x[:, ::2, ::2, :]
        p = planes // 4
        sc = jnp.pad(sc, ((0, 0), (0, 0), (0, 0), (p, p)))
    else:
        sc = x
    out = jax.nn.relu(out + sc)
    return jnp.transpose(out, (0, 3, 1, 2))


if __name__ == "__main__":
    # Small config: batch=2, in_planes=planes=4, 16x16 spatial, stride=1
    # (identity shortcut).  Grid over batch -> 2 grid steps per kernel.
    N, C, H, W = 2, 4, 16, 16
    in_planes = planes = C
    stride = 1

    key = jax.random.PRNGKey(0)
    k = jax.random.split(key, 7)
    x = jax.random.normal(k[0], (N, C, H, W), jnp.float32)

    # Conv weights stored HWIO (3, 3, Cin, Cout); BN gamma/beta per-channel.
    params = {
        "w1": 0.1 * jax.random.normal(k[1], (3, 3, in_planes, planes), jnp.float32),
        "g1": 1.0 + 0.1 * jax.random.normal(k[2], (planes,), jnp.float32),
        "b1": 0.1 * jax.random.normal(k[3], (planes,), jnp.float32),
        "w2": 0.1 * jax.random.normal(k[4], (3, 3, planes, planes), jnp.float32),
        "g2": 1.0 + 0.1 * jax.random.normal(k[5], (planes,), jnp.float32),
        "b2": 0.1 * jax.random.normal(k[6], (planes,), jnp.float32),
    }

    fwd = jax.jit(functools.partial(basic_block_forward,
                                    in_planes=in_planes, planes=planes,
                                    stride=stride))
    out = jax.block_until_ready(fwd(x, params))

    ref = jax.block_until_ready(
        basic_block_reference(x, params, in_planes=in_planes, planes=planes,
                              stride=stride))

    assert out.shape == (N, planes, H // stride, W // stride), out.shape
    # bf16 MXU operands and bf16 HBM intermediates vs f32 reference -> loose tol.
    max_err = float(jnp.max(jnp.abs(out - ref)))
    assert jnp.allclose(out, ref, atol=1e-1, rtol=5e-2), max_err

    print("KERNEL_OK")
</pallas_src>

<mosaic_0001>
module attributes {stable_mosaic.version = 11 : i64} {
  func.func @bn1_relu_conv2_stats_kernel(%arg0: i32, %arg1: memref<1x16x16x128xbf16, #tpu.memory_space<vmem>>, %arg2: memref<8x128xf32, #tpu.memory_space<vmem>>, %arg3: memref<1152x128xbf16, #tpu.memory_space<vmem>>, %arg4: memref<1x16x16x128xbf16, #tpu.memory_space<vmem>>, %arg5: memref<1x8x128xf32, #tpu.memory_space<vmem>>) attributes {dimension_semantics = [#tpu.dimension_semantics<parallel>], iteration_bounds = array<i64: 2>, scalar_prefetch = 0 : i64, scratch_operands = 0 : i64, tpu.core_type = #tpu.core_type<tc>, window_params = [{transform_indices = @transform_0, window_bounds = array<i64: 1, 16, 16, 128>}, {pipeline_mode = #tpu.pipeline_mode<synchronous>, transform_indices = @transform_1, window_bounds = array<i64: 8, 128>}, {pipeline_mode = #tpu.pipeline_mode<synchronous>, transform_indices = @transform_2, window_bounds = array<i64: 1152, 128>}, {transform_indices = @transform_3, window_bounds = array<i64: 1, 16, 16, 128>}, {transform_indices = @transform_4, window_bounds = array<i64: 1, 8, 128>}]} {
    %c0 = arith.constant 0 : index
    %c0_0 = arith.constant 0 : index
    %c0_1 = arith.constant 0 : index
    %c0_2 = arith.constant 0 : index
    %0 = vector.load %arg1[%c0, %c0_0, %c0_1, %c0_2] : memref<1x16x16x128xbf16, #tpu.memory_space<vmem>>, vector<1x16x16x128xbf16>
    %1 = vector.shape_cast %0 : vector<1x16x16x128xbf16> to vector<256x128xbf16>
    %2 = arith.extf %1 : vector<256x128xbf16> to vector<256x128xf32>
    %c0_3 = arith.constant 0 : index
    %c0_4 = arith.constant 0 : index
    %3 = vector.load %arg2[%c0_3, %c0_4] : memref<8x128xf32, #tpu.memory_space<vmem>>, vector<1x128xf32>
    %c1 = arith.constant 1 : index
    %c0_5 = arith.constant 0 : index
    %4 = vector.load %arg2[%c1, %c0_5] : memref<8x128xf32, #tpu.memory_space<vmem>>, vector<1x128xf32>
    %5 = vector.broadcast %3 : vector<1x128xf32> to vector<256x128xf32>
    %6 = arith.mulf %2, %5 : vector<256x128xf32>
    %7 = vector.broadcast %4 : vector<1x128xf32> to vector<256x128xf32>
    %8 = arith.addf %6, %7 : vector<256x128xf32>
    %cst = arith.constant 0.000000e+00 : f32
    %9 = vector.broadcast %cst : f32 to vector<256x128xf32>
    %10 = arith.maximumf %8, %9 : vector<256x128xf32>
    %11 = arith.truncf %10 : vector<256x128xf32> to vector<256x128xbf16>
    %12 = vector.shape_cast %11 : vector<256x128xbf16> to vector<1x16x16x128xbf16>
    %c0_i32 = arith.constant 0 : i32
    %13 = arith.sitofp %c0_i32 : i32 to bf16
    %14 = vector.broadcast %13 : bf16 to vector<1x1x16x128xbf16>
    %15 = tpu.concatenate %14, %12 in 1 : vector<1x1x16x128xbf16>, vector<1x16x16x128xbf16> -> vector<1x17x16x128xbf16>
    %16 = vector.broadcast %13 : bf16 to vector<1x1x16x128xbf16>
    %17 = tpu.concatenate %15, %16 in 1 : vector<1x17x16x128xbf16>, vector<1x1x16x128xbf16> -> vector<1x18x16x128xbf16>
    %18 = vector.broadcast %13 : bf16 to vector<1x18x1x128xbf16>
    %19 = tpu.concatenate %18, %17 in 2 : vector<1x18x1x128xbf16>, vector<1x18x16x128xbf16> -> vector<1x18x17x128xbf16>
    %20 = vector.broadcast %13 : bf16 to vector<1x18x1x128xbf16>
    %21 = tpu.concatenate %19, %20 in 2 : vector<1x18x17x128xbf16>, vector<1x18x1x128xbf16> -> vector<1x18x18x128xbf16>
    %22 = vector.extract_strided_slice %21 {offsets = [0, 0, 0, 0], sizes = [1, 16, 16, 128], strides = [1, 1, 1, 1]} : vector<1x18x18x128xbf16> to vector<1x16x16x128xbf16>
    %23 = vector.extract_strided_slice %21 {offsets = [0, 0, 1, 0], sizes = [1, 16, 16, 128], strides = [1, 1, 1, 1]} : vector<1x18x18x128xbf16> to vector<1x16x16x128xbf16>
    %24 = vector.extract_strided_slice %21 {offsets = [0, 0, 2, 0], sizes = [1, 16, 16, 128], strides = [1, 1, 1, 1]} : vector<1x18x18x128xbf16> to vector<1x16x16x128xbf16>
    %25 = vector.extract_strided_slice %21 {offsets = [0, 1, 0, 0], sizes = [1, 16, 16, 128], strides = [1, 1, 1, 1]} : vector<1x18x18x128xbf16> to vector<1x16x16x128xbf16>
    %26 = vector.extract_strided_slice %21 {offsets = [0, 1, 1, 0], sizes = [1, 16, 16, 128], strides = [1, 1, 1, 1]} : vector<1x18x18x128xbf16> to vector<1x16x16x128xbf16>
    %27 = vector.extract_strided_slice %21 {offsets = [0, 1, 2, 0], sizes = [1, 16, 16, 128], strides = [1, 1, 1, 1]} : vector<1x18x18x128xbf16> to vector<1x16x16x128xbf16>
    %28 = vector.extract_strided_slice %21 {offsets = [0, 2, 0, 0], sizes = [1, 16, 16, 128], strides = [1, 1, 1, 1]} : vector<1x18x18x128xbf16> to vector<1x16x16x128xbf16>
    %29 = vector.extract_strided_slice %21 {offsets = [0, 2, 1, 0], sizes = [1, 16, 16, 128], strides = [1, 1, 1, 1]} : vector<1x18x18x128xbf16> to vector<1x16x16x128xbf16>
    %30 = vector.extract_strided_slice %21 {offsets = [0, 2, 2, 0], sizes = [1, 16, 16, 128], strides = [1, 1, 1, 1]} : vector<1x18x18x128xbf16> to vector<1x16x16x128xbf16>
    %31 = tpu.concatenate %22, %23, %24, %25, %26, %27, %28, %29, %30 in 3 : vector<1x16x16x128xbf16>, vector<1x16x16x128xbf16>, vector<1x16x16x128xbf16>, vector<1x16x16x128xbf16>, vector<1x16x16x128xbf16>, vector<1x16x16x128xbf16>, vector<1x16x16x128xbf16>, vector<1x16x16x128xbf16>, vector<1x16x16x128xbf16> -> vector<1x16x16x1152xbf16>
    %32 = vector.shape_cast %31 : vector<1x16x16x1152xbf16> to vector<256x1152xbf16>
    %c0_6 = arith.constant 0 : index
    %c0_7 = arith.constant 0 : index
    %33 = vector.load %arg3[%c0_6, %c0_7] : memref<1152x128xbf16, #tpu.memory_space<vmem>>, vector<1152x128xbf16>
    %cst_8 = arith.constant dense<0.000000e+00> : vector<256x128xf32>
    %34 = tpu.matmul %32, %33, %cst_8 {dimension_numbers = #tpu.dot_dimension_numbers<[1], [0], [0], [1], [0, 0, 1, 1], [], []>} : vector<256x1152xbf16>, vector<1152x128xbf16>, vector<256x128xf32> -> vector<256x128xf32>
    %cst_9 = arith.constant dense<0.000000e+00> : vector<128xf32>
    %35 = vector.multi_reduction <add>, %34, %cst_9 [0] : vector<256x128xf32> to vector<128xf32>
    %36 = vector.shape_cast %35 : vector<128xf32> to vector<1x128xf32>
    %37 = arith.mulf %34, %34 : vector<256x128xf32>
    %cst_10 = arith.constant dense<0.000000e+00> : vector<128xf32>
    %38 = vector.multi_reduction <add>, %37, %cst_10 [0] : vector<256x128xf32> to vector<128xf32>
    %39 = vector.shape_cast %38 : vector<128xf32> to vector<1x128xf32>
    %cst_11 = arith.constant 0.000000e+00 : f32
    %40 = vector.broadcast %cst_11 : f32 to vector<6x128xf32>
    %41 = tpu.concatenate %36, %39, %40 in 0 : vector<1x128xf32>, vector<1x128xf32>, vector<6x128xf32> -> vector<8x128xf32>
    %42 = vector.shape_cast %41 : vector<8x128xf32> to vector<1x8x128xf32>
    %c0_12 = arith.constant 0 : index
    %c0_13 = arith.constant 0 : index
    %c0_14 = arith.constant 0 : index
    %43 = vector.load %arg5[%c0_12, %c0_13, %c0_14] : memref<1x8x128xf32, #tpu.memory_space<vmem>>, vector<1x8x128xf32>
    tpu.vector_store %arg5[%c0_12, %c0_13, %c0_14], %42 {strides = array<i32>} : memref<1x8x128xf32, #tpu.memory_space<vmem>>, vector<1x8x128xf32>,
    %44 = vector.shape_cast %34 : vector<256x128xf32> to vector<1x16x16x128xf32>
    %45 = arith.truncf %44 : vector<1x16x16x128xf32> to vector<1x16x16x128xbf16>
    %c0_15 = arith.constant 0 : index
    %c0_16 = arith.constant 0 : index
    %c0_17 = arith.constant 0 : index
    %c0_18 = arith.constant 0 : index
    %46 = vector.load %arg4[%c0_15, %c0_16, %c0_17, %c0_18] : memref<1x16x16x128xbf16, #tpu.memory_space<vmem>>, vector<1x16x16x128xbf16>
    tpu.vector_store %arg4[%c0_15, %c0_16, %c0_17, %c0_18], %45 {strides = array<i32>} : memref<1x16x16x128xbf16, #tpu.memory_space<vmem>>, vector<1x16x16x128xbf16>,
    return
  }
  func.func @transform_0(%arg0: i32) -> (i32, i32, i32, i32) {
    %c0_i32 = arith.constant 0 : i32
    %c0_i32_0 = arith.constant 0 : i32
    %c0_i32_1 = arith.constant 0 : i32
    %c0_i32_2 = arith.constant 0 : i32
    return %arg0, %c0_i32, %c0_i32_0, %c0_i32_1 : i32, i32, i32, i32
  }
  func.func @transform_1(%arg0: i32) -> (i32, i32) {
    %c0_i32 = arith.constant 0 : i32
    %c0_i32_0 = arith.constant 0 : i32
    %c0_i32_1 = arith.constant 0 : i32
    return %c0_i32, %c0_i32_0 : i32, i32
  }
  func.func @transform_2(%arg0: i32) -> (i32, i32) {
    %c0_i32 = arith.constant 0 : i32
    %c0_i32_0 = arith.constant 0 : i32
    %c0_i32_1 = arith.constant 0 : i32
    return %c0_i32, %c0_i32_0 : i32, i32
  }
  func.func @transform_3(%arg0: i32) -> (i32, i32, i32, i32) {
    %c0_i32 = arith.constant 0 : i32
    %c0_i32_0 = arith.constant 0 : i32
    %c0_i32_1 = arith.constant 0 : i32
    %c0_i32_2 = arith.constant 0 : i32
    return %arg0, %c0_i32, %c0_i32_0, %c0_i32_1 : i32, i32, i32, i32
  }
  func.func @transform_4(%arg0: i32) -> (i32, i32, i32) {
    %c0_i32 = arith.constant 0 : i32
    %c0_i32_0 = arith.constant 0 : i32
    %c0_i32_1 = arith.constant 0 : i32
    return %arg0, %c0_i32, %c0_i32_0 : i32, i32, i32
  }
}

module attributes {stable_mosaic.version = 11 : i64} {
  func.func @conv1_stats_kernel(%arg0: i32, %arg1: memref<1x18x18x128xbf16, #tpu.memory_space<vmem>>, %arg2: memref<1152x128xbf16, #tpu.memory_space<vmem>>, %arg3: memref<1x16x16x128xbf16, #tpu.memory_space<vmem>>, %arg4: memref<1x8x128xf32, #tpu.memory_space<vmem>>) attributes {dimension_semantics = [#tpu.dimension_semantics<parallel>], iteration_bounds = array<i64: 2>, scalar_prefetch = 0 : i64, scratch_operands = 0 : i64, tpu.core_type = #tpu.core_type<tc>, window_params = [{transform_indices = @transform_0, window_bounds = array<i64: 1, 18, 18, 128>}, {pipeline_mode = #tpu.pipeline_mode<synchronous>, transform_indices = @transform_1, window_bounds = array<i64: 1152, 128>}, {transform_indices = @transform_2, window_bounds = array<i64: 1, 16, 16, 128>}, {transform_indices = @transform_3, window_bounds = array<i64: 1, 8, 128>}]} {
    %c0 = arith.constant 0 : index
    %c0_0 = arith.constant 0 : index
    %c0_1 = arith.constant 0 : index
    %c0_2 = arith.constant 0 : index
    %0 = vector.load %arg1[%c0, %c0_0, %c0_1, %c0_2] : memref<1x18x18x128xbf16, #tpu.memory_space<vmem>>, vector<1x18x18x128xbf16>
    %1 = vector.extract_strided_slice %0 {offsets = [0, 0, 0, 0], sizes = [1, 16, 16, 128], strides = [1, 1, 1, 1]} : vector<1x18x18x128xbf16> to vector<1x16x16x128xbf16>
    %2 = vector.extract_strided_slice %0 {offsets = [0, 0, 1, 0], sizes = [1, 16, 16, 128], strides = [1, 1, 1, 1]} : vector<1x18x18x128xbf16> to vector<1x16x16x128xbf16>
    %3 = vector.extract_strided_slice %0 {offsets = [0, 0, 2, 0], sizes = [1, 16, 16, 128], strides = [1, 1, 1, 1]} : vector<1x18x18x128xbf16> to vector<1x16x16x128xbf16>
    %4 = vector.extract_strided_slice %0 {offsets = [0, 1, 0, 0], sizes = [1, 16, 16, 128], strides = [1, 1, 1, 1]} : vector<1x18x18x128xbf16> to vector<1x16x16x128xbf16>
    %5 = vector.extract_strided_slice %0 {offsets = [0, 1, 1, 0], sizes = [1, 16, 16, 128], strides = [1, 1, 1, 1]} : vector<1x18x18x128xbf16> to vector<1x16x16x128xbf16>
    %6 = vector.extract_strided_slice %0 {offsets = [0, 1, 2, 0], sizes = [1, 16, 16, 128], strides = [1, 1, 1, 1]} : vector<1x18x18x128xbf16> to vector<1x16x16x128xbf16>
    %7 = vector.extract_strided_slice %0 {offsets = [0, 2, 0, 0], sizes = [1, 16, 16, 128], strides = [1, 1, 1, 1]} : vector<1x18x18x128xbf16> to vector<1x16x16x128xbf16>
    %8 = vector.extract_strided_slice %0 {offsets = [0, 2, 1, 0], sizes = [1, 16, 16, 128], strides = [1, 1, 1, 1]} : vector<1x18x18x128xbf16> to vector<1x16x16x128xbf16>
    %9 = vector.extract_strided_slice %0 {offsets = [0, 2, 2, 0], sizes = [1, 16, 16, 128], strides = [1, 1, 1, 1]} : vector<1x18x18x128xbf16> to vector<1x16x16x128xbf16>
    %10 = tpu.concatenate %1, %2, %3, %4, %5, %6, %7, %8, %9 in 3 : vector<1x16x16x128xbf16>, vector<1x16x16x128xbf16>, vector<1x16x16x128xbf16>, vector<1x16x16x128xbf16>, vector<1x16x16x128xbf16>, vector<1x16x16x128xbf16>, vector<1x16x16x128xbf16>, vector<1x16x16x128xbf16>, vector<1x16x16x128xbf16> -> vector<1x16x16x1152xbf16>
    %11 = vector.shape_cast %10 : vector<1x16x16x1152xbf16> to vector<256x1152xbf16>
    %c0_3 = arith.constant 0 : index
    %c0_4 = arith.constant 0 : index
    %12 = vector.load %arg2[%c0_3, %c0_4] : memref<1152x128xbf16, #tpu.memory_space<vmem>>, vector<1152x128xbf16>
    %cst = arith.constant dense<0.000000e+00> : vector<256x128xf32>
    %13 = tpu.matmul %11, %12, %cst {dimension_numbers = #tpu.dot_dimension_numbers<[1], [0], [0], [1], [0, 0, 1, 1], [], []>} : vector<256x1152xbf16>, vector<1152x128xbf16>, vector<256x128xf32> -> vector<256x128xf32>
    %cst_5 = arith.constant dense<0.000000e+00> : vector<128xf32>
    %14 = vector.multi_reduction <add>, %13, %cst_5 [0] : vector<256x128xf32> to vector<128xf32>
    %15 = vector.shape_cast %14 : vector<128xf32> to vector<1x128xf32>
    %16 = arith.mulf %13, %13 : vector<256x128xf32>
    %cst_6 = arith.constant dense<0.000000e+00> : vector<128xf32>
    %17 = vector.multi_reduction <add>, %16, %cst_6 [0] : vector<256x128xf32> to vector<128xf32>
    %18 = vector.shape_cast %17 : vector<128xf32> to vector<1x128xf32>
    %cst_7 = arith.constant 0.000000e+00 : f32
    %19 = vector.broadcast %cst_7 : f32 to vector<6x128xf32>
    %20 = tpu.concatenate %15, %18, %19 in 0 : vector<1x128xf32>, vector<1x128xf32>, vector<6x128xf32> -> vector<8x128xf32>
    %21 = vector.shape_cast %20 : vector<8x128xf32> to vector<1x8x128xf32>
    %c0_8 = arith.constant 0 : index
    %c0_9 = arith.constant 0 : index
    %c0_10 = arith.constant 0 : index
    %22 = vector.load %arg4[%c0_8, %c0_9, %c0_10] : memref<1x8x128xf32, #tpu.memory_space<vmem>>, vector<1x8x128xf32>
    tpu.vector_store %arg4[%c0_8, %c0_9, %c0_10], %21 {strides = array<i32>} : memref<1x8x128xf32, #tpu.memory_space<vmem>>, vector<1x8x128xf32>,
    %23 = vector.shape_cast %13 : vector<256x128xf32> to vector<1x16x16x128xf32>
    %24 = arith.truncf %23 : vector<1x16x16x128xf32> to vector<1x16x16x128xbf16>
    %c0_11 = arith.constant 0 : index
    %c0_12 = arith.constant 0 : index
    %c0_13 = arith.constant 0 : index
    %c0_14 = arith.constant 0 : index
    %25 = vector.load %arg3[%c0_11, %c0_12, %c0_13, %c0_14] : memref<1x16x16x128xbf16, #tpu.memory_space<vmem>>, vector<1x16x16x128xbf16>
    tpu.vector_store %arg3[%c0_11, %c0_12, %c0_13, %c0_14], %24 {strides = array<i32>} : memref<1x16x16x128xbf16, #tpu.memory_space<vmem>>, vector<1x16x16x128xbf16>,
    return
  }
  func.func @transform_0(%arg0: i32) -> (i32, i32, i32, i32) {
    %c0_i32 = arith.constant 0 : i32
    %c0_i32_0 = arith.constant 0 : i32
    %c0_i32_1 = arith.constant 0 : i32
    %c0_i32_2 = arith.constant 0 : i32
    return %arg0, %c0_i32, %c0_i32_0, %c0_i32_1 : i32, i32, i32, i32
  }
  func.func @transform_1(%arg0: i32) -> (i32, i32) {
    %c0_i32 = arith.constant 0 : i32
    %c0_i32_0 = arith.constant 0 : i32
    %c0_i32_1 = arith.constant 0 : i32
    return %c0_i32, %c0_i32_0 : i32, i32
  }
  func.func @transform_2(%arg0: i32) -> (i32, i32, i32, i32) {
    %c0_i32 = arith.constant 0 : i32
    %c0_i32_0 = arith.constant 0 : i32
    %c0_i32_1 = arith.constant 0 : i32
    %c0_i32_2 = arith.constant 0 : i32
    return %arg0, %c0_i32, %c0_i32_0, %c0_i32_1 : i32, i32, i32, i32
  }
  func.func @transform_3(%arg0: i32) -> (i32, i32, i32) {
    %c0_i32 = arith.constant 0 : i32
    %c0_i32_0 = arith.constant 0 : i32
    %c0_i32_1 = arith.constant 0 : i32
    return %arg0, %c0_i32, %c0_i32_0 : i32, i32, i32
  }
}

module attributes {stable_mosaic.version = 11 : i64} {
  func.func @bn2_add_relu_kernel(%arg0: i32, %arg1: memref<1x16x16x128xbf16, #tpu.memory_space<vmem>>, %arg2: memref<8x128xf32, #tpu.memory_space<vmem>>, %arg3: memref<1x16x16x128xbf16, #tpu.memory_space<vmem>>, %arg4: memref<1x16x16x128xf32, #tpu.memory_space<vmem>>) attributes {dimension_semantics = [#tpu.dimension_semantics<parallel>], iteration_bounds = array<i64: 2>, scalar_prefetch = 0 : i64, scratch_operands = 0 : i64, tpu.core_type = #tpu.core_type<tc>, window_params = [{transform_indices = @transform_0, window_bounds = array<i64: 1, 16, 16, 128>}, {pipeline_mode = #tpu.pipeline_mode<synchronous>, transform_indices = @transform_1, window_bounds = array<i64: 8, 128>}, {transform_indices = @transform_2, window_bounds = array<i64: 1, 16, 16, 128>}, {transform_indices = @transform_3, window_bounds = array<i64: 1, 16, 16, 128>}]} {
    %c0 = arith.constant 0 : index
    %c0_0 = arith.constant 0 : index
    %c0_1 = arith.constant 0 : index
    %c0_2 = arith.constant 0 : index
    %0 = vector.load %arg1[%c0, %c0_0, %c0_1, %c0_2] : memref<1x16x16x128xbf16, #tpu.memory_space<vmem>>, vector<1x16x16x128xbf16>
    %1 = vector.shape_cast %0 : vector<1x16x16x128xbf16> to vector<256x128xbf16>
    %2 = arith.extf %1 : vector<256x128xbf16> to vector<256x128xf32>
    %c0_3 = arith.constant 0 : index
    %c0_4 = arith.constant 0 : index
    %c0_5 = arith.constant 0 : index
    %c0_6 = arith.constant 0 : index
    %3 = vector.load %arg3[%c0_3, %c0_4, %c0_5, %c0_6] : memref<1x16x16x128xbf16, #tpu.memory_space<vmem>>, vector<1x16x16x128xbf16>
    %4 = vector.shape_cast %3 : vector<1x16x16x128xbf16> to vector<256x128xbf16>
    %5 = arith.extf %4 : vector<256x128xbf16> to vector<256x128xf32>
    %c0_7 = arith.constant 0 : index
    %c0_8 = arith.constant 0 : index
    %6 = vector.load %arg2[%c0_7, %c0_8] : memref<8x128xf32, #tpu.memory_space<vmem>>, vector<1x128xf32>
    %c1 = arith.constant 1 : index
    %c0_9 = arith.constant 0 : index
    %7 = vector.load %arg2[%c1, %c0_9] : memref<8x128xf32, #tpu.memory_space<vmem>>, vector<1x128xf32>
    %8 = vector.broadcast %6 : vector<1x128xf32> to vector<256x128xf32>
    %9 = arith.mulf %2, %8 : vector<256x128xf32>
    %10 = vector.broadcast %7 : vector<1x128xf32> to vector<256x128xf32>
    %11 = arith.addf %9, %10 : vector<256x128xf32>
    %12 = arith.addf %11, %5 : vector<256x128xf32>
    %cst = arith.constant 0.000000e+00 : f32
    %13 = vector.broadcast %cst : f32 to vector<256x128xf32>
    %14 = arith.maximumf %12, %13 : vector<256x128xf32>
    %15 = vector.shape_cast %14 : vector<256x128xf32> to vector<1x16x16x128xf32>
    %c0_10 = arith.constant 0 : index
    %c0_11 = arith.constant 0 : index
    %c0_12 = arith.constant 0 : index
    %c0_13 = arith.constant 0 : index
    %16 = vector.load %arg4[%c0_10, %c0_11, %c0_12, %c0_13] : memref<1x16x16x128xf32, #tpu.memory_space<vmem>>, vector<1x16x16x128xf32>
    tpu.vector_store %arg4[%c0_10, %c0_11, %c0_12, %c0_13], %15 {strides = array<i32>} : memref<1x16x16x128xf32, #tpu.memory_space<vmem>>, vector<1x16x16x128xf32>,
    return
  }
  func.func @transform_0(%arg0: i32) -> (i32, i32, i32, i32) {
    %c0_i32 = arith.constant 0 : i32
    %c0_i32_0 = arith.constant 0 : i32
    %c0_i32_1 = arith.constant 0 : i32
    %c0_i32_2 = arith.constant 0 : i32
    return %arg0, %c0_i32, %c0_i32_0, %c0_i32_1 : i32, i32, i32, i32
  }
  func.func @transform_1(%arg0: i32) -> (i32, i32) {
    %c0_i32 = arith.constant 0 : i32
    %c0_i32_0 = arith.constant 0 : i32
    %c0_i32_1 = arith.constant 0 : i32
    return %c0_i32, %c0_i32_0 : i32, i32
  }
  func.func @transform_2(%arg0: i32) -> (i32, i32, i32, i32) {
    %c0_i32 = arith.constant 0 : i32
    %c0_i32_0 = arith.constant 0 : i32
    %c0_i32_1 = arith.constant 0 : i32
    %c0_i32_2 = arith.constant 0 : i32
    return %arg0, %c0_i32, %c0_i32_0, %c0_i32_1 : i32, i32, i32, i32
  }
  func.func @transform_3(%arg0: i32) -> (i32, i32, i32, i32) {
    %c0_i32 = arith.constant 0 : i32
    %c0_i32_0 = arith.constant 0 : i32
    %c0_i32_1 = arith.constant 0 : i32
    %c0_i32_2 = arith.constant 0 : i32
    return %arg0, %c0_i32, %c0_i32_0, %c0_i32_1 : i32, i32, i32, i32
  }
}

</mosaic_0001>

<bundles_post_ra>
// kernel: basic_block_forward.5
= control target key start
LH: loop header
LB: loop body
LE: loop exit
PB: predicated region body
PF: predicated region fallthrough
CT: control target
= control target key end

     0   :  { %8 = vsyncpa [#allocation3], 0  ;;  %s1489_s0 = inlined_call_operand.hbm [shape: bf16[2,16,16,128], index: 0, kind: input, shape index: {}]   ;;  %s1490_s1 = inlined_call_operand.hbm [shape: f32[8,128], index: 1, kind: input, shape index: {}]   ;;  %s1491_s2 = inlined_call_operand.hbm [shape: bf16[2,16,16,128], index: 2, kind: input, shape index: {}]   ;;  %s1492_s3 = inlined_call_operand.hbm [shape: f32[2,16,16,128], index: 3, kind: output, shape index: {}]  }
   0x1   :  { %10 = vsyncpa [#allocation3 + $0x1], 0 }
   0x2   :  { %11 = vsyncpa [#allocation6], 0 }
   0x3   :  { %12 = vsyncpa [#allocation4], 0 }
   0x4   :  { %14 = vsyncpa [#allocation4 + $0x1], 0  ;;  %s1095_s12 = smov 0   ;;  %s1097_s13 = smov 0  }
   0x5   :  { %s1099_s14 = smov 0   ;;  %s1101_s15 = smov 0  }
   0x6 LB: > { %s1116_s16 = sadd.s32 1, %s1065_s15   ;;  %s27_s17 = sadd.s32 1, %s1061_s14  ;;  %s1065_s15 = sphi %s1101_s15, %s1515_s15   ;;  %s1061_s14 = sphi %s1099_s14, %s1514_s14   ;;  %s1057_s13 = sphi %s1097_s13, %s1513_s13   ;;  %s1053_s12 = sphi %s1095_s12, %s1512_s12  }
   0x7   : > { %s24_s18 = ssub.s32 %s1065_s15, %s1116_s16  ;;  %p34_p0 = scmp.ne.s32.totalorder %s1061_s14, %s1057_s13 }
   0x8   : > { %p25_p1 = scmp.eq.s32.totalorder %s24_s18, 0  ;;  %p35_p2 = scmp.eq.s32.totalorder %s1065_s15, 0 }
   0x9   : > { %p863_p4 = scmp.lt.s32.totalorder %s1065_s15, 2  ;;  %s148_s20 = sand.u32 1, %s1065_s15  }
   0xa   : > { %s1127_s19 = scalar_select %p25_p1, %s1061_s14, %s27_s17  }
   0xb   : > { %p36_p5 = por %p35_p2, %p34_p0  ;;  %s150_s21 = sand.u32 1, %s1061_s14  }
   0xc   : > { %s1134_s22 = sshll.u32 %s150_s21, 7  ;;  %s676_s23 = sshll.u32 %s1065_s15, 11 }
   0xd   : > { %s1142_s26 = scalar_lea.hbm %s1489_s0, %s676_s23  ;;  %s152_s27 = scalar_lea.vmem [#allocation2], %s1134_s22 }
   0xe   : > { %s159_s28 = sshll.u32 %s152_s27, 4  ;;  %p1145_p6 = pnand %p863_p4, %p36_p5  ;;  %s1149_s28 = int_to_ptr.vmem [resolvable:$true] %s159_s28 }
   0xf   : > { %s1151_s30 = scalar_lea.sflag [#allocation3], %s148_s20  ;;  %s903_s4 = scalar_lea.hbm %s1142_s26, 2048 }
  0x10   : > { %p904_p7 = scmp.ne.s32.totalorder %s1142_s26, %s903_s4  ;;  %p905_p8 = pneg %p1145_p6 }
  0x11   : > { %s908_s7 = scalar_lea.hbm %s1489_s0, 4096  ;;  %p909_p11 = scmp.lt.u32.totalorder %s1142_s26, %s1489_s0 }
  0x12   : > { %p906_p9 = pnand %p905_p8, %p904_p7  ;;  %p910_p12 = scmp.lt.u32.totalorder %s908_s7, %s903_s4 }
  0x13   : > { %p912_p1 = scmp.lt.u32.totalorder %s903_s4, %s1142_s26 }
  0x14   : > { %p907_p10 = pneg %p906_p9  ;;  %p911_p13 = por %p910_p12, %p909_p11 }
  0x16   : > { %p913_p2 = por %p912_p1, %p911_p13 }
  0x18   : > { %p914_p4 = pnand %p913_p2, %p907_p10 }
  0x1a   : > { %917 = shalt.err (!%p914_p4)
}
  0x1b   : > { %s918_s10 = scalar_lea.vmem %s1149_s28, 2048  ;;  %s1067_s11 = smov [#allocation2]  }
  0x1c   : > { %p919_p5 = scmp.ne.s32.totalorder %s1149_s28, %s918_s10  ;;  %s923_s17 = sshll.u32 %s1067_s11, 4  ;;  %s924_s17 = int_to_ptr.vmem [resolvable:$false] %s923_s17 }
  0x1d   : > { %s925_s18 = scalar_lea.vmem %s924_s17, 4096  ;;  %p926_p3 = scmp.lt.s32.totalorder %s1149_s28, %s924_s17 }
  0x1e   : > { %p921_p7 = pnand %p919_p5, %p905_p8  ;;  %p927_p11 = scmp.lt.s32.totalorder %s925_s18, %s918_s10 }
  0x20   : > { %p922_p9 = pneg %p921_p7  ;;  %p928_p12 = por %p927_p11, %p926_p3 }
  0x22   : > { %p929_p13 = pnand %p928_p12, %p922_p9 }
  0x24   : > { %932 = shalt.err (!%p929_p13)
}
  0x25   : > { %s1068_s20 = smov 64   ;;  %s1069_s21 = smov 4  }
  0x26   : > { %854 = dma.hbm_to_vmem [thread:$0]  (!%p1145_p6), %s1142_s26, 2048, %s1149_s28, %s1151_s30, %s1068_s20, %s1068_s20, %s1069_s21  }
  0x27   : > { %s173_s24 = scalar_lea.vmem [#allocation7], %s1134_s22  ;;  %s1184_s27 = sadd.s32 4294967295, %s1065_s15  }
  0x28   : > { %s180_s25 = sshll.u32 %s173_s24, 4  ;;  %s654_s4 = sadd.s32 4294967294, %s1065_s15   ;;  %s1217_s25 = int_to_ptr.vmem [resolvable:$true] %s180_s25 }
  0x29   : > { %p40_p3 = scmp.ne.s32.totalorder %s1057_s13, %s1053_s12  ;;  %p1493_p10 = scmp.eq.s32.totalorder %s1184_s27, 0 }
  0x2a   : > { %p111_p1 = scmp.eq.s32.totalorder %s1184_s27, 1  ;;  %p117_p2 = scmp.eq.s32.totalorder %s654_s4, 1 }
  0x2b   : > { %p1193_p4 = por %p1493_p10, %p40_p3  ;;  %p655_p5 = scmp.ge.s32.totalorder %s1065_s15, 1 }
  0x2c   : > { %p1201_p7 = por %p111_p1, %p34_p0  ;;  %p1205_p9 = por %p117_p2, %p40_p3 }
  0x2d   : > { %s1498_s5 = scalar_select %p1193_p4, 1, 0 }
  0x2e   : > { %s1499_s22 = scalar_select %p1201_p7, 1, 0 }
  0x2f   : > { %s1500_s26 = scalar_select %p1205_p9, 1, 0 }
  0x30   : > { %p124_p11 = scmp.lt.s32.totalorder %s1065_s15, 3  ;;  %s1215_s7 = scalar_lea.hbm %s1491_s2, %s676_s23 }
  0x31   : > { %s1070_s9 = smov [#allocation5]   ;;  %s933_s11 = scalar_lea.hbm %s1215_s7, 2048 }
  0x32   : > { %p1219_p0 = pnand %p655_p5, %p124_p11  ;;  %s1223_s10 = sshll.u32 %s1070_s9, 4  ;;  %s138_s10 = int_to_ptr.vmem [resolvable:$true] %s1223_s10 }
  0x33   : > { %p934_p13 = scmp.ne.s32.totalorder %s1215_s7, %s933_s11  ;;  %s938_s18 = scalar_lea.hbm %s1491_s2, 4096 }
  0x34   : > { %s1501_s8 = scalar_select %p1219_p0, 1, 0 }
  0x35   : > { %p936_p3 = pnand %p934_p13, %p905_p8  ;;  %p939_p2 = scmp.lt.u32.totalorder %s1215_s7, %s1491_s2 }
  0x36   : > { %p940_p5 = scmp.lt.u32.totalorder %s938_s18, %s933_s11  ;;  %p942_p10 = scmp.lt.u32.totalorder %s933_s11, %s1215_s7 }
  0x37   : > { %p937_p1 = pneg %p936_p3 }
  0x38   : > { %p941_p11 = por %p940_p5, %p939_p2 }
  0x3a   : > { %p943_p9 = por %p942_p10, %p941_p11 }
  0x3c   : > { %p944_p7 = pnand %p943_p9, %p937_p1 }
  0x3e   : > { %947 = shalt.err (!%p944_p7)
}
  0x3f   : > { %s948_s28 = scalar_lea.vmem %s1217_s25, 2048  ;;  %s1071_s6 = smov [#allocation7]  }
  0x40   : > { %p949_p13 = scmp.ne.s32.totalorder %s1217_s25, %s948_s28  ;;  %s953_s9 = sshll.u32 %s1071_s6, 4  ;;  %s954_s9 = int_to_ptr.vmem [resolvable:$false] %s953_s9 }
  0x41   : > { %s955_s23 = scalar_lea.vmem %s954_s9, 4096  ;;  %p956_p4 = scmp.lt.s32.totalorder %s1217_s25, %s954_s9 }
  0x42   : > { %p951_p3 = pnand %p949_p13, %p905_p8  ;;  %p957_p2 = scmp.lt.s32.totalorder %s955_s23, %s948_s28 }
  0x44   : > { %p952_p12 = pneg %p951_p3  ;;  %p958_p5 = por %p957_p2, %p956_p4 }
  0x46   : > { %p959_p10 = pnand %p958_p5, %p952_p12 }
  0x48   : > { %962 = shalt.err (!%p959_p10)
}
  0x49   : > { %857 = dma.hbm_to_vmem [thread:$0]  (!%p1145_p6), %s1215_s7, 2048, %s1217_s25, %s1151_s30, %s1068_s20, %s1068_s20, %s1069_s21  }
  0x4a   : > { %p1502_p8 = scmp.eq.s32.totalorder %s1184_s27, 0  ;;  %p1503_p7 = pneg %p1219_p0 }
  0x4b   : > { %s963_s18 = scalar_lea.hbm %s1490_s1, 128 }
  0x4c   : > { %p1260_p9 = pnand %p1503_p7, %p1502_p8  ;;  %p964_p4 = scmp.ne.s32.totalorder %s1490_s1, %s963_s18 }
  0x4d   : > { %p970_p11 = scmp.lt.u32.totalorder %s963_s18, %s1490_s1 }
  0x4e   : > { %p965_p12 = pneg %p1260_p9 }
  0x50   : > { %p966_p6 = pnand %p965_p12, %p964_p4 }
  0x52   : > { %p967_p1 = pneg %p966_p6 }
  0x54   : > { %p972_p13 = pnand %p970_p11, %p967_p1 }
  0x56   : > { %975 = shalt.err (!%p972_p13)
}
  0x57   : > { %s976_s21 = scalar_lea.vmem %s138_s10, 128  ;;  %p984_p10 = scmp.lt.s32.totalorder %s138_s10, %s138_s10 }
  0x58   : > { %p977_p3 = scmp.ne.s32.totalorder %s138_s10, %s976_s21  ;;  %p985_p8 = scmp.lt.s32.totalorder %s976_s21, %s976_s21 }
  0x5a   : > { %p979_p2 = pnand %p977_p3, %p965_p12  ;;  %p986_p7 = por %p985_p8, %p984_p10 }
  0x5c   : > { %p980_p5 = pneg %p979_p2 }
  0x5e   : > { %p987_p0 = pnand %p986_p7, %p980_p5 }
  0x60   : > { %990 = shalt.err (!%p987_p0)
}
  0x61   : > { %850 = dma.hbm_to_vmem [thread:$0]  (!%p1260_p9), %s1490_s1, 128, %s138_s10, [#allocation6]  }
  0x62   : > { %p1505_p4 = scmp.ne.s32.totalorder %s1501_s8, 0 }
  0x63   : > { %s194_s28 = sand.u32 (!%p1505_p4), 1, %s1184_s27   ;;  %s1284_s6 = sand.u32 (!%p1505_p4), 1, %s1057_s13  }
  0x64   : > { %192 = sbr.rel (%p1505_p4) target bundleno = 184 (0xb8), region = 32  ;;  %s665_s9 = sshll.u32 (!%p1505_p4), %s1284_s6, 7 }
  0x65   : > { %s195_s23 = scalar_lea.sflag (!%p1505_p4), [#allocation3], %s194_s28  ;;  %s1287_s17 = scalar_lea.vmem (!%p1505_p4), [#allocation2], %s665_s9 }
  0x66   : > { %p1506_p0 = scmp.ne.s32.totalorder (!%p1505_p4), %s1498_s5, 0 }
  0x6b   : > { %1036 = dma.done.wait (%p1506_p0), %s195_s23, 2048  }
  0x6c   : > { %1038 = vsyncadd (%p1506_p0), %s195_s23, 4294965248  ;;  %p1507_p9 = scmp.eq.s32.totalorder %s1184_s27, 0 }
  0x6e   : > { %1040 = dma.done.wait (%p1507_p9), [#allocation6], 128   ;;  %p1508_p12 = pmov %p1507_p9 }
  0x6f   : > { %s1297_s8 = scalar_lea.vmem [#allocation7], %s665_s9 }
  0x70   : > { %1042 = vsyncadd (%p1508_p12), [#allocation6], 4294967168 }
  0x71   : > { %1044 = dma.done.wait (%p1506_p0), %s195_s23, 2048  }
  0x72   : > { %1046 = vsyncadd (%p1506_p0), %s195_s23, 4294965248  ;;  %v680_v0 = vld [vmem:[%s1287_s17] sm:$0xff]   ;;  %v744_v1 = vld [vmem:[%s1297_s8] sm:$0xff]   ;;  %s668_s5 = sshll.u32 %s1284_s6, 8  ;;  %s678_s11 = sshll.u32 %s1184_s27, 12 }
  0x73   : > { %v1305_v2 = vld [vmem:[#allocation5] ss:$0 sm:$0xff]  ;;  %v681_v3 = vunpack.c.l.bf16 %v680_v0  ;;  %v745_v4 = vunpack.c.l.bf16 %v744_v1  ;;  %v1307_v5 = vld [vmem:[#allocation5 + $0x1] ss:$0 sm:$0xff]  ;;  %v682_v6 = vunpack.c.h.bf16 %v680_v0  ;;  %v746_v7 = vunpack.c.h.bf16 %v744_v1  ;;  %v807_v8 = vld [vmem:[%s1287_s17 + $0x8] sm:$0xff]   ;;  %s1333_s10 = scalar_lea.vmem [#allocation8], %s668_s5  ;;  %s1441_s4 = scalar_lea.hbm %s1492_s3, %s678_s11 }
  0x74   : > { %v822_v9 = vld [vmem:[%s1297_s8 + $0x8] sm:$0xff]   ;;  %v685_v10 = vunpack.c.l.bf16 %v807_v8  ;;  %v686_v12 = vunpack.c.h.bf16 %v807_v8  ;;  %v823_v15 = vld [vmem:[%s1297_s8 + $0x10] sm:$0xff]   ;;  %v824_v21 = vld [vmem:[%s1297_s8 + $0x18] sm:$0xff]   ;;  %s551_s29 = sshll.u32 %s1333_s10, 4  ;;  %s538_s27 = scalar_lea.sflag [#allocation4], %s1284_s6  ;;  %s1443_s29 = int_to_ptr.vmem [resolvable:$true] %s551_s29 }
  0x75   : > { %v749_v11 = vunpack.c.l.bf16 %v822_v9  ;;  %v750_v13 = vunpack.c.h.bf16 %v822_v9  ;;  %v808_v14 = vld [vmem:[%s1287_s17 + $0x10] sm:$0xff]   ;;  %v809_v16 = vld [vmem:[%s1287_s17 + $0x18] sm:$0xff]   ;;  %v373_v17 = vmul.f32 %v681_v3, %v1305_v2  ;;  %v374_v18 = vmul.f32 %v682_v6, %v1305_v2  ;;  %v810_v42 = vld [vmem:[%s1287_s17 + $0x20] sm:$0xff]   ;;  %s991_s30 = scalar_lea.vmem %s1443_s29, 4096  ;;  %p1509_p1 = scmp.ne.s32.totalorder %s1499_s22, 0 }
  0x76   : > { %v689_v19 = vunpack.c.l.bf16 %v808_v14  ;;  %v753_v20 = vunpack.c.l.bf16 %v823_v15  ;;  %v375_v22 = vmul.f32 %v685_v10, %v1305_v2  ;;  %v376_v23 = vmul.f32 %v686_v12, %v1305_v2  ;;  %v825_v47 = vld [vmem:[%s1297_s8 + $0x20] sm:$0xff]   ;;  %v826_v57 = vld [vmem:[%s1297_s8 + $0x28] sm:$0xff]   ;;  %p992_p6 = scmp.ne.s32.totalorder %s1443_s29, %s991_s30  ;;  %s1072_s20 = smov [#allocation8]  }
  0x77   : > { %v690_v24 = vunpack.c.h.bf16 %v808_v14  ;;  %v754_v25 = vunpack.c.h.bf16 %v823_v15  ;;  %v409_v26 = vadd.f32 %v1307_v5, %v373_v17  ;;  %v410_v27 = vadd.f32 %v1307_v5, %v374_v18  ;;  %v811_v52 = vld [vmem:[%s1287_s17 + $0x28] sm:$0xff]   ;;  %v812_v62 = vld [vmem:[%s1287_s17 + $0x30] sm:$0xff]   ;;  %v813_v18 = vld [vmem:[%s1287_s17 + $0x38] sm:$0xff]   ;;  %s995_s21 = sshll.u32 %s1072_s20, 4  ;;  %s996_s21 = int_to_ptr.vmem [resolvable:$false] %s995_s21 }
  0x78   : > { %v377_v28 = vmul.f32 %v689_v19, %v1305_v2  ;;  %v693_v29 = vunpack.c.l.bf16 %v809_v16  ;;  %v411_v30 = vadd.f32 %v1307_v5, %v375_v22  ;;  %v412_v31 = vadd.f32 %v1307_v5, %v376_v23  ;;  %v828_v23 = vld [vmem:[%s1297_s8 + $0x38] sm:$0xff]   ;;  %p993_p11 = pnand %p992_p6, %p1509_p1  ;;  %s997_s25 = scalar_lea.vmem %s996_s21, 8192 }
  0x79   : > { %v378_v32 = vmul.f32 %v690_v24, %v1305_v2  ;;  %v757_v33 = vunpack.c.l.bf16 %v824_v21  ;;  %v441_v34 = vadd.f32 %v745_v4, %v409_v26  ;;  %v442_v35 = vadd.f32 %v746_v7, %v410_v27  ;;  %v827_v4 = vld [vmem:[%s1297_s8 + $0x30] sm:$0xff]   ;;  %p998_p3 = scmp.lt.s32.totalorder %s1443_s29, %s996_s21  ;;  %p999_p2 = scmp.lt.s32.totalorder %s997_s25, %s991_s30 }
  0x7a   : > { %v413_v36 = vadd.f32 %v1307_v5, %v377_v28  ;;  %v379_v37 = vmul.f32 %v693_v29, %v1305_v2  ;;  %v443_v38 = vadd.f32 %v749_v11, %v411_v30  ;;  %v444_v39 = vadd.f32 %v750_v13, %v412_v31  ;;  %p994_p13 = pneg %p993_p11 }
  0x7b   : > { %v414_v40 = vadd.f32 %v1307_v5, %v378_v32  ;;  %v694_v41 = vunpack.c.h.bf16 %v809_v16  ;;  %v473_v43 = vmax.f32 %v441_v34, 0.0  ;;  %v474_v44 = vmax.f32 %v442_v35, 0.0  ;;  %v814_v32 = vld [vmem:[%s1287_s17 + $0x40] sm:$0xff]   ;;  %p1000_p5 = por %p999_p2, %p998_p3 }
  0x7c   : > { %v445_v45 = vadd.f32 %v753_v20, %v413_v36  ;;  %v415_v46 = vadd.f32 %v1307_v5, %v379_v37  ;;  %v475_v48 = vmax.f32 %v443_v38, 0.0  ;;  %v476_v49 = vmax.f32 %v444_v39, 0.0  ;;  %v829_v37 = vld [vmem:[%s1297_s8 + $0x40] sm:$0xff]  }
  0x7d   : > { %v446_v50 = vadd.f32 %v754_v25, %v414_v40  ;;  %v758_v51 = vunpack.c.h.bf16 %v824_v21  ;;  %505 = vst [vmem:[%s1333_s10] sm:$0xff] %v473_v43  ;;  %506 = vst [vmem:[%s1333_s10 + $0x8] sm:$0xff] %v474_v44  ;;  %v380_v55 = vmul.f32 %v694_v41, %v1305_v2  ;;  %v697_v56 = vunpack.c.l.bf16 %v810_v42  ;;  %p1001_p10 = pnand %p1000_p5, %p994_p13 }
  0x7e   : > { %v477_v53 = vmax.f32 %v445_v45, 0.0  ;;  %v447_v54 = vadd.f32 %v757_v33, %v415_v46  ;;  %507 = vst [vmem:[%s1333_s10 + $0x10] sm:$0xff] %v475_v48  ;;  %508 = vst [vmem:[%s1333_s10 + $0x18] sm:$0xff] %v476_v49  ;;  %v761_v59 = vunpack.c.l.bf16 %v825_v47  ;;  %v698_v60 = vunpack.c.h.bf16 %v810_v42  ;;  %v815_v46 = vld [vmem:[%s1287_s17 + $0x48] sm:$0xff]  }
  0x7f   : > { %v478_v58 = vmax.f32 %v446_v50, 0.0  ;;  %v762_v61 = vunpack.c.h.bf16 %v825_v47  ;;  %v416_v0 = vadd.f32 %v1307_v5, %v380_v55  ;;  %v381_v1 = vmul.f32 %v697_v56, %v1305_v2  ;;  %v830_v47 = vld [vmem:[%s1297_s8 + $0x48] sm:$0xff]  }
  0x80   : > { %509 = vst [vmem:[%s1333_s10 + $0x20] sm:$0xff] %v477_v53  ;;  %v479_v63 = vmax.f32 %v447_v54, 0.0  ;;  %v701_v3 = vunpack.c.l.bf16 %v811_v52  ;;  %v382_v6 = vmul.f32 %v698_v60, %v1305_v2  ;;  %v765_v7 = vunpack.c.l.bf16 %v826_v57  ;;  %v816_v56 = vld [vmem:[%s1287_s17 + $0x50] sm:$0xff]  }
  0x81   : > { %510 = vst [vmem:[%s1333_s10 + $0x28] sm:$0xff] %v478_v58  ;;  %v702_v8 = vunpack.c.h.bf16 %v811_v52  ;;  %v766_v9 = vunpack.c.h.bf16 %v826_v57  ;;  %v448_v10 = vadd.f32 %v758_v51, %v416_v0  ;;  %v417_v11 = vadd.f32 %v1307_v5, %v381_v1 }
  0x82   : > { %511 = vst [vmem:[%s1333_s10 + $0x30] sm:$0xff] %v479_v63  ;;  %v383_v12 = vmul.f32 %v701_v3, %v1305_v2  ;;  %v705_v13 = vunpack.c.l.bf16 %v812_v62  ;;  %v418_v14 = vadd.f32 %v1307_v5, %v382_v6  ;;  %v769_v16 = vunpack.c.l.bf16 %v827_v4 }
  0x83   : > { %v384_v15 = vmul.f32 %v702_v8, %v1305_v2  ;;  %v706_v17 = vunpack.c.h.bf16 %v812_v62  ;;  %v480_v19 = vmax.f32 %v448_v10, 0.0  ;;  %v449_v20 = vadd.f32 %v761_v59, %v417_v11 }
  0x84   : > { %v419_v21 = vadd.f32 %v1307_v5, %v383_v12  ;;  %v385_v22 = vmul.f32 %v705_v13, %v1305_v2  ;;  %v450_v24 = vadd.f32 %v762_v61, %v418_v14  ;;  %v770_v26 = vunpack.c.h.bf16 %v827_v4  ;;  %v831_v61 = vld [vmem:[%s1297_s8 + $0x50] sm:$0xff]  }
  0x85   : > { %v420_v25 = vadd.f32 %v1307_v5, %v384_v15  ;;  %v386_v27 = vmul.f32 %v706_v17, %v1305_v2  ;;  %512 = vst [vmem:[%s1333_s10 + $0x38] sm:$0xff] %v480_v19  ;;  %v481_v28 = vmax.f32 %v449_v20, 0.0  ;;  %v709_v31 = vunpack.c.l.bf16 %v813_v18  ;;  %v817_v12 = vld [vmem:[%s1287_s17 + $0x58] sm:$0xff]   ;;  %v832_v17 = vld [vmem:[%s1297_s8 + $0x58] sm:$0xff]  }
  0x86   : > { %v451_v29 = vadd.f32 %v765_v7, %v419_v21  ;;  %v421_v30 = vadd.f32 %v1307_v5, %v385_v22  ;;  %v482_v33 = vmax.f32 %v450_v24, 0.0  ;;  %v773_v36 = vunpack.c.l.bf16 %v828_v23 }
  0x87   : > { %v452_v34 = vadd.f32 %v766_v9, %v420_v25  ;;  %v422_v35 = vadd.f32 %v1307_v5, %v386_v27  ;;  %513 = vst [vmem:[%s1333_s10 + $0x40] sm:$0xff] %v481_v28  ;;  %v387_v40 = vmul.f32 %v709_v31, %v1305_v2  ;;  %v710_v41 = vunpack.c.h.bf16 %v813_v18  ;;  %v833_v31 = vld [vmem:[%s1297_s8 + $0x60] sm:$0xff]  }
  0x88   : > { %v483_v38 = vmax.f32 %v451_v29, 0.0  ;;  %v453_v39 = vadd.f32 %v769_v16, %v421_v30  ;;  %514 = vst [vmem:[%s1333_s10 + $0x48] sm:$0xff] %v482_v33  ;;  %v774_v44 = vunpack.c.h.bf16 %v828_v23  ;;  %v713_v45 = vunpack.c.l.bf16 %v814_v32 }
  0x89   : > { %v484_v42 = vmax.f32 %v452_v34, 0.0  ;;  %v454_v43 = vadd.f32 %v770_v26, %v422_v35  ;;  %v423_v49 = vadd.f32 %v1307_v5, %v387_v40  ;;  %v388_v50 = vmul.f32 %v710_v41, %v1305_v2  ;;  %v818_v26 = vld [vmem:[%s1287_s17 + $0x60] sm:$0xff]   ;;  %v819_v40 = vld [vmem:[%s1287_s17 + $0x68] sm:$0xff]   ;;  %v834_v41 = vld [vmem:[%s1297_s8 + $0x68] sm:$0xff]  }
  0x8a   : > { %515 = vst [vmem:[%s1333_s10 + $0x50] sm:$0xff] %v483_v38  ;;  %v485_v48 = vmax.f32 %v453_v39, 0.0  ;;  %v777_v51 = vunpack.c.l.bf16 %v829_v37  ;;  %v389_v53 = vmul.f32 %v713_v45, %v1305_v2  ;;  %v714_v54 = vunpack.c.h.bf16 %v814_v32 }
  0x8b   : > { %516 = vst [vmem:[%s1333_s10 + $0x58] sm:$0xff] %v484_v42  ;;  %v486_v52 = vmax.f32 %v454_v43, 0.0  ;;  %v778_v55 = vunpack.c.h.bf16 %v829_v37  ;;  %v455_v57 = vadd.f32 %v773_v36, %v423_v49  ;;  %v424_v58 = vadd.f32 %v1307_v5, %v388_v50  ;;  %v820_v50 = vld [vmem:[%s1287_s17 + $0x70] sm:$0xff]  }
  0x8c   : > { %517 = vst [vmem:[%s1333_s10 + $0x60] sm:$0xff] %v485_v48  ;;  %v717_v59 = vunpack.c.l.bf16 %v815_v46  ;;  %v781_v60 = vunpack.c.l.bf16 %v830_v47  ;;  %v425_v62 = vadd.f32 %v1307_v5, %v389_v53  ;;  %v390_v63 = vmul.f32 %v714_v54, %v1305_v2 }
  0x8d   : > { %518 = vst [vmem:[%s1333_s10 + $0x68] sm:$0xff] %v486_v52  ;;  %v718_v0 = vunpack.c.h.bf16 %v815_v46  ;;  %v782_v1 = vunpack.c.h.bf16 %v830_v47  ;;  %v487_v3 = vmax.f32 %v455_v57, 0.0  ;;  %v456_v4 = vadd.f32 %v774_v44, %v424_v58 }
  0x8e   : > { %v391_v6 = vmul.f32 %v717_v59, %v1305_v2  ;;  %v721_v7 = vunpack.c.l.bf16 %v816_v56  ;;  %v457_v8 = vadd.f32 %v777_v51, %v425_v62  ;;  %v426_v9 = vadd.f32 %v1307_v5, %v390_v63  ;;  %v835_v59 = vld [vmem:[%s1297_s8 + $0x70] sm:$0xff]  }
  0x8f   : > { %v392_v10 = vmul.f32 %v718_v0, %v1305_v2  ;;  %v785_v11 = vunpack.c.l.bf16 %v831_v61  ;;  %519 = vst [vmem:[%s1333_s10 + $0x70] sm:$0xff] %v487_v3  ;;  %v488_v13 = vmax.f32 %v456_v4, 0.0  ;;  %v722_v16 = vunpack.c.h.bf16 %v816_v56 }
  0x90   : > { %v427_v14 = vadd.f32 %v1307_v5, %v391_v6  ;;  %v393_v15 = vmul.f32 %v721_v7, %v1305_v2  ;;  %v489_v18 = vmax.f32 %v457_v8, 0.0  ;;  %v458_v19 = vadd.f32 %v778_v55, %v426_v9  ;;  %v821_v6 = vld [vmem:[%s1287_s17 + $0x78] sm:$0xff]  }
  0x91   : > { %v428_v20 = vadd.f32 %v1307_v5, %v392_v10  ;;  %v786_v21 = vunpack.c.h.bf16 %v831_v61  ;;  %520 = vst [vmem:[%s1333_s10 + $0x78] sm:$0xff] %v488_v13  ;;  %v394_v24 = vmul.f32 %v722_v16, %v1305_v2  ;;  %v725_v25 = vunpack.c.l.bf16 %v817_v12 }
  0x92   : > { %v459_v22 = vadd.f32 %v781_v60, %v427_v14  ;;  %v429_v23 = vadd.f32 %v1307_v5, %v393_v15  ;;  %521 = vst [vmem:[%s1333_s10 + $0x80] sm:$0xff] %v489_v18  ;;  %v490_v27 = vmax.f32 %v458_v19, 0.0  ;;  %v789_v29 = vunpack.c.l.bf16 %v832_v17 }
  0x93   : > { %v460_v28 = vadd.f32 %v782_v1, %v428_v20  ;;  %v726_v30 = vunpack.c.h.bf16 %v817_v12  ;;  %v430_v34 = vadd.f32 %v1307_v5, %v394_v24  ;;  %v395_v35 = vmul.f32 %v725_v25, %v1305_v2 }
  0x94   : > { %v491_v32 = vmax.f32 %v459_v22, 0.0  ;;  %v461_v33 = vadd.f32 %v785_v11, %v429_v23  ;;  %522 = vst [vmem:[%s1333_s10 + $0x88] sm:$0xff] %v490_v27  ;;  %v790_v37 = vunpack.c.h.bf16 %v832_v17  ;;  %v729_v39 = vunpack.c.l.bf16 %v818_v26  ;;  %v836_v11 = vld [vmem:[%s1297_s8 + $0x78] sm:$0xff]  }
  0x95   : > { %v492_v36 = vmax.f32 %v460_v28, 0.0  ;;  %v396_v38 = vmul.f32 %v726_v30, %v1305_v2  ;;  %v462_v43 = vadd.f32 %v786_v21, %v430_v34  ;;  %v431_v44 = vadd.f32 %v1307_v5, %v395_v35 }
  0x96   : > { %523 = vst [vmem:[%s1333_s10 + $0x90] sm:$0xff] %v491_v32  ;;  %v493_v42 = vmax.f32 %v461_v33, 0.0  ;;  %v793_v45 = vunpack.c.l.bf16 %v833_v31  ;;  %v397_v47 = vmul.f32 %v729_v39, %v1305_v2  ;;  %v730_v48 = vunpack.c.h.bf16 %v818_v26 }
  0x97   : > { %524 = vst [vmem:[%s1333_s10 + $0x98] sm:$0xff] %v492_v36  ;;  %v432_v46 = vadd.f32 %v1307_v5, %v396_v38  ;;  %v794_v49 = vunpack.c.h.bf16 %v833_v31  ;;  %v494_v51 = vmax.f32 %v462_v43, 0.0  ;;  %v463_v52 = vadd.f32 %v789_v29, %v431_v44 }
  0x98   : > { %525 = vst [vmem:[%s1333_s10 + $0xa0] sm:$0xff] %v493_v42  ;;  %v733_v53 = vunpack.c.l.bf16 %v819_v40  ;;  %v797_v54 = vunpack.c.l.bf16 %v834_v41  ;;  %v433_v56 = vadd.f32 %v1307_v5, %v397_v47  ;;  %v398_v57 = vmul.f32 %v730_v48, %v1305_v2 }
  0x99   : > { %v464_v55 = vadd.f32 %v790_v37, %v432_v46  ;;  %v734_v58 = vunpack.c.h.bf16 %v819_v40  ;;  %526 = vst [vmem:[%s1333_s10 + $0xa8] sm:$0xff] %v494_v51  ;;  %v495_v60 = vmax.f32 %v463_v52, 0.0  ;;  %v798_v62 = vunpack.c.h.bf16 %v834_v41 }
  0x9a   : > { %v399_v61 = vmul.f32 %v733_v53, %v1305_v2  ;;  %v737_v63 = vunpack.c.l.bf16 %v820_v50  ;;  %v465_v1 = vadd.f32 %v793_v45, %v433_v56  ;;  %v434_v3 = vadd.f32 %v1307_v5, %v398_v57 }
  0x9b   : > { %v496_v0 = vmax.f32 %v464_v55, 0.0  ;;  %v400_v4 = vmul.f32 %v734_v58, %v1305_v2  ;;  %527 = vst [vmem:[%s1333_s10 + $0xb0] sm:$0xff] %v495_v60  ;;  %v801_v8 = vunpack.c.l.bf16 %v835_v59  ;;  %v738_v10 = vunpack.c.h.bf16 %v820_v50 }
  0x9c   : > { %v435_v7 = vadd.f32 %v1307_v5, %v399_v61  ;;  %v401_v9 = vmul.f32 %v737_v63, %v1305_v2  ;;  %v497_v12 = vmax.f32 %v465_v1, 0.0  ;;  %v466_v13 = vadd.f32 %v794_v49, %v434_v3 }
  0x9d   : > { %528 = vst [vmem:[%s1333_s10 + $0xb8] sm:$0xff] %v496_v0  ;;  %v436_v14 = vadd.f32 %v1307_v5, %v400_v4  ;;  %v802_v15 = vunpack.c.h.bf16 %v835_v59  ;;  %v402_v18 = vmul.f32 %v738_v10, %v1305_v2  ;;  %v741_v19 = vunpack.c.l.bf16 %v821_v6 }
  0x9e   : > { %v467_v16 = vadd.f32 %v797_v54, %v435_v7  ;;  %v437_v17 = vadd.f32 %v1307_v5, %v401_v9  ;;  %529 = vst [vmem:[%s1333_s10 + $0xc0] sm:$0xff] %v497_v12  ;;  %v498_v20 = vmax.f32 %v466_v13, 0.0  ;;  %v805_v22 = vunpack.c.l.bf16 %v836_v11 }
  0x9f   : > { %v468_v21 = vadd.f32 %v798_v62, %v436_v14  ;;  %v742_v23 = vunpack.c.h.bf16 %v821_v6  ;;  %v438_v26 = vadd.f32 %v1307_v5, %v402_v18  ;;  %v403_v27 = vmul.f32 %v741_v19, %v1305_v2 }
  0xa0   : > { %v499_v24 = vmax.f32 %v467_v16, 0.0  ;;  %v469_v25 = vadd.f32 %v801_v8, %v437_v17  ;;  %530 = vst [vmem:[%s1333_s10 + $0xc8] sm:$0xff] %v498_v20  ;;  %v806_v29 = vunpack.c.h.bf16 %v836_v11 }
  0xa1   : > { %v500_v28 = vmax.f32 %v468_v21, 0.0  ;;  %v404_v30 = vmul.f32 %v742_v23, %v1305_v2  ;;  %v470_v32 = vadd.f32 %v802_v15, %v438_v26  ;;  %v439_v33 = vadd.f32 %v1307_v5, %v403_v27 }
  0xa2   : > { %531 = vst [vmem:[%s1333_s10 + $0xd0] sm:$0xff] %v499_v24  ;;  %v501_v31 = vmax.f32 %v469_v25, 0.0 }
  0xa3   : > { %532 = vst [vmem:[%s1333_s10 + $0xd8] sm:$0xff] %v500_v28  ;;  %v440_v34 = vadd.f32 %v1307_v5, %v404_v30  ;;  %v502_v35 = vmax.f32 %v470_v32, 0.0  ;;  %v471_v36 = vadd.f32 %v805_v22, %v439_v33 }
  0xa4   : > { %533 = vst [vmem:[%s1333_s10 + $0xe0] sm:$0xff] %v501_v31 }
  0xa5   : > { %v472_v37 = vadd.f32 %v806_v29, %v440_v34  ;;  %534 = vst [vmem:[%s1333_s10 + $0xe8] sm:$0xff] %v502_v35  ;;  %v503_v2 = vmax.f32 %v471_v36, 0.0 }
  0xa7   : > { %v504_v5 = vmax.f32 %v472_v37, 0.0  ;;  %535 = vst [vmem:[%s1333_s10 + $0xf0] sm:$0xff] %v503_v2 }
  0xa9   : > { %536 = vst [vmem:[%s1333_s10 + $0xf8] sm:$0xff] %v504_v5 }
  0xaa   : > { %1004 = shalt.err (!%p1001_p10)
}
  0xab   : > { %s1005_s7 = scalar_lea.hbm %s1441_s4, 4096  ;;  %s1009_s23 = scalar_lea.hbm %s1492_s3, 8192 }
  0xac   : > { %p1006_p8 = scmp.ne.s32.totalorder %s1441_s4, %s1005_s7  ;;  %p1010_p0 = scmp.lt.u32.totalorder %s1441_s4, %s1492_s3 }
  0xad   : > { %p1011_p9 = scmp.lt.u32.totalorder %s1009_s23, %s1005_s7  ;;  %p1013_p6 = scmp.lt.u32.totalorder %s1005_s7, %s1441_s4 }
  0xae   : > { %p1007_p7 = pnand %p1006_p8, %p1509_p1 }
  0xaf   : > { %p1012_p12 = por %p1011_p9, %p1010_p0 }
  0xb0   : > { %p1008_p4 = pneg %p1007_p7 }
  0xb1   : > { %p1014_p11 = por %p1013_p6, %p1012_p12 }
  0xb3   : > { %p1015_p13 = pnand %p1014_p11, %p1008_p4 }
  0xb5   : > { %1018 = shalt.err (!%p1015_p13)
}
  0xb6   : > { %s1073_s5 = smov 128   ;;  %s1074_s10 = smov 8  }
  0xb7   : > { %845 = dma.vmem_to_hbm [thread:$0]  (%p1509_p1), %s1443_s29, 4096, %s1441_s4, %s538_s27, %s1073_s5, %s1073_s5, %s1074_s10  }
  0xb8 PF: > { %s566_s11 = sand.u32 1, %s1053_s12   ;;  %p1510_p3 = scmp.ne.s32.totalorder %s1500_s26, 0 }
  0xb9   : > { %p1511_p2 = scmp.ge.s32.totalorder %s1065_s15, 2  ;;  %s567_s18 = scalar_lea.sflag [#allocation4], %s566_s11 }
  0xbb   : > { %p859_p5 = pnand %p1511_p2, %p1510_p3 }
  0xbd   : > { %1048 = dma.done.wait (!%p859_p5), %s567_s18, 4096  }
  0xbe   : > { %1050 = vsyncadd (!%p859_p5), %s567_s18, 4294963200  ;;  %p17_p10 = scmp.ge.s32.totalorder %s1116_s16, 4   ;;  %s1512_s12 = smov %s1057_s13 }
  0xbf   : > { %s1513_s13 = smov %s1061_s14  ;;  %s1514_s14 = smov %s1127_s19 }
  0xc0   : > { %s1515_s15 = smov %s1116_s16  ;;  %19 = sbr.rel (!%p17_p10) target bundleno = 6 (0x6), region = 92 }
  0xc7   :  { %572 = vsyncpa [#allocation3], 1 }
  0xc8   :  { %574 = vsyncpa [#allocation3 + $0x1], 1 }
  0xc9   :  { %575 = vsyncpa [#allocation6], 1 }
  0xca   :  { %576 = vsyncpa [#allocation4], 1 }
  0xcb   :  { %578 = vsyncpa [#allocation4 + $0x1], 1 }

// kernel: basic_block_forward.4
= control target key start
LH: loop header
LB: loop body
LE: loop exit
PB: predicated region body
PF: predicated region fallthrough
CT: control target
= control target key end

     0   :  { %s5225_s0 = inlined_call_operand.hbm [shape: bf16[2,16,16,128], index: 0, kind: input, shape index: {}]   ;;  %s5226_s1 = inlined_call_operand.hbm [shape: f32[8,128], index: 1, kind: input, shape index: {}]   ;;  %s5227_s2 = inlined_call_operand.hbm [shape: bf16[1152,128], index: 2, kind: input, shape index: {}]   ;;  %s5228_s3 = inlined_call_operand.hbm [shape: bf16[2,16,16,128], index: 3, kind: output, shape index: {0}]   ;;  %s5229_s4 = inlined_call_operand.hbm [shape: f32[2,8,128], index: 4, kind: output, shape index: {1}]  }
   0x1   :  { %5236 = sst [smem:[#allocation16_spill]] %s5226_s1 }
   0x2   :  { %10 = vsyncpa [#allocation3], 0 }
   0x3   :  { %12 = vsyncpa [#allocation3 + $0x1], 0 }
   0x4   :  { %13 = vsyncpa [#allocation6], 0 }
   0x5   :  { %14 = vsyncpa [#allocation4], 0 }
   0x6   :  { %16 = vsyncpa [#allocation4 + $0x1], 0 }
   0x7   :  { %17 = vsyncpa [#allocation10], 0 }
   0x8   :  { %19 = vsyncpa [#allocation10 + $0x1], 0  ;;  %s4011_s15 = smov 0   ;;  %s4013_s16 = smov 0  }
   0x9   :  { %s4015_s17 = smov 0   ;;  %s4017_s18 = smov 0  }
   0xa LB: > { %s4032_s19 = sadd.s32 4294967295, %s3974_s18   ;;  %s2764_s20 = sadd.s32 4294967294, %s3974_s18   ;;  %s3974_s18 = sphi %s4017_s18, %s5261_s18   ;;  %s3970_s17 = sphi %s4015_s17, %s5260_s17   ;;  %s3966_s16 = sphi %s4013_s16, %s5259_s16   ;;  %s3962_s15 = sphi %s4011_s15, %s5258_s15  }
   0xb   : > { %s4036_s21 = sadd.s32 1, %s3974_s18   ;;  %s32_s22 = sadd.s32 1, %s3970_s17 }
   0xc   : > { %s29_s23 = ssub.s32 %s3974_s18, %s4036_s21  ;;  %p39_p0 = scmp.ne.s32.totalorder %s3970_s17, %s3966_s16 }
   0xd   : > { %p30_p1 = scmp.eq.s32.totalorder %s29_s23, 0  ;;  %p40_p2 = scmp.eq.s32.totalorder %s3974_s18, 0 }
   0xe   : > { %p45_p3 = scmp.ne.s32.totalorder %s3966_s16, %s3962_s15  ;;  %p5230_p4 = scmp.eq.s32.totalorder %s4032_s19, 0 }
   0xf   : > { %s4048_s24 = scalar_select %p30_p1, %s3970_s17, %s32_s22  }
  0x10   : > { %p4050_p5 = por %p40_p2, %p39_p0  ;;  %p4056_p6 = por %p5230_p4, %p45_p3 }
  0x11   : > { %p111_p7 = scmp.eq.s32.totalorder %s4032_s19, 1  ;;  %p117_p8 = scmp.eq.s32.totalorder %s2764_s20, 1 }
  0x12   : > { %s5238_s26 = scalar_select %p4056_p6, 1, 0 }
  0x13   : > { %p2765_p9 = scmp.ge.s32.totalorder %s3974_s18, 1  ;;  %p150_p10 = scmp.lt.s32.totalorder %s3974_s18, 3 }
  0x14   : > { %p4063_p11 = por %p111_p7, %p39_p0  ;;  %p4067_p12 = por %p117_p8, %p45_p3 }
  0x15   : > { %p4071_p13 = pnand %p2765_p9, %p150_p10  ;;  %s3976_s30 = smov [#allocation5]  }
  0x16   : > { %s5239_s27 = scalar_select %p4063_p11, 1, 0 }
  0x17   : > { %s5240_s28 = scalar_select %p4067_p12, 1, 0 }
  0x18   : > { %s5241_s29 = scalar_select %p4071_p13, 1, 0 }
  0x19   : > { %p3649_p2 = pneg %p4071_p13  ;;  %s163_s5 = sshll.u32 %s3976_s30, 4  ;;  %s164_s5 = int_to_ptr.vmem [resolvable:$true] %s163_s5 }
  0x1a   : > { %p3669_p4 = scmp.lt.s32.totalorder %s3974_s18, 2  ;;  %p5242_p0 = scmp.eq.s32.totalorder %s4032_s19, 0 }
  0x1b   : > { %s3977_s8 = smov [#allocation7]   ;;  %s5245_s1 = sld [smem:[#allocation16_spill]] }
  0x1c   : > { %p4081_p7 = pnand %p3649_p2, %p5242_p0  ;;  %p4087_p3 = pnand %p3669_p4, %p4050_p5 }
  0x1d   : > { %s173_s9 = sshll.u32 %s3977_s8, 4  ;;  %s4091_s9 = int_to_ptr.vmem [resolvable:$true] %s173_s9 }
  0x1e   : > { %s5244_s7 = scalar_select %p4087_p3, 1, 0 }
  0x1f   : > { %p3788_p9 = pneg %p4081_p7 }
  0x21   : > { %s3786_s12 = scalar_lea.hbm %s5245_s1, 128 }
  0x22   : > { %p3787_p8 = scmp.ne.s32.totalorder %s5245_s1, %s3786_s12  ;;  %p3793_p10 = scmp.lt.u32.totalorder %s3786_s12, %s5245_s1 }
  0x24   : > { %p3789_p4 = pnand %p3788_p9, %p3787_p8 }
  0x26   : > { %p3790_p5 = pneg %p3789_p4 }
  0x28   : > { %p3795_p2 = pnand %p3793_p10, %p3790_p5 }
  0x2a   : > { %3798 = shalt.err (!%p3795_p2)
}
  0x2b   : > { %s3799_s23 = scalar_lea.vmem %s164_s5, 128  ;;  %p3807_p11 = scmp.lt.s32.totalorder %s164_s5, %s164_s5 }
  0x2c   : > { %p3800_p0 = scmp.ne.s32.totalorder %s164_s5, %s3799_s23  ;;  %p3808_p6 = scmp.lt.s32.totalorder %s3799_s23, %s3799_s23 }
  0x2e   : > { %p3802_p1 = pnand %p3800_p0, %p3788_p9  ;;  %p3809_p13 = por %p3808_p6, %p3807_p11 }
  0x30   : > { %p3803_p12 = pneg %p3802_p1 }
  0x32   : > { %p3810_p3 = pnand %p3809_p13, %p3803_p12 }
  0x34   : > { %3813 = shalt.err (!%p3810_p3)
}
  0x35   : > { %3652 = dma.hbm_to_vmem [thread:$0]  (!%p4081_p7), %s5245_s1, 128, %s164_s5, [#allocation6]  }
  0x36   : > { %s187_s8 = sand.u32 1, %s3970_s17   ;;  %s3814_s12 = scalar_lea.hbm %s5227_s2, 9216 }
  0x37   : > { %p3815_p1 = scmp.ne.s32.totalorder %s5227_s2, %s3814_s12  ;;  %p3821_p12 = scmp.lt.u32.totalorder %s3814_s12, %s5227_s2 }
  0x39   : > { %p3817_p6 = pnand %p3815_p1, %p3788_p9 }
  0x3b   : > { %p3818_p11 = pneg %p3817_p6 }
  0x3d   : > { %p3823_p13 = pnand %p3821_p12, %p3818_p11 }
  0x3f   : > { %3826 = shalt.err (!%p3823_p13)
}
  0x40   : > { %s3827_s5 = scalar_lea.vmem %s4091_s9, 9216  ;;  %p3835_p5 = scmp.lt.s32.totalorder %s4091_s9, %s4091_s9 }
  0x41   : > { %p3828_p3 = scmp.ne.s32.totalorder %s4091_s9, %s3827_s5  ;;  %p3836_p10 = scmp.lt.s32.totalorder %s3827_s5, %s3827_s5 }
  0x43   : > { %p3830_p8 = pnand %p3828_p3, %p3788_p9  ;;  %p3837_p2 = por %p3836_p10, %p3835_p5 }
  0x45   : > { %p3831_p4 = pneg %p3830_p8 }
  0x47   : > { %p3838_p0 = pnand %p3837_p2, %p3831_p4 }
  0x49   : > { %3841 = shalt.err (!%p3838_p0)
}
  0x4a   : > { %s3978_s23 = smov 64   ;;  %s3979_s25 = smov 4  }
  0x4b   : > { %3655 = dma.hbm_to_vmem [thread:$0]  (!%p4081_p7), %s5227_s2, 9216, %s4091_s9, [#allocation6], %s3978_s23, %s3978_s23, %s3979_s25  }
  0x4c   : > { %s2769_s11 = sshll.u32 %s187_s8, 7  ;;  %s2891_s12 = sshll.u32 %s3974_s18, 11 }
  0x4d   : > { %s4148_s20 = scalar_lea.hbm %s5225_s0, %s2891_s12  ;;  %s191_s22 = scalar_lea.vmem [#allocation2], %s2769_s11 }
  0x4e   : > { %s198_s6 = sshll.u32 %s191_s22, 4  ;;  %s4152_s5 = scalar_lea.sflag [#allocation3], %s187_s8  ;;  %s4150_s6 = int_to_ptr.vmem [resolvable:$true] %s198_s6 }
  0x4f   : > { %s3842_s1 = scalar_lea.hbm %s4148_s20, 2048  ;;  %p5246_p7 = scmp.ne.s32.totalorder %s5244_s7, 0 }
  0x50   : > { %p3843_p9 = scmp.ne.s32.totalorder %s4148_s20, %s3842_s1  ;;  %s3847_s10 = scalar_lea.hbm %s5225_s0, 4096 }
  0x51   : > { %p3844_p1 = pneg %p5246_p7  ;;  %p3848_p12 = scmp.lt.u32.totalorder %s4148_s20, %s5225_s0 }
  0x52   : > { %p3849_p13 = scmp.lt.u32.totalorder %s3847_s10, %s3842_s1  ;;  %p3851_p8 = scmp.lt.u32.totalorder %s3842_s1, %s4148_s20 }
  0x53   : > { %p3845_p6 = pnand %p3844_p1, %p3843_p9 }
  0x54   : > { %p3850_p3 = por %p3849_p13, %p3848_p12 }
  0x55   : > { %p3846_p11 = pneg %p3845_p6 }
  0x56   : > { %p3852_p4 = por %p3851_p8, %p3850_p3 }
  0x58   : > { %p3853_p5 = pnand %p3852_p4, %p3846_p11 }
  0x5a   : > { %3856 = shalt.err (!%p3853_p5)
}
  0x5b   : > { %s3857_s8 = scalar_lea.vmem %s4150_s6, 2048  ;;  %s3980_s11 = smov [#allocation2]  }
  0x5c   : > { %p3858_p10 = scmp.ne.s32.totalorder %s4150_s6, %s3857_s8  ;;  %s3862_s14 = sshll.u32 %s3980_s11, 4  ;;  %s3863_s14 = int_to_ptr.vmem [resolvable:$false] %s3862_s14 }
  0x5d   : > { %s3864_s22 = scalar_lea.vmem %s3863_s14, 4096  ;;  %p3865_p9 = scmp.lt.s32.totalorder %s4150_s6, %s3863_s14 }
  0x5e   : > { %p3860_p2 = pnand %p3858_p10, %p3844_p1  ;;  %p3866_p6 = scmp.lt.s32.totalorder %s3864_s22, %s3857_s8 }
  0x60   : > { %p3861_p0 = pneg %p3860_p2  ;;  %p3867_p12 = por %p3866_p6, %p3865_p9 }
  0x62   : > { %p3868_p13 = pnand %p3867_p12, %p3861_p0 }
  0x64   : > { %3871 = shalt.err (!%p3868_p13)
}
  0x65   : > { %3659 = dma.hbm_to_vmem [thread:$0]  (!%p5246_p7), %s4148_s20, 2048, %s4150_s6, %s4152_s5, %s3978_s23, %s3978_s23, %s3979_s25  }
  0x66   : > { %p5247_p1 = scmp.ne.s32.totalorder %s5241_s29, 0 }
  0x68   : > { %210 = sbr.rel (%p5247_p1) target bundleno = 703 (0x2bf), region = 32 }
  0x6f   : > { %s4186_s1 = sand.u32 1, %s3966_s16   ;;  %p5248_p11 = scmp.ne.s32.totalorder %s5238_s26, 0 }
  0x70   : > { %s2773_s9 = sshll.u32 %s4186_s1, 7  ;;  %s213_s30 = scalar_lea.sflag [#allocation3], %s4186_s1 }
  0x71   : > { %s4192_s7 = scalar_lea.vmem [#allocation2], %s2773_s9 }
  0x72   : > { %3945 = dma.done.wait (%p5248_p11), %s213_s30, 2048  }
  0x73   : > { %3947 = vsyncadd (%p5248_p11), %s213_s30, 4294965248  ;;  %p5249_p7 = scmp.eq.s32.totalorder %s4032_s19, 0 }
  0x75   : > { %3949 = dma.done.wait (%p5249_p7), [#allocation6], 9344   ;;  %p5250_p3 = pmov %p5249_p7 }
  0x76   : > { %vm594_vm0 = vcmask 1040384   ;;  %vm595_vm1 = vsmask.f32 256  ;;  %v3981_v0 = vmov 0   ;;  %vm631_vm3 = vsmask.f32 7424 }
  0x77   : > { %3951 = vsyncadd (%p5250_p3), [#allocation6], 4294957952  ;;  %v444_v1 = vrot.slane %v3981_v0, 7  ;;  %v3712_v10 = vld [vmem:[#allocation7 + $0x40] sm:$0xff]   ;;  %v3714_v13 = vld [vmem:[#allocation7 + $0x48] sm:$0xff]   ;;  %vm872_vm4 = vcmask 1046528  }
  0x78   : > { %vm4203_vm2 = vmand %vm594_vm0, %vm595_vm1  ;;  %v3713_v11 = vld [vmem:[#allocation7] sm:$0xff]   ;;  %3099 = vmatprep.subr.bf16.mxu0 %v3712_v10  ;;  %3619 = vmatprep.subr.bf16.mxu1 %v3712_v10  ;;  %v3715_v14 = vld [vmem:[#allocation7 + $0x8] sm:$0xff]   ;;  %s5078_s26 = scalar_lea.vmem [#allocation8], %s2773_s9  ;;  %s2924_s29 = sshll.u32 %s4032_s19, 11 }
  0x79   : > { %v4209_v3 = vsel %vm4203_vm2, 0, %v444_v1  ;;  %v4213_v4 = vsel %vm4203_vm2, %v444_v1, 0  ;;  %3100 = vmatpush3.bf16.msra.mxu0 %v3713_v11  ;;  %3627 = vmatpush3.bf16.msra.mxu1 %v3713_v11  ;;  %v3716_v16 = vld [vmem:[#allocation7 + $0x50] sm:$0xff]   ;;  %v3718_v18 = vld [vmem:[#allocation7 + $0x58] sm:$0xff]   ;;  %v3720_v20 = vld [vmem:[#allocation7 + $0x60] sm:$0xff]   ;;  %s2627_s23 = sshll.u32 %s5078_s26, 4  ;;  %s5146_s6 = scalar_lea.hbm %s5228_s3, %s2924_s29  ;;  %s5148_s23 = int_to_ptr.vmem [resolvable:$true] %s2627_s23 }
  0x7a   : > { %5253 = vst [vmem:[#allocation15_spill] sm:$0xff] %v4209_v3  ;;  %v633_v5 = vshrl.u32 %v4209_v3, 16  ;;  %v635_v6 = vshll.u32 %v4209_v3, 16  ;;  %v640_v7 = vshll.u32 %v4213_v4, 16  ;;  %3101 = vmatprep.subr.bf16.mxu0 %v3714_v13  ;;  %3620 = vmatprep.subr.bf16.mxu1 %v3714_v13  ;;  %v3717_v17 = vld [vmem:[#allocation7 + $0x10] sm:$0xff]   ;;  %v3719_v19 = vld [vmem:[#allocation7 + $0x18] sm:$0xff]  }
  0x7b   : > { %v3721_v21 = vld [vmem:[#allocation7 + $0x20] sm:$0xff]   ;;  %v3722_v22 = vld [vmem:[#allocation7 + $0x68] sm:$0xff]   ;;  %v3079_v23 = vld [vmem:[%s4192_s7 + $0x58] sm:$0xff]   ;;  %s2609_s5 = scalar_lea.sflag [#allocation4], %s4186_s1  ;;  %s3872_s10 = scalar_lea.vmem %s5148_s23, 2048 }
  0x7c   : > { %v637_v8 = vrot.slane %v635_v6, 1  ;;  %v642_v9 = vrot.slane %v640_v7, 1  ;;  %v4223_v24 = vld [vmem:[#allocation5] ss:$0 sm:$0xff]  ;;  %v2971_v25 = vunpack.c.l.bf16 %v3079_v23  ;;  %v2972_v26 = vunpack.c.h.bf16 %v3079_v23  ;;  %v4225_v27 = vld [vmem:[#allocation5 + $0x1] ss:$0 sm:$0xff]  ;;  %p3873_p8 = scmp.ne.s32.totalorder %s5148_s23, %s3872_s10 }
  0x7d   : > { %3102 = vmatpush3.bf16.msra.mxu0 %v3715_v14  ;;  %3628 = vmatpush3.bf16.msra.mxu1 %v3715_v14  ;;  %v3723_v28 = vld [vmem:[#allocation7 + $0x28] sm:$0xff]   ;;  %v3724_v31 = vld [vmem:[#allocation7 + $0x70] sm:$0xff]   ;;  %v2926_v37 = vld [vmem:[%s4192_s7] sm:$0xff]   ;;  %p5255_p4 = scmp.ne.s32.totalorder %s5239_s27, 0  ;;  %s3982_s12 = smov [#allocation8]  }
  0x7e   : > { %v638_v12 = vor.u32 %v637_v8, %v633_v5  ;;  %3103 = vmatprep.subr.bf16.mxu0 %v3716_v16  ;;  %3621 = vmatprep.subr.bf16.mxu1 %v3716_v16  ;;  %v347_v29 = vmul.f32 %v2971_v25, %v4223_v24  ;;  %v348_v30 = vmul.f32 %v2972_v26, %v4223_v24  ;;  %v3725_v34 = vld [vmem:[#allocation7 + $0x30] sm:$0xff]   ;;  %v3080_v38 = vld [vmem:[%s4192_s7 + $0x60] sm:$0xff]   ;;  %v2927_v40 = vunpack.c.l.bf16 %v2926_v37  ;;  %v3728_v52 = vld [vmem:[#allocation7 + $0xc0] sm:$0xff]   ;;  %s3876_s13 = sshll.u32 %s3982_s12, 4  ;;  %s3877_s13 = int_to_ptr.vmem [resolvable:$false] %s3876_s13 }
  0x7f   : > { %v3726_v39 = vld [vmem:[#allocation7 + $0x78] sm:$0xff]   ;;  %v2928_v41 = vunpack.c.h.bf16 %v2926_v37  ;;  %v2975_v42 = vunpack.c.l.bf16 %v3080_v38  ;;  %v2976_v43 = vunpack.c.h.bf16 %v3080_v38  ;;  %v3729_v53 = vld [vmem:[#allocation7 + $0x140] sm:$0xff]   ;;  %v3737_v11 = vld [vmem:[#allocation7 + $0x148] sm:$0xff]   ;;  %p3874_p5 = pnand %p3873_p8, %p5255_p4  ;;  %s3878_s8 = scalar_lea.vmem %s3877_s13, 4096 }
  0x80   : > { %v4219_v15 = vsel %vm631_vm3, %v638_v12, %v642_v9  ;;  %v383_v32 = vadd.f32 %v4225_v27, %v347_v29  ;;  %v384_v33 = vadd.f32 %v4225_v27, %v348_v30  ;;  %v3727_v45 = vld [vmem:[#allocation7 + $0x38] sm:$0xff]   ;;  %v325_v46 = vmul.f32 %v2927_v40, %v4223_v24  ;;  %v3069_v59 = vld [vmem:[%s4192_s7 + $0x8] sm:$0xff]   ;;  %v3070_v30 = vld [vmem:[%s4192_s7 + $0x10] sm:$0xff]   ;;  %p3879_p2 = scmp.lt.s32.totalorder %s5148_s23, %s3877_s13  ;;  %p3880_p0 = scmp.lt.s32.totalorder %s3878_s8, %s3872_s10 }
  0x81   : > { %1564 = vmatprep.mubr.bf16.mxu0 %v4219_v15  ;;  %3104 = vmatpush3.bf16.msra.mxu0 %v3717_v17  ;;  %v326_v47 = vmul.f32 %v2928_v41, %v4223_v24  ;;  %v349_v48 = vmul.f32 %v2975_v42, %v4223_v24  ;;  %v350_v49 = vmul.f32 %v2976_v43, %v4223_v24  ;;  %v2931_v63 = vunpack.c.l.bf16 %v3069_v59  ;;  %v3081_v0 = vld [vmem:[%s4192_s7 + $0x68] sm:$0xff]   ;;  %v3732_v41 = vld [vmem:[#allocation7 + $0xc8] sm:$0xff]   ;;  %p3875_p10 = pneg %p3874_p5 }
  0x82   : > { %3629 = vmatpush3.bf16.msra.mxu1 %v3717_v17  ;;  %3105 = vmatprep.subr.bf16.mxu0 %v3718_v18  ;;  %v415_v35 = vmax.f32 %v383_v32, 0.0  ;;  %v416_v36 = vmax.f32 %v384_v33, 0.0  ;;  %v361_v54 = vadd.f32 %v4225_v27, %v325_v46  ;;  %v3731_v6 = vld [vmem:[#allocation7 + $0x100] sm:$0xff]   ;;  %v2932_v8 = vunpack.c.h.bf16 %v3069_v59  ;;  %v3739_v17 = vld [vmem:[#allocation7 + $0x108] sm:$0xff]   ;;  %p3881_p9 = por %p3880_p0, %p3879_p2 }
  0x83   : > { %3622 = vmatprep.subr.bf16.mxu1 %v3718_v18  ;;  %v362_v55 = vadd.f32 %v4225_v27, %v326_v47  ;;  %v385_v56 = vadd.f32 %v4225_v27, %v349_v48  ;;  %v386_v58 = vadd.f32 %v4225_v27, %v350_v49  ;;  %v327_v12 = vmul.f32 %v2931_v63, %v4223_v24  ;;  %v3082_v59 = vld [vmem:[%s4192_s7 + $0x70] sm:$0xff]  }
  0x84   : > { %v436_v44 = vpack.c.bf16 %v416_v36, %v415_v35  ;;  %v393_v60 = vmax.f32 %v361_v54, 0.0  ;;  %v2979_v13 = vunpack.c.l.bf16 %v3081_v0  ;;  %v328_v18 = vmul.f32 %v2932_v8, %v4223_v24  ;;  %v3730_v35 = vld [vmem:[#allocation7 + $0x80] sm:$0xff]   ;;  %v3733_v54 = vld [vmem:[#allocation7 + $0x88] sm:$0xff]   ;;  %p3882_p6 = pnand %p3881_p9, %p3875_p10 }
  0x85   : > { %3106 = vmatpush3.bf16.msra.mxu0 %v3719_v19  ;;  %v394_v61 = vmax.f32 %v362_v55, 0.0  ;;  %v417_v62 = vmax.f32 %v385_v56, 0.0  ;;  %v418_v7 = vmax.f32 %v386_v58, 0.0  ;;  %v363_v29 = vadd.f32 %v4225_v27, %v327_v12 }
  0x86   : > { %3630 = vmatpush3.bf16.msra.mxu1 %v3719_v19  ;;  %3107 = vmatprep.subr.bf16.mxu0 %v3720_v20  ;;  %v526_v50 = vshrl.u32 %v436_v44, 16  ;;  %v529_v51 = vshll.u32 %v436_v44, 16  ;;  %v2980_v19 = vunpack.c.h.bf16 %v3081_v0  ;;  %v364_v33 = vadd.f32 %v4225_v27, %v328_v18 }
  0x87   : > { %3623 = vmatprep.subr.bf16.mxu1 %v3720_v20  ;;  %v425_v10 = vpack.c.bf16 %v394_v61, %v393_v60  ;;  %v437_v16 = vpack.c.bf16 %v418_v7, %v417_v62  ;;  %v395_v37 = vmax.f32 %v363_v29, 0.0  ;;  %v3747_v60 = vld [vmem:[#allocation7 + $0x110] sm:$0xff]   ;;  %v2936_v12 = vunpack.c.h.bf16 %v3070_v30 }
  0x88   : > { %v528_v57 = vrot.slane %v526_v50, 7  ;;  %v352_v38 = vmul.f32 %v2980_v19, %v4223_v24  ;;  %v396_v44 = vmax.f32 %v364_v33, 0.0  ;;  %v2983_v19 = vunpack.c.l.bf16 %v3082_v59 }
  0x89   : > { %3108 = vmatpush3.bf16.msra.mxu0 %v3721_v21  ;;  %v449_v23 = vshrl.u32 %v425_v10, 16  ;;  %v452_v25 = vshll.u32 %v425_v10, 16  ;;  %v533_v26 = vshrl.u32 %v437_v16, 16 }
  0x8a   : > { %3631 = vmatpush3.bf16.msra.mxu1 %v3721_v21  ;;  %3109 = vmatprep.subr.bf16.mxu0 %v3722_v22  ;;  %v531_v1 = vor.u32 %v529_v51, %v528_v57  ;;  %v4245_v5 = vsel %vm4203_vm2, %v528_v57, 0  ;;  %v388_v8 = vadd.f32 %v4225_v27, %v352_v38 }
  0x8b   : > { %3624 = vmatprep.subr.bf16.mxu1 %v3722_v22  ;;  %v784_v9 = vshll.u32 %v4245_v5, 16  ;;  %v451_v32 = vrot.slane %v449_v23, 7  ;;  %v535_v36 = vrot.slane %v533_v26, 7  ;;  %v330_v26 = vmul.f32 %v2936_v12, %v4223_v24 }
  0x8c   : > { %v4251_v14 = vsel %vm4203_vm2, 0, %v531_v1  ;;  %v420_v18 = vmax.f32 %v388_v8, 0.0 }
  0x8d   : > { %3110 = vmatpush3.bf16.msra.mxu0 %v3723_v28  ;;  %v777_v20 = vshrl.u32 %v4251_v14, 16  ;;  %v779_v21 = vshll.u32 %v4251_v14, 16  ;;  %v786_v22 = vrot.slane %v784_v9, 1  ;;  %v454_v42 = vor.u32 %v452_v25, %v451_v32 }
  0x8e   : > { %3632 = vmatpush3.bf16.msra.mxu1 %v3723_v28  ;;  %3111 = vmatprep.subr.bf16.mxu0 %v3724_v31  ;;  %v536_v28 = vshll.u32 %v437_v16, 16  ;;  %v4264_v43 = vsel %vm4203_vm2, %v451_v32, 0  ;;  %v4269_v48 = vsel %vm4203_vm2, %v535_v36, 0  ;;  %v3071_v32 = vld [vmem:[%s4192_s7 + $0x18] sm:$0xff]  }
  0x8f   : > { %3625 = vmatprep.subr.bf16.mxu1 %v3724_v31  ;;  %v781_v31 = vrot.slane %v779_v21, 1  ;;  %v652_v46 = vshll.u32 %v4264_v43, 16  ;;  %v4277_v51 = vsel %vm4203_vm2, 0, %v454_v42  ;;  %v3753_v42 = vld [vmem:[#allocation7 + $0x118] sm:$0xff]  }
  0x90   : > { %v538_v47 = vor.u32 %v536_v28, %v535_v36  ;;  %v645_v55 = vshrl.u32 %v4277_v51, 16  ;;  %v647_v56 = vshll.u32 %v4277_v51, 16  ;;  %v353_v36 = vmul.f32 %v2983_v19, %v4223_v24 }
  0x91   : > { %3112 = vmatpush3.bf16.msra.mxu0 %v3725_v34  ;;  %v782_v40 = vor.u32 %v781_v31, %v777_v20  ;;  %v654_v57 = vrot.slane %v652_v46, 1  ;;  %v2984_v20 = vunpack.c.h.bf16 %v3082_v59  ;;  %v3754_v59 = vld [vmem:[#allocation7 + $0x160] sm:$0xff]  }
  0x92   : > { %3633 = vmatpush3.bf16.msra.mxu1 %v3725_v34  ;;  %3113 = vmatprep.subr.bf16.mxu0 %v3726_v39  ;;  %v351_v34 = vmul.f32 %v2979_v13, %v4223_v24  ;;  %v4285_v58 = vsel %vm4203_vm2, 0, %v538_v47  ;;  %v649_v1 = vrot.slane %v647_v56, 1  ;;  %v389_v56 = vadd.f32 %v4225_v27, %v353_v36 }
  0x93   : > { %3626 = vmatprep.subr.bf16.mxu1 %v3726_v39  ;;  %v2935_v39 = vunpack.c.l.bf16 %v3070_v30  ;;  %v4273_v50 = vsel %vm631_vm3, %v782_v40, %v786_v22  ;;  %v789_v61 = vshrl.u32 %v4285_v58, 16  ;;  %v791_v62 = vshll.u32 %v4285_v58, 16  ;;  %v3736_v22 = vld [vmem:[#allocation7 + $0xd8] sm:$0xff]  }
  0x94   : > { %v387_v49 = vadd.f32 %v4225_v27, %v351_v34  ;;  %1660 = vmatprep.mubr.bf16.mxu1 %v4273_v50  ;;  %v650_v16 = vor.u32 %v649_v1, %v645_v55  ;;  %v3740_v55 = vld [vmem:[#allocation7 + $0xe0] sm:$0xff]   ;;  %v421_v8 = vmax.f32 %v389_v56, 0.0 }
  0x95   : > { %3114 = vmatpush3.bf16.msra.mxu0 %v3727_v45  ;;  %v793_v10 = vrot.slane %v791_v62, 1  ;;  %v329_v13 = vmul.f32 %v2935_v39, %v4223_v24  ;;  %v2940_v62 = vunpack.c.h.bf16 %v3071_v32 }
  0x96   : > { %3634 = vmatpush3.bf16.msra.mxu1 %v3727_v45  ;;  %3323 = vmatprep.subr.bf16.mxu0 %v3729_v53  ;;  %v3745_v45 = vld [vmem:[#allocation7 + $0x150] sm:$0xff]   ;;  %v426_v53 = vpack.c.bf16 %v396_v44, %v395_v37  ;;  %v419_v9 = vmax.f32 %v387_v49, 0.0  ;;  %v4299_v28 = vsel %vm631_vm3, %v650_v16, %v654_v57  ;;  %v3752_v37 = vld [vmem:[#allocation7 + $0x158] sm:$0xff]   ;;  %v2939_v57 = vunpack.c.l.bf16 %v3071_v32 }
  0x97   : > { %3211 = vmatprep.subr.bf16.mxu1 %v3728_v52  ;;  %v796_v52 = vshll.u32 %v4269_v48, 16  ;;  %v794_v21 = vor.u32 %v793_v10, %v789_v61  ;;  %v365_v31 = vadd.f32 %v4225_v27, %v329_v13  ;;  %v4319_v44 = vld [vmem:[%s4192_s7 + $0x20] sm:$0xff]  }
  0x98   : > { %1565 = vmatmul.mubr.bf16.vlgmr.msra.gmra.mrb[0].mxu0 %v4209_v3  ;;  %v456_v0 = vshrl.u32 %v426_v53, 16  ;;  %v459_v7 = vshll.u32 %v426_v53, 16  ;;  %v438_v30 = vpack.c.bf16 %v420_v18, %v419_v9  ;;  %v3756_v9 = vld [vmem:[#allocation7 + $0x120] sm:$0xff]   ;;  %v3742_v18 = vld [vmem:[#allocation7 + $0xe8] sm:$0xff]   ;;  %v331_v19 = vmul.f32 %v2939_v57, %v4223_v24 }
  0x99   : > { %3324 = vmatpush3.bf16.msra.mxu0 %v3731_v6  ;;  %1661 = vmatmul.mubr.bf16.vlgmr.msra.gmra.mrb[0].mxu1 %v4251_v14  ;;  %v798_v63 = vrot.slane %v796_v52, 1  ;;  %v3734_v6 = vld [vmem:[#allocation7 + $0xd0] sm:$0xff]   ;;  %v397_v47 = vmax.f32 %v365_v31, 0.0  ;;  %v354_v52 = vmul.f32 %v2984_v20, %v4223_v24  ;;  %v332_v20 = vmul.f32 %v2940_v62, %v4223_v24 }
  0x9a   : > { %3325 = vmatprep.subr.bf16.mxu0 %v3737_v11  ;;  %3212 = vmatpush3.bf16.msra.mxu1 %v3730_v35  ;;  %v458_v11 = vrot.slane %v456_v0, 7  ;;  %v366_v35 = vadd.f32 %v4225_v27, %v330_v26  ;;  %v543_v46 = vshll.u32 %v438_v30, 16  ;;  %v2944_v32 = vunpack.c.h.bf16 %v4319_v44 }
  0x9b   : > { %3213 = vmatprep.subr.bf16.mxu1 %v3732_v41  ;;  %1572 = vmatprep.mubr.bf16.mxu0 %v4299_v28  ;;  %v4306_v33 = vsel %vm631_vm3, %v794_v21, %v798_v63  ;;  %v540_v41 = vshrl.u32 %v438_v30, 16  ;;  %v390_v61 = vadd.f32 %v4225_v27, %v354_v52  ;;  %v2943_v63 = vunpack.c.l.bf16 %v4319_v44  ;;  %v3744_v52 = vld [vmem:[#allocation7 + $0xf0] sm:$0xff]  }
  0x9c   : > { %v461_v23 = vor.u32 %v459_v7, %v458_v11  ;;  %v4295_v25 = vsel %vm4203_vm2, %v458_v11, 0  ;;  %1668 = vmatprep.mubr.bf16.mxu1 %v4306_v33  ;;  %v398_v49 = vmax.f32 %v366_v35, 0.0  ;;  %v3741_v7 = vld [vmem:[#allocation7 + $0xa0] sm:$0xff]   ;;  %v367_v30 = vadd.f32 %v4225_v27, %v331_v19  ;;  %v3758_v35 = vld [vmem:[#allocation7 + $0x168] sm:$0xff]  }
  0x9d   : > { %3326 = vmatpush3.bf16.msra.mxu0 %v3739_v17  ;;  %v3735_v17 = vld [vmem:[#allocation7 + $0x90] sm:$0xff]   ;;  %v664_v29 = vshll.u32 %v4295_v25, 16  ;;  %v422_v13 = vmax.f32 %v390_v61, 0.0  ;;  %v368_v31 = vadd.f32 %v4225_v27, %v332_v20  ;;  %v3748_v61 = vld [vmem:[#allocation7 + $0xf8] sm:$0xff]   ;;  %v874_v20 = vrot.slane %v4213_v4, 1 }
  0x9e   : > { %3327 = vmatprep.subr.bf16.mxu0 %v3745_v45  ;;  %3214 = vmatpush3.bf16.msra.mxu1 %v3733_v54  ;;  %v4310_v34 = vsel %vm4203_vm2, 0, %v461_v23  ;;  %v3738_v45 = vld [vmem:[#allocation7 + $0x98] sm:$0xff]   ;;  %v542_v54 = vrot.slane %v540_v41, 7  ;;  %v3759_v41 = vld [vmem:[#allocation7 + $0x128] sm:$0xff]  }
  0x9f   : > { %3215 = vmatprep.subr.bf16.mxu1 %v3734_v6  ;;  %v657_v38 = vshrl.u32 %v4310_v34, 16  ;;  %v659_v39 = vshll.u32 %v4310_v34, 16  ;;  %v666_v40 = vrot.slane %v664_v29, 1  ;;  %v439_v29 = vpack.c.bf16 %v422_v13, %v421_v8 }
  0xa0   : > { %1573 = vmatmul.mubr.bf16.gmra.mrb[4].mxu0 %v4277_v51  ;;  %v545_v1 = vor.u32 %v543_v46, %v542_v54  ;;  %v4328_v6 = vsel %vm4203_vm2, %v542_v54, 0  ;;  %v334_v54 = vmul.f32 %v2944_v32, %v4223_v24 }
  0xa1   : > { %3328 = vmatpush3.bf16.msra.mxu0 %v3747_v60  ;;  %1669 = vmatmul.mubr.bf16.gmra.mrb[4].mxu1 %v4285_v58  ;;  %v661_v53 = vrot.slane %v659_v39, 1  ;;  %v427_v60 = vpack.c.bf16 %v398_v49, %v397_v47  ;;  %v808_v10 = vshll.u32 %v4328_v6, 16  ;;  %v550_v46 = vshll.u32 %v439_v29, 16 }
  0xa2   : > { %3329 = vmatprep.subr.bf16.mxu0 %v3752_v37  ;;  %3216 = vmatpush3.bf16.msra.mxu1 %v3735_v17  ;;  %v4336_v17 = vsel %vm4203_vm2, 0, %v545_v1  ;;  %v3743_v37 = vld [vmem:[#allocation7 + $0xa8] sm:$0xff]   ;;  %v399_v47 = vmax.f32 %v367_v30, 0.0  ;;  %v3073_v1 = vld [vmem:[%s4192_s7 + $0x28] sm:$0xff]  }
  0xa3   : > { %3217 = vmatprep.subr.bf16.mxu1 %v3736_v22  ;;  %v662_v0 = vor.u32 %v661_v53, %v657_v38  ;;  %v463_v11 = vshrl.u32 %v427_v60, 16  ;;  %v466_v12 = vshll.u32 %v427_v60, 16  ;;  %v801_v21 = vshrl.u32 %v4336_v17, 16 }
  0xa4   : > { %v803_v22 = vshll.u32 %v4336_v17, 16  ;;  %v810_v23 = vrot.slane %v808_v10, 1  ;;  %v400_v53 = vmax.f32 %v368_v31, 0.0 }
  0xa5   : > { %3330 = vmatpush3.bf16.msra.mxu0 %v3753_v42  ;;  %v4332_v16 = vsel %vm631_vm3, %v662_v0, %v666_v40  ;;  %v465_v26 = vrot.slane %v463_v11, 7  ;;  %v333_v40 = vmul.f32 %v2943_v63, %v4223_v24  ;;  %v370_v0 = vadd.f32 %v4225_v27, %v334_v54  ;;  %v3762_v11 = vld [vmem:[#allocation7 + $0x170] sm:$0xff]  }
  0xa6   : > { %3331 = vmatprep.subr.bf16.mxu0 %v3754_v59  ;;  %3218 = vmatpush3.bf16.msra.mxu1 %v3738_v45  ;;  %v805_v36 = vrot.slane %v803_v22, 1  ;;  %v547_v45 = vshrl.u32 %v439_v29, 16  ;;  %v3746_v59 = vld [vmem:[#allocation7 + $0xb0] sm:$0xff]   ;;  %v428_v62 = vpack.c.bf16 %v400_v53, %v399_v47  ;;  %v3766_v47 = vld [vmem:[#allocation7 + $0x178] sm:$0xff]  }
  0xa7   : > { %1580 = vmatprep.mubr.bf16.mxu0 %v4332_v16  ;;  %3219 = vmatprep.subr.bf16.mxu1 %v3740_v55  ;;  %v468_v38 = vor.u32 %v466_v12, %v465_v26  ;;  %v4349_v39 = vsel %vm4203_vm2, %v465_v26, 0  ;;  %v369_v63 = vadd.f32 %v4225_v27, %v333_v40  ;;  %v402_v26 = vmax.f32 %v370_v0, 0.0  ;;  %v3763_v29 = vld [vmem:[#allocation7 + $0x130] sm:$0xff]  }
  0xa8   : > { %1581 = vmatmul.mubr.bf16.gmra.mrb[8].mxu0 %v4310_v34  ;;  %v676_v42 = vshll.u32 %v4349_v39, 16  ;;  %v806_v49 = vor.u32 %v805_v36, %v801_v21  ;;  %v549_v57 = vrot.slane %v547_v45, 7  ;;  %v470_v13 = vshrl.u32 %v428_v62, 16  ;;  %v3750_v45 = vld [vmem:[#allocation7 + $0x1c0] sm:$0xff]  }
  0xa9   : > { %3332 = vmatpush3.bf16.msra.mxu0 %v3756_v9  ;;  %v4355_v44 = vsel %vm4203_vm2, 0, %v468_v38  ;;  %v401_v19 = vmax.f32 %v369_v63, 0.0  ;;  %v2947_v38 = vunpack.c.l.bf16 %v3073_v1  ;;  %v873_v0 = vrot.slane %v4209_v3, 1  ;;  %v3777_v3 = vld [vmem:[#allocation7 + $0x1f8] sm:$0xff]  }
  0xaa   : > { %3220 = vmatpush3.bf16.msra.mxu1 %v3741_v7  ;;  %3333 = vmatprep.subr.bf16.mxu0 %v3758_v35  ;;  %v669_v55 = vshrl.u32 %v4355_v44, 16  ;;  %v671_v56 = vshll.u32 %v4355_v44, 16  ;;  %v4361_v60 = vsel %vm631_vm3, %v806_v49, %v810_v23  ;;  %v678_v8 = vrot.slane %v676_v42, 1  ;;  %v3749_v23 = vld [vmem:[#allocation7 + $0xb8] sm:$0xff]  }
  0xab   : > { %3221 = vmatprep.subr.bf16.mxu1 %v3742_v18  ;;  %1676 = vmatprep.mubr.bf16.mxu1 %v4361_v60  ;;  %v552_v9 = vor.u32 %v550_v46, %v549_v57  ;;  %v4369_v10 = vsel %vm4203_vm2, %v549_v57, 0  ;;  %v473_v18 = vshll.u32 %v428_v62, 16  ;;  %v472_v35 = vrot.slane %v470_v13, 7 }
  0xac   : > { %v673_v7 = vrot.slane %v671_v56, 1  ;;  %1677 = vmatmul.mubr.bf16.gmra.mrb[8].mxu1 %v4336_v17  ;;  %v820_v12 = vshll.u32 %v4369_v10, 16  ;;  %v2948_v46 = vunpack.c.h.bf16 %v3073_v1  ;;  %v335_v54 = vmul.f32 %v2947_v38, %v4223_v24 }
  0xad   : > { %3334 = vmatpush3.bf16.msra.mxu0 %v3759_v41  ;;  %v4376_v22 = vsel %vm4203_vm2, 0, %v552_v9  ;;  %v475_v41 = vor.u32 %v473_v18, %v472_v35  ;;  %v4386_v42 = vsel %vm4203_vm2, %v472_v35, 0 }
  0xae   : > { %3222 = vmatpush3.bf16.msra.mxu1 %v3743_v37  ;;  %v674_v21 = vor.u32 %v673_v7, %v669_v55  ;;  %3335 = vmatprep.subr.bf16.mxu0 %v3762_v11  ;;  %v813_v30 = vshrl.u32 %v4376_v22, 16  ;;  %v815_v31 = vshll.u32 %v4376_v22, 16  ;;  %v822_v32 = vrot.slane %v820_v12, 1  ;;  %v3767_v55 = vld [vmem:[#allocation7 + $0x138] sm:$0xff]   ;;  %v4405_v12 = vld [vmem:[#allocation7 + $0x200] sm:$0xff]  }
  0xaf   : > { %3223 = vmatprep.subr.bf16.mxu1 %v3744_v52  ;;  %v429_v37 = vpack.c.bf16 %v402_v26, %v401_v19  ;;  %v688_v49 = vshll.u32 %v4386_v42, 16  ;;  %v4393_v57 = vsel %vm4203_vm2, 0, %v475_v41  ;;  %v371_v9 = vadd.f32 %v4225_v27, %v335_v54 }
  0xb0   : > { %v4381_v36 = vsel %vm631_vm3, %v674_v21, %v678_v8  ;;  %v817_v40 = vrot.slane %v815_v31, 1  ;;  %v681_v62 = vshrl.u32 %v4393_v57, 16  ;;  %v683_v63 = vshll.u32 %v4393_v57, 16 }
  0xb1   : > { %3336 = vmatpush3.bf16.msra.mxu0 %v3763_v29  ;;  %1588 = vmatprep.mubr.bf16.mxu0 %v4381_v36  ;;  %v477_v52 = vshrl.u32 %v429_v37, 16  ;;  %v480_v53 = vshll.u32 %v429_v37, 16  ;;  %v690_v8 = vrot.slane %v688_v49, 1  ;;  %v403_v26 = vmax.f32 %v371_v9, 0.0 }
  0xb2   : > { %3224 = vmatpush3.bf16.msra.mxu1 %v3746_v59  ;;  %1589 = vmatmul.mubr.bf16.gmra.mrb[12].mxu0 %v4355_v44  ;;  %v818_v56 = vor.u32 %v817_v40, %v813_v30  ;;  %v336_v59 = vmul.f32 %v2948_v46, %v4223_v24  ;;  %v685_v13 = vrot.slane %v683_v63, 1  ;;  %v4424_v37 = vsel %vm872_vm4, %v873_v0, %v874_v20  ;;  %v3076_v0 = vld [vmem:[%s4192_s7 + $0x40] sm:$0xff]  }
  0xb3   : > { %3225 = vmatprep.subr.bf16.mxu1 %v3748_v61  ;;  %v3074_v61 = vld [vmem:[%s4192_s7 + $0x30] sm:$0xff]   ;;  %3337 = vmatprep.subr.bf16.mxu0 %v3766_v47  ;;  %v479_v1 = vrot.slane %v477_v52, 7  ;;  %v3751_v47 = vld [vmem:[#allocation7 + $0x180] sm:$0xff]   ;;  %v876_v49 = vrot.slane %v4277_v51, 1 }
  0xb4   : > { %v4401_v7 = vsel %vm631_vm3, %v818_v56, %v822_v32  ;;  %v372_v11 = vadd.f32 %v4225_v27, %v336_v59  ;;  %v2951_v21 = vunpack.c.l.bf16 %v3074_v61  ;;  %v686_v30 = vor.u32 %v685_v13, %v681_v62  ;;  %v3755_v56 = vld [vmem:[#allocation7 + $0x1c8] sm:$0xff]  }
  0xb5   : > { %3338 = vmatpush3.bf16.msra.mxu0 %v3767_v55  ;;  %1684 = vmatprep.mubr.bf16.mxu1 %v4401_v7  ;;  %v482_v18 = vor.u32 %v480_v53, %v479_v1  ;;  %v4410_v19 = vsel %vm4203_vm2, %v479_v1, 0  ;;  %v2952_v32 = vunpack.c.h.bf16 %v3074_v61  ;;  %v877_v1 = vrot.slane %v4264_v43, 1 }
  0xb6   : > { %3226 = vmatpush3.bf16.msra.mxu1 %v3749_v23  ;;  %v700_v23 = vshll.u32 %v4410_v19, 16  ;;  %v404_v29 = vmax.f32 %v372_v11, 0.0  ;;  %3571 = vmatprep.subr.bf16.mxu0 %v4405_v12  ;;  %v337_v35 = vmul.f32 %v2951_v21, %v4223_v24  ;;  %v4430_v46 = vsel %vm631_vm3, %v686_v30, %v690_v8 }
  0xb7   : > { %3435 = vmatprep.subr.bf16.mxu1 %v3750_v45  ;;  %1685 = vmatmul.mubr.bf16.gmra.mrb[12].mxu1 %v4376_v22  ;;  %v4418_v31 = vsel %vm4203_vm2, 0, %v482_v18  ;;  %v3075_v45 = vld [vmem:[%s4192_s7 + $0x38] sm:$0xff]   ;;  %v338_v52 = vmul.f32 %v2952_v32, %v4223_v24 }
  0xb8   : > { %1725 = vmatprep.mubr.bf16.mxu1 %v4277_v51  ;;  %v693_v38 = vshrl.u32 %v4418_v31, 16  ;;  %v695_v40 = vshll.u32 %v4418_v31, 16  ;;  %v430_v41 = vpack.c.bf16 %v404_v29, %v403_v26  ;;  %v373_v4 = vadd.f32 %v4225_v27, %v337_v35  ;;  %1596 = vmatprep.mubr.bf16.mxu0 %v4430_v46  ;;  %v3757_v26 = vld [vmem:[#allocation7 + $0x188] sm:$0xff]  }
  0xb9   : > { %v702_v53 = vrot.slane %v700_v23, 1  ;;  %v374_v59 = vadd.f32 %v4225_v27, %v338_v52  ;;  %v2955_v62 = vunpack.c.l.bf16 %v3075_v45  ;;  %v2956_v63 = vunpack.c.h.bf16 %v3075_v45  ;;  %v3077_v52 = vld [vmem:[%s4192_s7 + $0x48] sm:$0xff]  }
  0xba   : > { %v697_v20 = vrot.slane %v695_v40, 1  ;;  %v484_v54 = vshrl.u32 %v430_v41, 16  ;;  %v487_v55 = vshll.u32 %v430_v41, 16  ;;  %1597 = vmatmul.mubr.bf16.gmra.mrb[16].mxu0 %v4393_v57  ;;  %v405_v61 = vmax.f32 %v373_v4, 0.0 }
  0xbb   : > { %v406_v9 = vmax.f32 %v374_v59, 0.0  ;;  %v339_v11 = vmul.f32 %v2955_v62, %v4223_v24  ;;  %v340_v13 = vmul.f32 %v2956_v63, %v4223_v24  ;;  %v2959_v29 = vunpack.c.l.bf16 %v3076_v0 }
  0xbc   : > { %v698_v51 = vor.u32 %v697_v20, %v693_v38  ;;  %v486_v8 = vrot.slane %v484_v54, 7  ;;  %v3760_v38 = vld [vmem:[#allocation7 + $0x1d0] sm:$0xff]   ;;  %v4456_v40 = vsel %vm872_vm4, %v876_v49, %v877_v1  ;;  %v2960_v45 = vunpack.c.h.bf16 %v3076_v0 }
  0xbd   : > { %v431_v30 = vpack.c.bf16 %v406_v9, %v405_v61  ;;  %v375_v32 = vadd.f32 %v4225_v27, %v339_v11  ;;  %v376_v35 = vadd.f32 %v4225_v27, %v340_v13  ;;  %v3761_v0 = vld [vmem:[#allocation7 + $0x190] sm:$0xff]   ;;  %v880_v1 = vrot.slane %v4295_v25, 1  ;;  %v3764_v13 = vld [vmem:[#allocation7 + $0x1d8] sm:$0xff]  }
  0xbe   : > { %v4444_v18 = vsel %vm631_vm3, %v698_v51, %v702_v53  ;;  %v489_v21 = vor.u32 %v487_v55, %v486_v8  ;;  %v4448_v23 = vsel %vm4203_vm2, %v486_v8, 0  ;;  %v879_v53 = vrot.slane %v4310_v34, 1 }
  0xbf   : > { %1726 = vmatmul.mubr.bf16.vlgmr.msra.gmra.mrb[16].mxu1 %v4424_v37  ;;  %1604 = vmatprep.mubr.bf16.mxu0 %v4444_v18  ;;  %v712_v43 = vshll.u32 %v4448_v23, 16  ;;  %v491_v54 = vshrl.u32 %v431_v30, 16  ;;  %v494_v55 = vshll.u32 %v431_v30, 16  ;;  %v407_v59 = vmax.f32 %v375_v32, 0.0 }
  0xc0   : > { %3436 = vmatpush3.bf16.msra.mxu1 %v3751_v47  ;;  %1733 = vmatprep.mubr.bf16.mxu1 %v4310_v34  ;;  %v4460_v41 = vsel %vm4203_vm2, 0, %v489_v21  ;;  %v341_v47 = vmul.f32 %v2959_v29, %v4223_v24  ;;  %v408_v49 = vmax.f32 %v376_v35, 0.0  ;;  %v342_v61 = vmul.f32 %v2960_v45, %v4223_v24  ;;  %v3765_v45 = vld [vmem:[#allocation7 + $0x198] sm:$0xff]  }
  0xc1   : > { %3437 = vmatprep.subr.bf16.mxu1 %v3755_v56  ;;  %v705_v4 = vshrl.u32 %v4460_v41, 16  ;;  %v707_v20 = vshll.u32 %v4460_v41, 16  ;;  %v714_v56 = vrot.slane %v712_v43, 1  ;;  %v493_v63 = vrot.slane %v491_v54, 7 }
  0xc2   : > { %1605 = vmatmul.mubr.bf16.gmra.mrb[20].mxu0 %v4418_v31  ;;  %v377_v51 = vadd.f32 %v4225_v27, %v341_v47  ;;  %v432_v8 = vpack.c.bf16 %v408_v49, %v407_v59  ;;  %v378_v9 = vadd.f32 %v4225_v27, %v342_v61  ;;  %v2963_v11 = vunpack.c.l.bf16 %v3077_v52  ;;  %v4493_v61 = vld [vmem:[#allocation5] ss:$0 sm:$0xff] }
  0xc3   : > { %v709_v62 = vrot.slane %v707_v20, 1  ;;  %v496_v29 = vor.u32 %v494_v55, %v493_v63  ;;  %v4474_v24 = vsel %vm4203_vm2, %v493_v63, 0  ;;  %v4488_v47 = vsel %vm872_vm4, %v879_v53, %v880_v1  ;;  %v3768_v55 = vld [vmem:[#allocation7 + $0x1e0] sm:$0xff]  }
  0xc4   : > { %3438 = vmatpush3.bf16.msra.mxu1 %v3757_v26  ;;  %v409_v43 = vmax.f32 %v377_v51, 0.0  ;;  %v724_v26 = vshll.u32 %v4474_v24, 16  ;;  %v498_v30 = vshrl.u32 %v432_v8, 16  ;;  %v501_v32 = vshll.u32 %v432_v8, 16 }
  0xc5   : > { %3439 = vmatprep.subr.bf16.mxu1 %v3760_v38  ;;  %v710_v21 = vor.u32 %v709_v62, %v705_v4  ;;  %v410_v25 = vmax.f32 %v378_v9, 0.0  ;;  %v4484_v27 = vsel %vm4203_vm2, 0, %v496_v29  ;;  %v2964_v38 = vunpack.c.h.bf16 %v3077_v52  ;;  %v4503_v9 = vld [vmem:[#allocation5 + $0x1] ss:$0 sm:$0xff] }
  0xc6   : > { %v717_v4 = vshrl.u32 %v4484_v27, 16  ;;  %v719_v20 = vshll.u32 %v4484_v27, 16  ;;  %v500_v54 = vrot.slane %v498_v30, 7  ;;  %v882_v59 = vrot.slane %v4355_v44, 1  ;;  %v3770_v30 = vld [vmem:[#allocation7 + $0x1a0] sm:$0xff]  }
  0xc7   : > { %1734 = vmatmul.mubr.bf16.gmra.mrb[20].mxu1 %v4456_v40  ;;  %v4479_v35 = vsel %vm631_vm3, %v710_v21, %v714_v56  ;;  %v433_v49 = vpack.c.bf16 %v410_v25, %v409_v43  ;;  %v343_v52 = vmul.f32 %v4493_v61, %v2963_v11  ;;  %v344_v62 = vmul.f32 %v4493_v61, %v2964_v38  ;;  %v3078_v11 = vld [vmem:[%s4192_s7 + $0x50] sm:$0xff]  }
  0xc8   : > { %1741 = vmatprep.mubr.bf16.mxu1 %v4355_v44  ;;  %3440 = vmatpush3.bf16.msra.mxu1 %v3761_v0  ;;  %v721_v56 = vrot.slane %v719_v20, 1  ;;  %v726_v53 = vrot.slane %v724_v26, 1  ;;  %v503_v63 = vor.u32 %v501_v32, %v500_v54  ;;  %v4499_v0 = vsel %vm4203_vm2, %v500_v54, 0  ;;  %v3771_v54 = vld [vmem:[#allocation7 + $0x1e8] sm:$0xff]  }
  0xc9   : > { %1612 = vmatprep.mubr.bf16.mxu0 %v4479_v35  ;;  %3441 = vmatprep.subr.bf16.mxu1 %v3764_v13  ;;  %v736_v51 = vshll.u32 %v4499_v0, 16  ;;  %v505_v1 = vshrl.u32 %v433_v49, 16  ;;  %v508_v8 = vshll.u32 %v433_v49, 16  ;;  %v379_v13 = vadd.f32 %v4503_v9, %v343_v52 }
  0xca   : > { %1613 = vmatmul.mubr.bf16.gmra.mrb[24].mxu0 %v4460_v41  ;;  %v722_v21 = vor.u32 %v721_v56, %v717_v4  ;;  %v883_v29 = vrot.slane %v4349_v39, 1  ;;  %v4510_v43 = vsel %vm4203_vm2, 0, %v503_v63  ;;  %v380_v26 = vadd.f32 %v4503_v9, %v344_v62 }
  0xcb   : > { %v729_v32 = vshrl.u32 %v4510_v43, 16  ;;  %v731_v25 = vshll.u32 %v4510_v43, 16  ;;  %v738_v38 = vrot.slane %v736_v51, 1  ;;  %v507_v20 = vrot.slane %v505_v1, 7 }
  0xcc   : > { %3442 = vmatpush3.bf16.msra.mxu1 %v3765_v45  ;;  %v4517_v45 = vsel %vm631_vm3, %v722_v21, %v726_v53  ;;  %v411_v39 = vmax.f32 %v379_v13, 0.0  ;;  %v412_v4 = vmax.f32 %v380_v26, 0.0  ;;  %v2967_v49 = vunpack.c.l.bf16 %v3078_v11  ;;  %v3773_v53 = vld [vmem:[#allocation7 + $0x1a8] sm:$0xff]  }
  0xcd   : > { %3443 = vmatprep.subr.bf16.mxu1 %v3768_v55  ;;  %1620 = vmatprep.mubr.bf16.mxu0 %v4517_v45  ;;  %v733_v55 = vrot.slane %v731_v25, 1  ;;  %v510_v52 = vor.u32 %v508_v8, %v507_v20  ;;  %v4523_v62 = vsel %vm4203_vm2, %v507_v20, 0  ;;  %v2968_v56 = vunpack.c.h.bf16 %v3078_v11  ;;  %v3774_v8 = vld [vmem:[#allocation7 + $0x1f0] sm:$0xff]  }
  0xce   : > { %v434_v63 = vpack.c.bf16 %v412_v4, %v411_v39  ;;  %v345_v51 = vmul.f32 %v4493_v61, %v2967_v49  ;;  %v748_v21 = vshll.u32 %v4523_v62, 16  ;;  %v4533_v25 = vsel %vm872_vm4, %v882_v59, %v883_v29  ;;  %v3776_v29 = vld [vmem:[#allocation7 + $0x1b0] sm:$0xff]  }
  0xcf   : > { %1742 = vmatmul.mubr.bf16.gmra.mrb[24].mxu1 %v4488_v47  ;;  %v734_v1 = vor.u32 %v733_v55, %v729_v32  ;;  %v4528_v13 = vsel %vm4203_vm2, 0, %v510_v52  ;;  %v346_v26 = vmul.f32 %v4493_v61, %v2968_v56 }
  0xd0   : > { %1749 = vmatprep.mubr.bf16.mxu1 %v4393_v57  ;;  %3444 = vmatpush3.bf16.msra.mxu1 %v3770_v30  ;;  %v741_v11 = vshrl.u32 %v4528_v13, 16  ;;  %v743_v20 = vshll.u32 %v4528_v13, 16  ;;  %v512_v30 = vshrl.u32 %v434_v63, 16  ;;  %v515_v39 = vshll.u32 %v434_v63, 16 }
  0xd1   : > { %3445 = vmatprep.subr.bf16.mxu1 %v3771_v54  ;;  %v4539_v32 = vsel %vm631_vm3, %v734_v1, %v738_v38  ;;  %v381_v4 = vadd.f32 %v4503_v9, %v345_v51  ;;  %v382_v49 = vadd.f32 %v4503_v9, %v346_v26  ;;  %v750_v55 = vrot.slane %v748_v21, 1 }
  0xd2   : > { %1621 = vmatmul.mubr.bf16.gmra.mrb[28].mxu0 %v4484_v27  ;;  %v745_v54 = vrot.slane %v743_v20, 1  ;;  %v514_v59 = vrot.slane %v512_v30, 7  ;;  %v885_v51 = vrot.slane %v4393_v57, 1 }
  0xd3   : > { %1628 = vmatprep.mubr.bf16.mxu0 %v4539_v32  ;;  %v413_v52 = vmax.f32 %v381_v4, 0.0  ;;  %v414_v56 = vmax.f32 %v382_v49, 0.0 }
  0xd4   : > { %3446 = vmatpush3.bf16.msra.mxu1 %v3773_v53  ;;  %v746_v38 = vor.u32 %v745_v54, %v741_v11  ;;  %v517_v1 = vor.u32 %v515_v39, %v514_v59  ;;  %v4547_v63 = vsel %vm4203_vm2, %v514_v59, 0  ;;  %v886_v53 = vrot.slane %v4386_v42, 1  ;;  %v3779_v11 = vld [vmem:[#allocation7 + $0x1b8] sm:$0xff]  }
  0xd5   : > { %3447 = vmatprep.subr.bf16.mxu1 %v3774_v8  ;;  %v435_v26 = vpack.c.bf16 %v414_v56, %v413_v52  ;;  %v760_v8 = vshll.u32 %v4547_v63, 16 }
  0xd6   : > { %v4554_v21 = vsel %vm4203_vm2, 0, %v517_v1  ;;  %v4558_v20 = vsel %vm631_vm3, %v746_v38, %v750_v55  ;;  %v4564_v42 = vsel %vm872_vm4, %v885_v51, %v886_v53  ;;  %v889_v38 = vrot.slane %v4410_v19, 1 }
  0xd7   : > { %1750 = vmatmul.mubr.bf16.gmra.mrb[28].mxu1 %v4533_v25  ;;  %v753_v30 = vshrl.u32 %v4554_v21, 16  ;;  %v755_v39 = vshll.u32 %v4554_v21, 16  ;;  %v519_v4 = vshrl.u32 %v435_v26, 16  ;;  %v522_v49 = vshll.u32 %v435_v26, 16 }
  0xd8   : > { %1757 = vmatprep.mubr.bf16.mxu1 %v4418_v31  ;;  %3448 = vmatpush3.bf16.msra.mxu1 %v3776_v29  ;;  %v762_v55 = vrot.slane %v760_v8, 1 }
  0xd9   : > { %3449 = vmatprep.subr.bf16.mxu1 %v3777_v3  ;;  %v757_v54 = vrot.slane %v755_v39, 1  ;;  %v521_v59 = vrot.slane %v519_v4, 7  ;;  %v888_v3 = vrot.slane %v4418_v31, 1  ;;  %v891_v4 = vrot.slane %v4460_v41, 1 }
  0xda   : > { %1629 = vmatmul.mubr.bf16.gmra.mrb[32].mxu0 %v4510_v43 }
  0xdb   : > { %1636 = vmatprep.mubr.bf16.mxu0 %v4558_v20  ;;  %v758_v29 = vor.u32 %v757_v54, %v753_v30  ;;  %v524_v52 = vor.u32 %v522_v49, %v521_v59  ;;  %v4570_v56 = vsel %vm4203_vm2, %v521_v59, 0  ;;  %v4587_v30 = vsel %vm872_vm4, %v888_v3, %v889_v38  ;;  %v3772_v38 = vld [vmem:[#allocation7 + $0x208] sm:$0xff]  }
  0xdc   : > { %3450 = vmatpush3.bf16.msra.mxu1 %v3779_v11  ;;  %v772_v8 = vshll.u32 %v4570_v56, 16  ;;  %v892_v49 = vrot.slane %v4448_v23, 1  ;;  %v898_v3 = vrot.slane %v4499_v0, 1  ;;  %v901_v0 = vrot.slane %v4523_v62, 1 }
  0xdd   : > { %v4577_v1 = vsel %vm4203_vm2, 0, %v524_v52  ;;  %v4581_v53 = vsel %vm631_vm3, %v758_v29, %v762_v55  ;;  %v894_v29 = vrot.slane %v4484_v27, 1  ;;  %v895_v55 = vrot.slane %v4474_v24, 1 }
  0xde   : > { %v767_v51 = vshll.u32 %v4577_v1, 16  ;;  %v765_v26 = vshrl.u32 %v4577_v1, 16  ;;  %v774_v39 = vrot.slane %v772_v8, 1  ;;  %v4599_v59 = vsel %vm872_vm4, %v891_v4, %v892_v49 }
  0xdf   : > { %1758 = vmatmul.mubr.bf16.gmra.mrb[32].mxu1 %v4564_v42  ;;  %v4608_v23 = vsel %vm872_vm4, %v894_v29, %v895_v55  ;;  %v897_v52 = vrot.slane %v4510_v43, 1  ;;  %v900_v24 = vrot.slane %v4528_v13, 1  ;;  %v903_v8 = vrot.slane %v4554_v21, 1  ;;  %v3782_v29 = vld [vmem:[#allocation7 + $0x230] sm:$0xff]  }
  0xe0   : > { %1765 = vmatprep.mubr.bf16.mxu1 %v4460_v41  ;;  %v769_v11 = vrot.slane %v767_v51, 1  ;;  %v904_v62 = vrot.slane %v4547_v63, 1  ;;  %v906_v63 = vrot.slane %v4577_v1, 1  ;;  %v907_v55 = vrot.slane %v4570_v56, 1 }
  0xe1   : > { %v4616_v51 = vsel %vm872_vm4, %v897_v52, %v898_v3  ;;  %v910_v56 = vrot.slane %v4245_v5, 1 }
  0xe2   : > { %1637 = vmatmul.mubr.bf16.gmra.mrb[36].mxu0 %v4528_v13  ;;  %v770_v19 = vor.u32 %v769_v11, %v765_v26  ;;  %v3778_v26 = vld [vmem:[#allocation7 + $0x218] sm:$0xff]   ;;  %v3083_v11 = vld [vmem:[%s4192_s7 + $0x78] sm:$0xff]  }
  0xe3   : > { %1644 = vmatprep.mubr.bf16.mxu0 %v4581_v53  ;;  %v2987_v4 = vunpack.c.l.bf16 %v3083_v11  ;;  %v2988_v49 = vunpack.c.h.bf16 %v3083_v11  ;;  %v913_v11 = vrot.slane %v4269_v48, 1 }
  0xe4   : > { %v4595_v54 = vsel %vm631_vm3, %v770_v19, %v774_v39  ;;  %v3781_v19 = vld [vmem:[#allocation7 + $0x228] sm:$0xff]   ;;  %v4636_v39 = vsel %vm872_vm4, %v903_v8, %v904_v62  ;;  %v912_v62 = vrot.slane %v4285_v58, 1 }
  0xe5   : > { %v355_v52 = vmul.f32 %v4493_v61, %v2987_v4  ;;  %v356_v3 = vmul.f32 %v4493_v61, %v2988_v49  ;;  %v909_v61 = vrot.slane %v4251_v14, 1 }
  0xe7   : > { %1766 = vmatmul.mubr.bf16.gmra.mrb[36].mxu1 %v4587_v30  ;;  %v4658_v8 = vsel %vm872_vm4, %v909_v61, %v910_v56 }
  0xe8   : > { %1773 = vmatprep.mubr.bf16.mxu1 %v4484_v27 }
  0xea   : > { %1645 = vmatmul.mubr.bf16.gmra.mrb[40].mxu0 %v4554_v21 }
  0xeb   : > { %1652 = vmatprep.mubr.bf16.mxu0 %v4595_v54 }
  0xef   : > { %1774 = vmatmul.mubr.bf16.gmra.mrb[40].mxu1 %v4599_v59 }
  0xf0   : > { %1781 = vmatprep.mubr.bf16.mxu1 %v4510_v43 }
  0xf2   : > { %1653 = vmatmul.mubr.bf16.gmra.mrb[44].mxu0 %v4577_v1 }
  0xf3   : > { %1886 = vmatprep.mubr.bf16.mxu0 %v4456_v40  ;;  %v3775_v40 = vld [vmem:[#allocation7 + $0x210] sm:$0xff]  }
  0xf7   : > { %1782 = vmatmul.mubr.bf16.gmra.mrb[44].mxu1 %v4608_v23 }
  0xf8   : > { %1789 = vmatprep.mubr.bf16.mxu1 %v4528_v13 }
  0xfa   : > { %1887 = vmatmul.mubr.bf16.vlgmr.msra.gmra.mrb[48].mxu0 %v4299_v28  ;;  %v4626_v28 = vsel %vm872_vm4, %v900_v24, %v901_v0  ;;  %v391_v24 = vadd.f32 %v4503_v9, %v355_v52  ;;  %v392_v0 = vadd.f32 %v4503_v9, %v356_v3  ;;  %v918_v3 = vrot.slane %v4376_v22, 1 }
  0xfb   : > { %3572 = vmatpush3.bf16.msra.mxu0 %v4405_v12  ;;  %1894 = vmatprep.mubr.bf16.mxu0 %v4488_v47  ;;  %v3780_v12 = vld [vmem:[#allocation7 + $0x220] sm:$0xff]  }
  0xfc   : > { %3573 = vmatprep.subr.bf16.mxu0 %v3772_v38 }
  0xff   : > { %1790 = vmatmul.mubr.bf16.gmra.mrb[48].mxu1 %v4616_v51  ;;  %3574 = vmatpush3.bf16.msra.mxu0 %v3772_v38  ;;  %v3783_v38 = vld [vmem:[#allocation7 + $0x238] sm:$0xff]  }
 0x100   : > { %1797 = vmatprep.mubr.bf16.mxu1 %v4554_v21  ;;  %3575 = vmatprep.subr.bf16.mxu0 %v3775_v40 }
 0x102   : > { %1895 = vmatmul.mubr.bf16.gmra.mrb[52].mxu0 %v4332_v16 }
 0x103   : > { %1902 = vmatprep.mubr.bf16.mxu0 %v4533_v25  ;;  %3576 = vmatpush3.bf16.msra.mxu0 %v3775_v40  ;;  %v4647_v40 = vsel %vm872_vm4, %v906_v63, %v907_v55  ;;  %v916_v63 = vrot.slane %v4328_v6, 1  ;;  %v919_v6 = vrot.slane %v4369_v10, 1 }
 0x104   : > { %3577 = vmatprep.subr.bf16.mxu0 %v3778_v26 }
 0x107   : > { %1798 = vmatmul.mubr.bf16.gmra.mrb[52].mxu1 %v4626_v28  ;;  %3578 = vmatpush3.bf16.msra.mxu0 %v3778_v26  ;;  %v423_v26 = vmax.f32 %v391_v24, 0.0 }
 0x108   : > { %1805 = vmatprep.mubr.bf16.mxu1 %v4577_v1  ;;  %3579 = vmatprep.subr.bf16.mxu0 %v3780_v12 }
 0x10a   : > { %1903 = vmatmul.mubr.bf16.gmra.mrb[56].mxu0 %v4381_v36 }
 0x10b   : > { %1910 = vmatprep.mubr.bf16.mxu0 %v4564_v42  ;;  %3580 = vmatpush3.bf16.msra.mxu0 %v3780_v12  ;;  %v424_v12 = vmax.f32 %v392_v0, 0.0 }
 0x10c   : > { %3581 = vmatprep.subr.bf16.mxu0 %v3781_v19 }
 0x10d   : > { %v440_v9 = vpack.c.bf16 %v424_v12, %v423_v26 }
 0x10f   : > { %1806 = vmatmul.mubr.bf16.gmra.mrb[56].mxu1 %v4636_v39  ;;  %3582 = vmatpush3.bf16.msra.mxu0 %v3781_v19  ;;  %v554_v5 = vshrl.u32 %v440_v9, 16  ;;  %v4667_v19 = vsel %vm872_vm4, %v912_v62, %v913_v11  ;;  %v557_v49 = vshll.u32 %v440_v9, 16 }
 0x110   : > { %1813 = vmatprep.mubr.bf16.mxu1 %v4251_v14  ;;  %3583 = vmatprep.subr.bf16.mxu0 %v3782_v29 }
 0x111   : > { %v556_v4 = vrot.slane %v554_v5, 7 }
 0x112   : > { %1911 = vmatmul.mubr.bf16.gmra.mrb[60].mxu0 %v4430_v46 }
 0x113   : > { %1918 = vmatprep.mubr.bf16.mxu0 %v4587_v30  ;;  %3584 = vmatpush3.bf16.msra.mxu0 %v3782_v29  ;;  %v915_v29 = vrot.slane %v4336_v17, 1  ;;  %v559_v55 = vor.u32 %v557_v49, %v556_v4 }
 0x114   : > { %3585 = vmatprep.subr.bf16.mxu0 %v3783_v38 }
 0x115   : > { %v4676_v48 = vsel %vm872_vm4, %v915_v29, %v916_v63  ;;  %v4681_v52 = vsel %vm4203_vm2, 0, %v559_v55 }
 0x116   : > { %v938_v2 = vshrl.u32 %v4681_v52, 16 }
 0x117   : > { %1814 = vmatmul.mubr.bf16.gmra.mrb[60].mxu1 %v4647_v40  ;;  %3586 = vmatpush3.bf16.msra.mxu0 %v3783_v38  ;;  %v4689_v38 = vsel %vm872_vm4, %v918_v3, %v919_v6 }
 0x118   : > { %1821 = vmatprep.mubr.bf16.mxu1 %v4285_v58 }
 0x11a   : > { %1919 = vmatmul.mubr.bf16.gmra.mrb[64].mxu0 %v4444_v18 }
 0x11b   : > { %1926 = vmatprep.mubr.bf16.mxu0 %v4599_v59 }
 0x11f   : > { %1822 = vmatmul.mubr.bf16.gmra.mrb[64].mxu1 %v4658_v8 }
 0x120   : > { %1829 = vmatprep.mubr.bf16.mxu1 %v4336_v17 }
 0x122   : > { %1927 = vmatmul.mubr.bf16.gmra.mrb[68].mxu0 %v4479_v35 }
 0x123   : > { %1934 = vmatprep.mubr.bf16.mxu0 %v4608_v23 }
 0x127   : > { %1830 = vmatmul.mubr.bf16.gmra.mrb[68].mxu1 %v4667_v19 }
 0x128   : > { %1837 = vmatprep.mubr.bf16.mxu1 %v4376_v22 }
 0x12a   : > { %1935 = vmatmul.mubr.bf16.gmra.mrb[72].mxu0 %v4517_v45 }
 0x12b   : > { %1942 = vmatprep.mubr.bf16.mxu0 %v4616_v51 }
 0x12f   : > { %1838 = vmatmul.mubr.bf16.gmra.mrb[72].mxu1 %v4676_v48 }
 0x130   : > { %1845 = vmatprep.mubr.bf16.mxu1 %v4681_v52 }
 0x132   : > { %1943 = vmatmul.mubr.bf16.gmra.mrb[76].mxu0 %v4539_v32 }
 0x133   : > { %1950 = vmatprep.mubr.bf16.mxu0 %v4626_v28 }
 0x137   : > { %1846 = vmatmul.mubr.bf16.gmra.mrb[76].mxu1 %v4689_v38 }
 0x138   : > { %2047 = vmatprep.mubr.bf16.mxu1 %v4332_v16 }
 0x13a   : > { %1951 = vmatmul.mubr.bf16.gmra.mrb[80].mxu0 %v4558_v20 }
 0x13b   : > { %1958 = vmatprep.mubr.bf16.mxu0 %v4636_v39 }
 0x13f   : > { %2048 = vmatmul.mubr.bf16.vlgmr.msra.gmra.mrb[80].mxu1 %v4310_v34 }
 0x140   : > { %2055 = vmatprep.mubr.bf16.mxu1 %v4381_v36 }
 0x142   : > { %1959 = vmatmul.mubr.bf16.gmra.mrb[84].mxu0 %v4581_v53 }
 0x143   : > { %1966 = vmatprep.mubr.bf16.mxu0 %v4647_v40 }
 0x147   : > { %2056 = vmatmul.mubr.bf16.gmra.mrb[84].mxu1 %v4355_v44  ;;  %v630_v44 = vsel %vm4203_vm2, %v556_v4, 0 }
 0x148   : > { %2063 = vmatprep.mubr.bf16.mxu1 %v4430_v46 }
 0x14a   : > { %1967 = vmatmul.mubr.bf16.gmra.mrb[88].mxu0 %v4595_v54 }
 0x14b   : > { %1974 = vmatprep.mubr.bf16.mxu0 %v4658_v8 }
 0x14f   : > { %2064 = vmatmul.mubr.bf16.gmra.mrb[88].mxu1 %v4393_v57 }
 0x150   : > { %2071 = vmatprep.mubr.bf16.mxu1 %v4444_v18  ;;  %v952_v18 = vrot.slane %v4681_v52, 1 }
 0x152   : > { %1975 = vmatmul.mubr.bf16.gmra.mrb[92].mxu0 %v4273_v50 }
 0x153   : > { %1982 = vmatprep.mubr.bf16.mxu0 %v4667_v19 }
 0x157   : > { %2072 = vmatmul.mubr.bf16.gmra.mrb[92].mxu1 %v4418_v31  ;;  %v940_v31 = vshll.u32 %v4681_v52, 16 }
 0x158   : > { %2079 = vmatprep.mubr.bf16.mxu1 %v4479_v35 }
 0x159   : > { %v942_v35 = vrot.slane %v940_v31, 1 }
 0x15a   : > { %1983 = vmatmul.mubr.bf16.gmra.mrb[96].mxu0 %v4306_v33 }
 0x15b   : > { %1990 = vmatprep.mubr.bf16.mxu0 %v4676_v48 }
 0x15f   : > { %2080 = vmatmul.mubr.bf16.gmra.mrb[96].mxu1 %v4460_v41  ;;  %v953_v41 = vrot.slane %v630_v44, 1 }
 0x160   : > { %2087 = vmatprep.mubr.bf16.mxu1 %v4517_v45  ;;  %v945_v45 = vshll.u32 %v630_v44, 16 }
 0x161   : > { %v4729_v0 = vsel %vm872_vm4, %v952_v18, %v953_v41 }
 0x162   : > { %1991 = vmatmul.mubr.bf16.gmra.mrb[100].mxu0 %v4361_v60  ;;  %v947_v9 = vrot.slane %v945_v45, 1 }
 0x163   : > { %1998 = vmatprep.mubr.bf16.mxu0 %v4689_v38 }
 0x167   : > { %2088 = vmatmul.mubr.bf16.gmra.mrb[100].mxu1 %v4484_v27  ;;  %v943_v27 = vor.u32 %v942_v35, %v938_v2 }
 0x168   : > { %2095 = vmatprep.mubr.bf16.mxu1 %v4539_v32 }
 0x169   : > { %v4740_v62 = vsel %vm631_vm3, %v943_v27, %v947_v9 }
 0x16a   : > { %1999 = vmatmul.mubr.bf16.gmra.mrb[104].mxu0 %v4401_v7 }
 0x16b   : > { %v3115_v34 = vpop.f32.mrb[0].mxu0  ;;  %2006 = vmatprep.mubr.bf16.mxu0 %v4729_v0 }
 0x16c   : > { %v3116_v16 = vpop.f32.mrb[1].mxu0  ;;  %v3187_v24 = vpop.f32.mrb[0].mxu1 }
 0x16d   : > { %v4718_v10 = vadd.f32 %v3116_v16, %v3115_v34  ;;  %v3118_v36 = vpop.f32.mrb[2].mxu0  ;;  %v3188_v61 = vpop.f32.mrb[1].mxu1 }
 0x16e   : > { %v3119_v57 = vpop.f32.mrb[3].mxu0  ;;  %v4732_v56 = vadd.f32 %v3188_v61, %v3187_v24  ;;  %v3190_v26 = vpop.f32.mrb[2].mxu1 }
 0x16f   : > { %v4722_v46 = vadd.f32 %v3119_v57, %v3118_v36  ;;  %v3191_v12 = vpop.f32.mrb[3].mxu1  ;;  %2096 = vmatmul.mubr.bf16.gmra.mrb[104].mxu1 %v4510_v43 }
 0x170   : > { %v4735_v32 = vadd.f32 %v3191_v12, %v3190_v26  ;;  %2103 = vmatprep.mubr.bf16.mxu1 %v4558_v20 }
 0x172   : > { %2007 = vmatmul.mubr.bf16.gmra.mrb[108].mxu0 %v4740_v62 }
 0x173   : > { %v3121_v11 = vpop.f32.mrb[4].mxu0  ;;  %3587 = vmatprep.mubr.bf16.mxu0 %v4488_v47 }
 0x174   : > { %v3193_v5 = vpop.f32.mrb[4].mxu1  ;;  %v3122_v4 = vpop.f32.mrb[5].mxu0 }
 0x175   : > { %v4742_v49 = vadd.f32 %v3122_v4, %v3121_v11  ;;  %v3194_v29 = vpop.f32.mrb[5].mxu1  ;;  %v3124_v63 = vpop.f32.mrb[6].mxu0 }
 0x176   : > { %v4745_v55 = vadd.f32 %v3194_v29, %v3193_v5  ;;  %v3196_v3 = vpop.f32.mrb[6].mxu1  ;;  %v3125_v6 = vpop.f32.mrb[7].mxu0 }
 0x177   : > { %v4747_v34 = vadd.f32 %v3125_v6, %v3124_v63  ;;  %v3197_v43 = vpop.f32.mrb[7].mxu1  ;;  %2104 = vmatmul.mubr.bf16.gmra.mrb[108].mxu1 %v4528_v13 }
 0x178   : > { %v4750_v20 = vadd.f32 %v3197_v43, %v3196_v3  ;;  %2111 = vmatprep.mubr.bf16.mxu1 %v4581_v53 }
 0x17a   : > { %3588 = vmatmul.mubr.bf16.vlgmr.msra.gmra.mrb[112].mxu0 %v4533_v25 }
 0x17b   : > { %v3127_v16 = vpop.f32.mrb[8].mxu0  ;;  %3591 = vmatprep.mubr.bf16.mxu0 %v4564_v42 }
 0x17c   : > { %v3128_v44 = vpop.f32.mrb[9].mxu0 }
 0x17d   : > { %v4754_v36 = vadd.f32 %v3128_v44, %v3127_v16  ;;  %v3130_v57 = vpop.f32.mrb[10].mxu0 }
 0x17e   : > { %v3131_v31 = vpop.f32.mrb[11].mxu0 }
 0x17f   : > { %v4757_v18 = vadd.f32 %v3131_v31, %v3130_v57  ;;  %2112 = vmatmul.mubr.bf16.gmra.mrb[112].mxu1 %v4554_v21  ;;  %v3199_v47 = vpop.f32.mrb[8].mxu1 }
 0x180   : > { %2119 = vmatprep.mubr.bf16.mxu1 %v4595_v54  ;;  %v3200_v13 = vpop.f32.mrb[9].mxu1 }
 0x181   : > { %v4762_v41 = vadd.f32 %v3200_v13, %v3199_v47  ;;  %v3202_v53 = vpop.f32.mrb[10].mxu1 }
 0x182   : > { %v3203_v2 = vpop.f32.mrb[11].mxu1  ;;  %3592 = vmatmul.mubr.bf16.gmra.mrb[116].mxu0 %v4587_v30 }
 0x183   : > { %v4764_v35 = vadd.f32 %v3203_v2, %v3202_v53  ;;  %3595 = vmatprep.mubr.bf16.mxu0 %v4599_v59 }
 0x185   : > { %v3133_v25 = vpop.f32.mrb[12].mxu0 }
 0x186   : > { %v3134_v45 = vpop.f32.mrb[13].mxu0 }
 0x187   : > { %2120 = vmatmul.mubr.bf16.gmra.mrb[116].mxu1 %v4577_v1  ;;  %v4769_v42 = vadd.f32 %v3134_v45, %v3133_v25  ;;  %v3136_v21 = vpop.f32.mrb[14].mxu0 }
 0x188   : > { %v3137_v24 = vpop.f32.mrb[15].mxu0  ;;  %2127 = vmatprep.mubr.bf16.mxu1 %v4273_v50 }
 0x189   : > { %v4772_v54 = vadd.f32 %v3137_v24, %v3136_v21 }
 0x18a   : > { %v3205_v61 = vpop.f32.mrb[12].mxu1  ;;  %3596 = vmatmul.mubr.bf16.gmra.mrb[120].mxu0 %v4608_v23 }
 0x18b   : > { %v3206_v26 = vpop.f32.mrb[13].mxu1  ;;  %3599 = vmatprep.mubr.bf16.mxu0 %v4616_v51 }
 0x18c   : > { %v4774_v12 = vadd.f32 %v3206_v26, %v3205_v61  ;;  %v3208_v27 = vpop.f32.mrb[14].mxu1 }
 0x18d   : > { %v3209_v30 = vpop.f32.mrb[15].mxu1  ;;  %v3139_v1 = vpop.f32.mrb[16].mxu0 }
 0x18e   : > { %v4778_v59 = vadd.f32 %v3209_v30, %v3208_v27  ;;  %v3140_v9 = vpop.f32.mrb[17].mxu0 }
 0x18f   : > { %2128 = vmatmul.mubr.bf16.gmra.mrb[120].mxu1 %v4251_v14  ;;  %v4782_v50 = vadd.f32 %v3140_v9, %v3139_v1  ;;  %v3142_v11 = vpop.f32.mrb[18].mxu0 }
 0x190   : > { %2135 = vmatprep.mubr.bf16.mxu1 %v4306_v33  ;;  %v3143_v4 = vpop.f32.mrb[19].mxu0 }
 0x191   : > { %v4784_v63 = vadd.f32 %v3143_v4, %v3142_v11 }
 0x192   : > { %v3227_v5 = vpop.f32.mrb[16].mxu1  ;;  %3600 = vmatmul.mubr.bf16.gmra.mrb[124].mxu0 %v4626_v28 }
 0x193   : > { %v3228_v29 = vpop.f32.mrb[17].mxu1  ;;  %3603 = vmatprep.mubr.bf16.mxu0 %v4636_v39 }
 0x194   : > { %v3229_v23 = vadd.f32 %v3228_v29, %v3227_v5  ;;  %v3230_v3 = vpop.f32.mrb[18].mxu1 }
 0x195   : > { %v3231_v51 = vpop.f32.mrb[19].mxu1  ;;  %v3145_v33 = vpop.f32.mrb[20].mxu0 }
 0x196   : > { %v4789_v14 = vadd.f32 %v3229_v23, %v4718_v10  ;;  %v3232_v6 = vadd.f32 %v3231_v51, %v3230_v3  ;;  %v3146_v16 = vpop.f32.mrb[21].mxu0 }
 0x197   : > { %2136 = vmatmul.mubr.bf16.gmra.mrb[124].mxu1 %v4285_v58  ;;  %v4796_v44 = vadd.f32 %v3146_v16, %v3145_v33  ;;  %v3148_v57 = vpop.f32.mrb[22].mxu0 }
 0x198   : > { %v4793_v43 = vadd.f32 %v3232_v6, %v4722_v46  ;;  %2143 = vmatprep.mubr.bf16.mxu1 %v4361_v60  ;;  %v3149_v31 = vpop.f32.mrb[23].mxu0 }
 0x199   : > { %v4798_v39 = vadd.f32 %v3149_v31, %v3148_v57 }
 0x19a   : > { %v3233_v28 = vpop.f32.mrb[20].mxu1  ;;  %3604 = vmatmul.mubr.bf16.gmra.mrb[128].mxu0 %v4647_v40 }
 0x19b   : > { %v3234_v47 = vpop.f32.mrb[21].mxu1  ;;  %3607 = vmatprep.mubr.bf16.mxu0 %v4658_v8 }
 0x19c   : > { %v3235_v10 = vadd.f32 %v3234_v47, %v3233_v28  ;;  %v3236_v13 = vpop.f32.mrb[22].mxu1  ;;  %v5254_v47 = vld [vmem:[#allocation15_spill] sm:$0xff] }
 0x19d   : > { %v3237_v58 = vpop.f32.mrb[23].mxu1  ;;  %v3151_v60 = vpop.f32.mrb[24].mxu0 }
 0x19e   : > { %v4803_v46 = vadd.f32 %v3235_v10, %v4742_v49  ;;  %v3238_v53 = vadd.f32 %v3237_v58, %v3236_v13  ;;  %v3152_v25 = vpop.f32.mrb[25].mxu0 }
 0x19f   : > { %2144 = vmatmul.mubr.bf16.gmra.mrb[128].mxu1 %v4336_v17  ;;  %v4810_v45 = vadd.f32 %v3152_v25, %v3151_v60  ;;  %v3154_v21 = vpop.f32.mrb[26].mxu0 }
 0x1a0   : > { %v4807_v2 = vadd.f32 %v3238_v53, %v4747_v34  ;;  %2151 = vmatprep.mubr.bf16.mxu1 %v4401_v7  ;;  %v3155_v24 = vpop.f32.mrb[27].mxu0 }
 0x1a1   : > { %v4812_v8 = vadd.f32 %v3155_v24, %v3154_v21 }
 0x1a2   : > { %v3239_v40 = vpop.f32.mrb[24].mxu1  ;;  %3608 = vmatmul.mubr.bf16.gmra.mrb[132].mxu0 %v4667_v19 }
 0x1a3   : > { %v3240_v61 = vpop.f32.mrb[25].mxu1  ;;  %3611 = vmatprep.mubr.bf16.mxu0 %v4676_v48 }
 0x1a4   : > { %v3241_v49 = vadd.f32 %v3240_v61, %v3239_v40  ;;  %v3242_v26 = vpop.f32.mrb[26].mxu1 }
 0x1a5   : > { %v3243_v17 = vpop.f32.mrb[27].mxu1  ;;  %v3157_v7 = vpop.f32.mrb[28].mxu0 }
 0x1a6   : > { %v4817_v34 = vadd.f32 %v3241_v49, %v4754_v36  ;;  %v3244_v27 = vadd.f32 %v3243_v17, %v3242_v26  ;;  %v3158_v1 = vpop.f32.mrb[29].mxu0 }
 0x1a7   : > { %2152 = vmatmul.mubr.bf16.gmra.mrb[132].mxu1 %v4376_v22  ;;  %v4824_v9 = vadd.f32 %v3158_v1, %v3157_v7  ;;  %v3160_v11 = vpop.f32.mrb[30].mxu0 }
 0x1a8   : > { %v4821_v30 = vadd.f32 %v3244_v27, %v4757_v18  ;;  %2159 = vmatprep.mubr.bf16.mxu1 %v4740_v62  ;;  %v3161_v5 = vpop.f32.mrb[31].mxu0 }
 0x1a9   : > { %v4826_v48 = vadd.f32 %v3161_v5, %v3160_v11 }
 0x1aa   : > { %v3245_v19 = vpop.f32.mrb[28].mxu1  ;;  %3612 = vmatmul.mubr.bf16.gmra.mrb[136].mxu0 %v4689_v38 }
 0x1ab   : > { %v3246_v4 = vpop.f32.mrb[29].mxu1  ;;  %3615 = vmatprep.mubr.bf16.mxu0 %v4729_v0 }
 0x1ac   : > { %v3247_v36 = vadd.f32 %v3246_v4, %v3245_v19  ;;  %v3248_v29 = vpop.f32.mrb[30].mxu1 }
 0x1ad   : > { %v3249_v22 = vpop.f32.mrb[31].mxu1  ;;  %v3163_v62 = vpop.f32.mrb[32].mxu0 }
 0x1ae   : > { %v4831_v18 = vadd.f32 %v3247_v36, %v4769_v42  ;;  %v3250_v23 = vadd.f32 %v3249_v22, %v3248_v29  ;;  %v3164_v51 = vpop.f32.mrb[33].mxu0 }
 0x1af   : > { %2160 = vmatmul.mubr.bf16.gmra.mrb[136].mxu1 %v4681_v52  ;;  %v4838_v6 = vadd.f32 %v3164_v51, %v3163_v62  ;;  %v3166_v33 = vpop.f32.mrb[34].mxu0 }
 0x1b0   : > { %v4835_v3 = vadd.f32 %v3250_v23, %v4772_v54  ;;  %2167 = vmatprep.mubr.bf16.mxu1 %v4219_v15  ;;  %v3167_v16 = vpop.f32.mrb[35].mxu0 }
 0x1b1   : > { %v4840_v0 = vadd.f32 %v3167_v16, %v3166_v33 }
 0x1b2   : > { %v3251_v38 = vpop.f32.mrb[32].mxu1  ;;  %3616 = vmatmul.mubr.bf16.gmra.mrb[140].mxu0 %v4424_v37 }
 0x1b3   : > { %v3252_v57 = vpop.f32.mrb[33].mxu1 }
 0x1b4   : > { %v3253_v42 = vadd.f32 %v3252_v57, %v3251_v38  ;;  %v3254_v28 = vpop.f32.mrb[34].mxu1 }
 0x1b5   : > { %v3255_v52 = vpop.f32.mrb[35].mxu1  ;;  %v3169_v15 = vpop.f32.mrb[36].mxu0 }
 0x1b6   : > { %v4844_v31 = vadd.f32 %v3253_v42, %v4782_v50  ;;  %v3256_v54 = vadd.f32 %v3255_v52, %v3254_v28  ;;  %v3170_v13 = vpop.f32.mrb[37].mxu0 }
 0x1b7   : > { %2168 = vmatmul.mubr.bf16.gmra.mrb[140].mxu1 %v5254_v47  ;;  %v4850_v58 = vadd.f32 %v3170_v13, %v3169_v15  ;;  %v3172_v53 = vpop.f32.mrb[38].mxu0 }
 0x1b8   : > { %v4848_v10 = vadd.f32 %v3256_v54, %v4784_v63  ;;  %v3173_v25 = vpop.f32.mrb[39].mxu0 }
 0x1b9   : > { %v4852_v40 = vadd.f32 %v3173_v25, %v3172_v53 }
 0x1ba   : > { %v3257_v60 = vpop.f32.mrb[36].mxu1 }
 0x1bb   : > { %v3258_v21 = vpop.f32.mrb[37].mxu1 }
 0x1bc   : > { %v3259_v37 = vadd.f32 %v3258_v21, %v3257_v60  ;;  %v3260_v24 = vpop.f32.mrb[38].mxu1 }
 0x1bd   : > { %v3261_v50 = vpop.f32.mrb[39].mxu1  ;;  %v3175_v26 = vpop.f32.mrb[40].mxu0 }
 0x1be   : > { %v4855_v61 = vadd.f32 %v3259_v37, %v4796_v44  ;;  %v3262_v49 = vadd.f32 %v3261_v50, %v3260_v24  ;;  %v3176_v17 = vpop.f32.mrb[41].mxu0 }
 0x1bf   : > { %v4860_v27 = vadd.f32 %v3176_v17, %v3175_v26  ;;  %v3178_v7 = vpop.f32.mrb[42].mxu0 }
 0x1c0   : > { %v4858_v63 = vadd.f32 %v3262_v49, %v4798_v39  ;;  %v3179_v11 = vpop.f32.mrb[43].mxu0 }
 0x1c1   : > { %v4862_v5 = vadd.f32 %v3179_v11, %v3178_v7 }
 0x1c2   : > { %v3263_v1 = vpop.f32.mrb[40].mxu1 }
 0x1c3   : > { %v3264_v19 = vpop.f32.mrb[41].mxu1 }
 0x1c4   : > { %v3265_v4 = vadd.f32 %v3264_v19, %v3263_v1  ;;  %v3266_v36 = vpop.f32.mrb[42].mxu1 }
 0x1c5   : > { %v3267_v29 = vpop.f32.mrb[43].mxu1  ;;  %v3181_v23 = vpop.f32.mrb[44].mxu0 }
 0x1c6   : > { %v4865_v44 = vadd.f32 %v3265_v4, %v4810_v45  ;;  %v3268_v22 = vadd.f32 %v3267_v29, %v3266_v36  ;;  %v3182_v62 = vpop.f32.mrb[45].mxu0 }
 0x1c7   : > { %v4870_v51 = vadd.f32 %v3182_v62, %v3181_v23  ;;  %v3184_v33 = vpop.f32.mrb[46].mxu0 }
 0x1c8   : > { %v4868_v39 = vadd.f32 %v3268_v22, %v4812_v8  ;;  %v3185_v16 = vpop.f32.mrb[47].mxu0 }
 0x1c9   : > { %v4872_v42 = vadd.f32 %v3185_v16, %v3184_v33 }
 0x1ca   : > { %v3269_v38 = vpop.f32.mrb[44].mxu1 }
 0x1cb   : > { %v3270_v57 = vpop.f32.mrb[45].mxu1 }
 0x1cc   : > { %v3271_v28 = vadd.f32 %v3270_v57, %v3269_v38  ;;  %v3272_v52 = vpop.f32.mrb[46].mxu1 }
 0x1cd   : > { %v3273_v54 = vpop.f32.mrb[47].mxu1  ;;  %v3339_v15 = vpop.f32.mrb[48].mxu0 }
 0x1ce   : > { %v4875_v45 = vadd.f32 %v3271_v28, %v4824_v9  ;;  %v3274_v47 = vadd.f32 %v3273_v54, %v3272_v52  ;;  %v3340_v13 = vpop.f32.mrb[49].mxu0 }
 0x1cf   : > { %v3341_v53 = vadd.f32 %v3340_v13, %v3339_v15  ;;  %v3342_v60 = vpop.f32.mrb[50].mxu0 }
 0x1d0   : > { %v4878_v8 = vadd.f32 %v3274_v47, %v4826_v48  ;;  %v3343_v21 = vpop.f32.mrb[51].mxu0 }
 0x1d1   : > { %v4881_v24 = vadd.f32 %v3341_v53, %v4789_v14  ;;  %v3344_v50 = vadd.f32 %v3343_v21, %v3342_v60 }
 0x1d2   : > { %v3275_v25 = vpop.f32.mrb[48].mxu1 }
 0x1d3   : > { %v3276_v37 = vpop.f32.mrb[49].mxu1  ;;  %v4884_v9 = vadd.f32 %v3344_v50, %v4793_v43 }
 0x1d4   : > { %v3277_v49 = vadd.f32 %v3276_v37, %v3275_v25  ;;  %v3278_v26 = vpop.f32.mrb[50].mxu1 }
 0x1d5   : > { %v3279_v17 = vpop.f32.mrb[51].mxu1  ;;  %v3345_v1 = vpop.f32.mrb[52].mxu0 }
 0x1d6   : > { %v4887_v7 = vadd.f32 %v3277_v49, %v4838_v6  ;;  %v3280_v48 = vadd.f32 %v3279_v17, %v3278_v26  ;;  %v3346_v19 = vpop.f32.mrb[53].mxu0 }
 0x1d7   : > { %v3347_v4 = vadd.f32 %v3346_v19, %v3345_v1  ;;  %v3348_v36 = vpop.f32.mrb[54].mxu0 }
 0x1d8   : > { %v4890_v11 = vadd.f32 %v3280_v48, %v4840_v0  ;;  %v3349_v29 = vpop.f32.mrb[55].mxu0 }
 0x1d9   : > { %v4893_v23 = vadd.f32 %v3347_v4, %v4803_v46  ;;  %v3350_v62 = vadd.f32 %v3349_v29, %v3348_v36 }
 0x1da   : > { %v3281_v14 = vpop.f32.mrb[52].mxu1 }
 0x1db   : > { %v3282_v22 = vpop.f32.mrb[53].mxu1  ;;  %v4896_v6 = vadd.f32 %v3350_v62, %v4807_v2 }
 0x1dc   : > { %v3283_v43 = vadd.f32 %v3282_v22, %v3281_v14  ;;  %v3284_v33 = vpop.f32.mrb[54].mxu1 }
 0x1dd   : > { %v3285_v38 = vpop.f32.mrb[55].mxu1  ;;  %v3351_v57 = vpop.f32.mrb[56].mxu0 }
 0x1de   : > { %v4899_v16 = vadd.f32 %v3283_v43, %v4850_v58  ;;  %v3286_v0 = vadd.f32 %v3285_v38, %v3284_v33  ;;  %v3352_v52 = vpop.f32.mrb[57].mxu0 }
 0x1df   : > { %v3353_v54 = vadd.f32 %v3352_v52, %v3351_v57  ;;  %v3354_v47 = vpop.f32.mrb[58].mxu0 }
 0x1e0   : > { %v4902_v28 = vadd.f32 %v3286_v0, %v4852_v40  ;;  %v3355_v15 = vpop.f32.mrb[59].mxu0 }
 0x1e1   : > { %v4905_v53 = vadd.f32 %v3353_v54, %v4817_v34  ;;  %v3356_v60 = vadd.f32 %v3355_v15, %v3354_v47 }
 0x1e2   : > { %v3287_v46 = vpop.f32.mrb[56].mxu1 }
 0x1e3   : > { %v3288_v13 = vpop.f32.mrb[57].mxu1  ;;  %v4908_v58 = vadd.f32 %v3356_v60, %v4821_v30 }
 0x1e4   : > { %v3289_v2 = vadd.f32 %v3288_v13, %v3287_v46  ;;  %v3290_v25 = vpop.f32.mrb[58].mxu1 }
 0x1e5   : > { %v3291_v21 = vpop.f32.mrb[59].mxu1  ;;  %v3357_v50 = vpop.f32.mrb[60].mxu0 }
 0x1e6   : > { %v4911_v37 = vadd.f32 %v3289_v2, %v4860_v27  ;;  %v3292_v40 = vadd.f32 %v3291_v21, %v3290_v25  ;;  %v3358_v26 = vpop.f32.mrb[61].mxu0 }
 0x1e7   : > { %v3359_v17 = vadd.f32 %v3358_v26, %v3357_v50  ;;  %v3360_v48 = vpop.f32.mrb[62].mxu0 }
 0x1e8   : > { %v4914_v49 = vadd.f32 %v3292_v40, %v4862_v5  ;;  %v3361_v1 = vpop.f32.mrb[63].mxu0 }
 0x1e9   : > { %v4917_v4 = vadd.f32 %v3359_v17, %v4831_v18  ;;  %v3362_v36 = vadd.f32 %v3361_v1, %v3360_v48 }
 0x1ea   : > { %v3293_v34 = vpop.f32.mrb[60].mxu1 }
 0x1eb   : > { %v3294_v19 = vpop.f32.mrb[61].mxu1  ;;  %v4920_v27 = vadd.f32 %v3362_v36, %v4835_v3 }
 0x1ec   : > { %v3295_v30 = vadd.f32 %v3294_v19, %v3293_v34  ;;  %v3296_v14 = vpop.f32.mrb[62].mxu1 }
 0x1ed   : > { %v3297_v29 = vpop.f32.mrb[63].mxu1  ;;  %v3363_v62 = vpop.f32.mrb[64].mxu0 }
 0x1ee   : > { %v4923_v22 = vadd.f32 %v3295_v30, %v4870_v51  ;;  %v3298_v5 = vadd.f32 %v3297_v29, %v3296_v14  ;;  %v3364_v33 = vpop.f32.mrb[65].mxu0 }
 0x1ef   : > { %v3365_v38 = vadd.f32 %v3364_v33, %v3363_v62  ;;  %v3366_v0 = vpop.f32.mrb[66].mxu0 }
 0x1f0   : > { %v4926_v43 = vadd.f32 %v3298_v5, %v4872_v42  ;;  %v3367_v57 = vpop.f32.mrb[67].mxu0 }
 0x1f1   : > { %v4929_v54 = vadd.f32 %v3365_v38, %v4844_v31  ;;  %v3368_v47 = vadd.f32 %v3367_v57, %v3366_v0 }
 0x1f2   : > { %v3299_v18 = vpop.f32.mrb[64].mxu1 }
 0x1f3   : > { %v3300_v52 = vpop.f32.mrb[65].mxu1  ;;  %v4932_v51 = vadd.f32 %v3368_v47, %v4848_v10 }
 0x1f4   : > { %v3301_v3 = vadd.f32 %v3300_v52, %v3299_v18  ;;  %v3302_v46 = vpop.f32.mrb[66].mxu1 }
 0x1f5   : > { %v3303_v15 = vpop.f32.mrb[67].mxu1  ;;  %v3369_v60 = vpop.f32.mrb[68].mxu0 }
 0x1f6   : > { %v4935_v13 = vadd.f32 %v3301_v3, %v4732_v56  ;;  %v3304_v42 = vadd.f32 %v3303_v15, %v3302_v46  ;;  %v3370_v25 = vpop.f32.mrb[69].mxu0 }
 0x1f7   : > { %v3371_v21 = vadd.f32 %v3370_v25, %v3369_v60  ;;  %v3372_v40 = vpop.f32.mrb[70].mxu0 }
 0x1f8   : > { %v4938_v2 = vadd.f32 %v3304_v42, %v4735_v32  ;;  %v3373_v50 = vpop.f32.mrb[71].mxu0 }
 0x1f9   : > { %v4941_v17 = vadd.f32 %v3371_v21, %v4855_v61  ;;  %v3374_v48 = vadd.f32 %v3373_v50, %v3372_v40 }
 0x1fa   : > { %v3305_v31 = vpop.f32.mrb[68].mxu1 }
 0x1fb   : > { %v3306_v26 = vpop.f32.mrb[69].mxu1  ;;  %v4944_v56 = vadd.f32 %v3374_v48, %v4858_v63 }
 0x1fc   : > { %v3307_v10 = vadd.f32 %v3306_v26, %v3305_v31  ;;  %v3308_v34 = vpop.f32.mrb[70].mxu1 }
 0x1fd   : > { %v3309_v1 = vpop.f32.mrb[71].mxu1  ;;  %v3375_v36 = vpop.f32.mrb[72].mxu0 }
 0x1fe   : > { %v4947_v19 = vadd.f32 %v3307_v10, %v4745_v55  ;;  %v3310_v32 = vadd.f32 %v3309_v1, %v3308_v34  ;;  %v3376_v14 = vpop.f32.mrb[73].mxu0 }
 0x1ff   : > { %v3377_v29 = vadd.f32 %v3376_v14, %v3375_v36  ;;  %v3378_v5 = vpop.f32.mrb[74].mxu0 }
 0x200   : > { %v4950_v30 = vadd.f32 %v3310_v32, %v4750_v20  ;;  %v3379_v62 = vpop.f32.mrb[75].mxu0 }
 0x201   : > { %v4953_v38 = vadd.f32 %v3377_v29, %v4865_v44  ;;  %v3380_v0 = vadd.f32 %v3379_v62, %v3378_v5 }
 0x202   : > { %v3311_v61 = vpop.f32.mrb[72].mxu1 }
 0x203   : > { %v3312_v33 = vpop.f32.mrb[73].mxu1  ;;  %v4956_v55 = vadd.f32 %v3380_v0, %v4868_v39 }
 0x204   : > { %v3313_v63 = vadd.f32 %v3312_v33, %v3311_v61  ;;  %v3314_v18 = vpop.f32.mrb[74].mxu1 }
 0x205   : > { %v3315_v57 = vpop.f32.mrb[75].mxu1  ;;  %v3381_v47 = vpop.f32.mrb[76].mxu0 }
 0x206   : > { %v4959_v52 = vadd.f32 %v3313_v63, %v4762_v41  ;;  %v3316_v20 = vadd.f32 %v3315_v57, %v3314_v18  ;;  %v3382_v46 = vpop.f32.mrb[77].mxu0 }
 0x207   : > { %v3383_v15 = vadd.f32 %v3382_v46, %v3381_v47  ;;  %v3384_v42 = vpop.f32.mrb[78].mxu0 }
 0x208   : > { %v4962_v3 = vadd.f32 %v3316_v20, %v4764_v35  ;;  %v3385_v60 = vpop.f32.mrb[79].mxu0 }
 0x209   : > { %v4965_v21 = vadd.f32 %v3383_v15, %v4875_v45  ;;  %v3386_v40 = vadd.f32 %v3385_v60, %v3384_v42 }
 0x20a   : > { %v3317_v44 = vpop.f32.mrb[76].mxu1 }
 0x20b   : > { %v3318_v25 = vpop.f32.mrb[77].mxu1  ;;  %v4968_v41 = vadd.f32 %v3386_v40, %v4878_v8 }
 0x20c   : > { %v3319_v39 = vadd.f32 %v3318_v25, %v3317_v44  ;;  %v3320_v31 = vpop.f32.mrb[78].mxu1 }
 0x20d   : > { %v3321_v50 = vpop.f32.mrb[79].mxu1  ;;  %v3387_v48 = vpop.f32.mrb[80].mxu0 }
 0x20e   : > { %v4971_v26 = vadd.f32 %v3319_v39, %v4774_v12  ;;  %v3322_v35 = vadd.f32 %v3321_v50, %v3320_v31  ;;  %v3388_v34 = vpop.f32.mrb[81].mxu0 }
 0x20f   : > { %v3389_v1 = vadd.f32 %v3388_v34, %v3387_v48  ;;  %v3390_v32 = vpop.f32.mrb[82].mxu0 }
 0x210   : > { %v4974_v10 = vadd.f32 %v3322_v35, %v4778_v59  ;;  %v3391_v36 = vpop.f32.mrb[83].mxu0 }
 0x211   : > { %v4977_v14 = vadd.f32 %v3389_v1, %v4887_v7  ;;  %v3392_v5 = vadd.f32 %v3391_v36, %v3390_v32 }
 0x212   : > { %v3451_v45 = vpop.f32.mrb[80].mxu1 }
 0x213   : > { %v3452_v29 = vpop.f32.mrb[81].mxu1  ;;  %v4980_v12 = vadd.f32 %v3392_v5, %v4890_v11 }
 0x214   : > { %v3453_v8 = vadd.f32 %v3452_v29, %v3451_v45  ;;  %v3454_v61 = vpop.f32.mrb[82].mxu1 }
 0x215   : > { %v3455_v62 = vpop.f32.mrb[83].mxu1  ;;  %v3393_v0 = vpop.f32.mrb[84].mxu0 }
 0x216   : > { %v3456_v33 = vadd.f32 %v3455_v62, %v3454_v61  ;;  %v4983_v59 = vadd.f32 %v3453_v8, %v4881_v24  ;;  %v3394_v63 = vpop.f32.mrb[85].mxu0 }
 0x217   : > { %v3395_v57 = vadd.f32 %v3394_v63, %v3393_v0  ;;  %v3396_v7 = vpop.f32.mrb[86].mxu0 }
 0x218   : > { %v4986_v18 = vadd.f32 %v3456_v33, %v4884_v9  ;;  %v3397_v47 = vpop.f32.mrb[87].mxu0 }
 0x219   : > { %v4989_v46 = vadd.f32 %v3395_v57, %v4899_v16  ;;  %v3398_v11 = vadd.f32 %v3397_v47, %v3396_v7 }
 0x21a   : > { %v3457_v20 = vpop.f32.mrb[84].mxu1 }
 0x21b   : > { %v3458_v15 = vpop.f32.mrb[85].mxu1  ;;  %v4992_v60 = vadd.f32 %v3398_v11, %v4902_v28 }
 0x21c   : > { %v3459_v42 = vadd.f32 %v3458_v15, %v3457_v20  ;;  %v3460_v44 = vpop.f32.mrb[86].mxu1 }
 0x21d   : > { %v3461_v24 = vpop.f32.mrb[87].mxu1  ;;  %v3399_v9 = vpop.f32.mrb[88].mxu0 }
 0x21e   : > { %v3462_v25 = vadd.f32 %v3461_v24, %v3460_v44  ;;  %v4995_v40 = vadd.f32 %v3459_v42, %v4893_v23  ;;  %v3400_v39 = vpop.f32.mrb[89].mxu0 }
 0x21f   : > { %v3401_v50 = vadd.f32 %v3400_v39, %v3399_v9  ;;  %v3402_v16 = vpop.f32.mrb[90].mxu0 }
 0x220   : > { %v4998_v31 = vadd.f32 %v3462_v25, %v4896_v6  ;;  %v3403_v48 = vpop.f32.mrb[91].mxu0 }
 0x221   : > { %v5001_v34 = vadd.f32 %v3401_v50, %v4911_v37  ;;  %v3404_v28 = vadd.f32 %v3403_v48, %v3402_v16 }
 0x222   : > { %v3463_v35 = vpop.f32.mrb[88].mxu1 }
 0x223   : > { %v3464_v1 = vpop.f32.mrb[89].mxu1  ;;  %v5004_v36 = vadd.f32 %v3404_v28, %v4914_v49 }
 0x224   : > { %v3465_v32 = vadd.f32 %v3464_v1, %v3463_v35  ;;  %v3466_v45 = vpop.f32.mrb[90].mxu1 }
 0x225   : > { %v3467_v23 = vpop.f32.mrb[91].mxu1  ;;  %v3405_v6 = vpop.f32.mrb[92].mxu0 }
 0x226   : > { %v3468_v29 = vadd.f32 %v3467_v23, %v3466_v45  ;;  %v5007_v5 = vadd.f32 %v3465_v32, %v4905_v53  ;;  %v3406_v8 = vpop.f32.mrb[93].mxu0 }
 0x227   : > { %v3407_v62 = vadd.f32 %v3406_v8, %v3405_v6  ;;  %v3408_v37 = vpop.f32.mrb[94].mxu0 }
 0x228   : > { %v5010_v61 = vadd.f32 %v3468_v29, %v4908_v58  ;;  %v3409_v0 = vpop.f32.mrb[95].mxu0 }
 0x229   : > { %v5013_v63 = vadd.f32 %v3407_v62, %v4923_v22  ;;  %v3410_v49 = vadd.f32 %v3409_v0, %v3408_v37 }
 0x22a   : > { %v3469_v33 = vpop.f32.mrb[92].mxu1 }
 0x22b   : > { %v3470_v57 = vpop.f32.mrb[93].mxu1  ;;  %v5016_v47 = vadd.f32 %v3410_v49, %v4926_v43 }
 0x22c   : > { %v3471_v7 = vadd.f32 %v3470_v57, %v3469_v33  ;;  %v3472_v20 = vpop.f32.mrb[94].mxu1 }
 0x22d   : > { %v3473_v53 = vpop.f32.mrb[95].mxu1  ;;  %v3411_v58 = vpop.f32.mrb[96].mxu0 }
 0x22e   : > { %v3474_v15 = vadd.f32 %v3473_v53, %v3472_v20  ;;  %v5019_v11 = vadd.f32 %v3471_v7, %v4917_v4  ;;  %v3412_v42 = vpop.f32.mrb[97].mxu0 }
 0x22f   : > { %v3413_v24 = vadd.f32 %v3412_v42, %v3411_v58  ;;  %v3414_v22 = vpop.f32.mrb[98].mxu0 }
 0x230   : > { %v5022_v44 = vadd.f32 %v3474_v15, %v4920_v27  ;;  %v3415_v9 = vpop.f32.mrb[99].mxu0 }
 0x231   : > { %v5025_v39 = vadd.f32 %v3413_v24, %v4935_v13  ;;  %v3416_v43 = vadd.f32 %v3415_v9, %v3414_v22 }
 0x232   : > { %v3475_v25 = vpop.f32.mrb[96].mxu1 }
 0x233   : > { %v3476_v50 = vpop.f32.mrb[97].mxu1  ;;  %v5028_v48 = vadd.f32 %v3416_v43, %v4938_v2 }
 0x234   : > { %v3477_v16 = vadd.f32 %v3476_v50, %v3475_v25  ;;  %v3478_v35 = vpop.f32.mrb[98].mxu1 }
 0x235   : > { %v3479_v4 = vpop.f32.mrb[99].mxu1  ;;  %v3417_v27 = vpop.f32.mrb[100].mxu0 }
 0x236   : > { %v3480_v1 = vadd.f32 %v3479_v4, %v3478_v35  ;;  %v5031_v28 = vadd.f32 %v3477_v16, %v4929_v54  ;;  %v3418_v32 = vpop.f32.mrb[101].mxu0 }
 0x237   : > { %v3419_v23 = vadd.f32 %v3418_v32, %v3417_v27  ;;  %v3420_v13 = vpop.f32.mrb[102].mxu0 }
 0x238   : > { %v5034_v45 = vadd.f32 %v3480_v1, %v4932_v51  ;;  %v3421_v6 = vpop.f32.mrb[103].mxu0 }
 0x239   : > { %v5037_v8 = vadd.f32 %v3419_v23, %v4947_v19  ;;  %v3422_v2 = vadd.f32 %v3421_v6, %v3420_v13 }
 0x23a   : > { %v3481_v29 = vpop.f32.mrb[100].mxu1 }
 0x23b   : > { %v3482_v62 = vpop.f32.mrb[101].mxu1  ;;  %v5040_v0 = vadd.f32 %v3422_v2, %v4950_v30 }
 0x23c   : > { %v3483_v37 = vadd.f32 %v3482_v62, %v3481_v29  ;;  %v3484_v33 = vpop.f32.mrb[102].mxu1 }
 0x23d   : > { %v3485_v54 = vpop.f32.mrb[103].mxu1  ;;  %v3423_v51 = vpop.f32.mrb[104].mxu0 }
 0x23e   : > { %v3486_v57 = vadd.f32 %v3485_v54, %v3484_v33  ;;  %v5043_v49 = vadd.f32 %v3483_v37, %v4941_v17  ;;  %v3424_v7 = vpop.f32.mrb[105].mxu0 }
 0x23f   : > { %v3425_v53 = vadd.f32 %v3424_v7, %v3423_v51  ;;  %v3426_v19 = vpop.f32.mrb[106].mxu0 }
 0x240   : > { %v5046_v20 = vadd.f32 %v3486_v57, %v4944_v56  ;;  %v3427_v58 = vpop.f32.mrb[107].mxu0 }
 0x241   : > { %v5049_v42 = vadd.f32 %v3425_v53, %v4959_v52  ;;  %v3428_v30 = vadd.f32 %v3427_v58, %v3426_v19 }
 0x242   : > { %v3487_v15 = vpop.f32.mrb[104].mxu1 }
 0x243   : > { %v3488_v24 = vpop.f32.mrb[105].mxu1  ;;  %v5052_v9 = vadd.f32 %v3428_v30, %v4962_v3 }
 0x244   : > { %v3489_v22 = vadd.f32 %v3488_v24, %v3487_v15  ;;  %v3490_v25 = vpop.f32.mrb[106].mxu1 }
 0x245   : > { %v3491_v17 = vpop.f32.mrb[107].mxu1  ;;  %v3429_v56 = vpop.f32.mrb[108].mxu0 }
 0x246   : > { %v3492_v50 = vadd.f32 %v3491_v17, %v3490_v25  ;;  %v5055_v43 = vadd.f32 %v3489_v22, %v4953_v38  ;;  %v3430_v16 = vpop.f32.mrb[109].mxu0 }
 0x247   : > { %v3431_v4 = vadd.f32 %v3430_v16, %v3429_v56  ;;  %v3432_v52 = vpop.f32.mrb[110].mxu0 }
 0x248   : > { %v5058_v35 = vadd.f32 %v3492_v50, %v4956_v55  ;;  %v3433_v27 = vpop.f32.mrb[111].mxu0 }
 0x249   : > { %v5061_v32 = vadd.f32 %v3431_v4, %v4971_v26  ;;  %v3434_v3 = vadd.f32 %v3433_v27, %v3432_v52 }
 0x24a   : > { %v3493_v1 = vpop.f32.mrb[108].mxu1 }
 0x24b   : > { %v3494_v23 = vpop.f32.mrb[109].mxu1  ;;  %v5064_v6 = vadd.f32 %v3434_v3, %v4974_v10 }
 0x24c   : > { %v3495_v13 = vadd.f32 %v3494_v23, %v3493_v1  ;;  %v3496_v29 = vpop.f32.mrb[110].mxu1 }
 0x24d   : > { %v3497_v38 = vpop.f32.mrb[111].mxu1  ;;  %v3589_v55 = vpop.f32.mrb[112].mxu0 }
 0x24e   : > { %v3498_v62 = vadd.f32 %v3497_v38, %v3496_v29  ;;  %v5067_v2 = vadd.f32 %v3495_v13, %v4965_v21  ;;  %v2219_v37 = vadd.f32 %v3589_v55, %v4995_v40  ;;  %v2210_v33 = vpop.f32.mrb[113].mxu0 }
 0x24f   : > { %v2211_v26 = vadd.f32 %v2210_v33, %v4983_v59  ;;  %v3590_v57 = vpop.f32.mrb[114].mxu0 }
 0x250   : > { %v5071_v54 = vadd.f32 %v3498_v62, %v4968_v41  ;;  %v2222_v10 = vadd.f32 %v3590_v57, %v4998_v31  ;;  %v2213_v7 = vpop.f32.mrb[115].mxu0  ;;  %v2376_v25 = vmul.f32 %v2219_v37, %v2219_v37 }
 0x251   : > { %v2214_v19 = vadd.f32 %v2213_v7, %v4986_v18  ;;  %v2374_v24 = vmul.f32 %v2211_v26, %v2211_v26 }
 0x252   : > { %v3499_v51 = vpop.f32.mrb[112].mxu1  ;;  %v2997_v58 = vpack.c.bf16 %v2222_v10, %v2219_v37  ;;  %v2377_v52 = vmul.f32 %v2222_v10, %v2222_v10 }
 0x253   : > { %v3500_v53 = vpop.f32.mrb[113].mxu1  ;;  %v2337_v30 = vadd.f32 %v2214_v19, %v2211_v26  ;;  %v2375_v22 = vmul.f32 %v2214_v19, %v2214_v19  ;;  %v2992_v41 = vpack.c.bf16 %v2214_v19, %v2211_v26 }
 0x254   : > { %v3501_v21 = vadd.f32 %v3500_v53, %v3499_v51  ;;  %v3502_v15 = vpop.f32.mrb[114].mxu1  ;;  %3084 = vst [vmem:[%s5078_s26 + $0x8] sm:$0xff] %v2997_v58  }
 0x255   : > { %v3503_v40 = vpop.f32.mrb[115].mxu1  ;;  %v2338_v18 = vadd.f32 %v2337_v30, %v2219_v37  ;;  %v2406_v17 = vadd.f32 %v2375_v22, %v2374_v24  ;;  %2993 = vst [vmem:[%s5078_s26] sm:$0xff] %v2992_v41   ;;  %v3593_v50 = vpop.f32.mrb[116].mxu0 }
 0x256   : > { %v3504_v59 = vadd.f32 %v3503_v40, %v3502_v15  ;;  %v5082_v31 = vadd.f32 %v3501_v21, %v4977_v14  ;;  %v2235_v56 = vadd.f32 %v3593_v50, %v5019_v11  ;;  %v2226_v16 = vpop.f32.mrb[117].mxu0 }
 0x257   : > { %v2407_v1 = vadd.f32 %v2406_v17, %v2376_v25  ;;  %v2227_v27 = vadd.f32 %v2226_v16, %v5007_v5  ;;  %v2339_v23 = vadd.f32 %v2338_v18, %v2222_v10  ;;  %v3594_v3 = vpop.f32.mrb[118].mxu0 }
 0x258   : > { %v5087_v4 = vadd.f32 %v3504_v59, %v4980_v12  ;;  %v2238_v14 = vadd.f32 %v3594_v3, %v5022_v44  ;;  %v2229_v29 = vpop.f32.mrb[119].mxu0  ;;  %v2380_v19 = vmul.f32 %v2235_v56, %v2235_v56 }
 0x259   : > { %v2340_v62 = vadd.f32 %v2339_v23, %v2227_v27  ;;  %v2378_v55 = vmul.f32 %v2227_v27, %v2227_v27  ;;  %v2408_v37 = vadd.f32 %v2407_v1, %v2377_v52  ;;  %v2230_v11 = vadd.f32 %v2229_v29, %v5010_v61 }
 0x25a   : > { %v3505_v13 = vpop.f32.mrb[116].mxu1  ;;  %v3007_v26 = vpack.c.bf16 %v2238_v14, %v2235_v56  ;;  %v2381_v30 = vmul.f32 %v2238_v14, %v2238_v14 }
 0x25b   : > { %v3506_v38 = vpop.f32.mrb[117].mxu1  ;;  %v2409_v57 = vadd.f32 %v2408_v37, %v2378_v55  ;;  %v2341_v5 = vadd.f32 %v2340_v62, %v2230_v11  ;;  %v2379_v10 = vmul.f32 %v2230_v11, %v2230_v11  ;;  %v3002_v7 = vpack.c.bf16 %v2230_v11, %v2227_v27 }
 0x25c   : > { %v3507_v12 = vadd.f32 %v3506_v38, %v3505_v13  ;;  %v3508_v33 = vpop.f32.mrb[118].mxu1  ;;  %3086 = vst [vmem:[%s5078_s26 + $0x18] sm:$0xff] %v3007_v26  }
 0x25d   : > { %v3509_v51 = vpop.f32.mrb[119].mxu1  ;;  %v2342_v21 = vadd.f32 %v2341_v5, %v2235_v56  ;;  %v2410_v15 = vadd.f32 %v2409_v57, %v2379_v10  ;;  %3085 = vst [vmem:[%s5078_s26 + $0x10] sm:$0xff] %v3002_v7   ;;  %v3597_v58 = vpop.f32.mrb[120].mxu0 }
 0x25e   : > { %v3510_v53 = vadd.f32 %v3509_v51, %v3508_v33  ;;  %v5094_v44 = vadd.f32 %v3507_v12, %v4989_v46  ;;  %v2251_v61 = vadd.f32 %v3597_v58, %v5043_v49  ;;  %v2242_v24 = vpop.f32.mrb[121].mxu0 }
 0x25f   : > { %v2411_v22 = vadd.f32 %v2410_v15, %v2380_v19  ;;  %v2243_v41 = vadd.f32 %v2242_v24, %v5031_v28  ;;  %v2343_v59 = vadd.f32 %v2342_v21, %v2238_v14  ;;  %v3598_v25 = vpop.f32.mrb[122].mxu0 }
 0x260   : > { %v5099_v40 = vadd.f32 %v3510_v53, %v4992_v60  ;;  %v2254_v46 = vadd.f32 %v3598_v25, %v5046_v20  ;;  %v2245_v17 = vpop.f32.mrb[123].mxu0  ;;  %v2384_v38 = vmul.f32 %v2251_v61, %v2251_v61 }
 0x261   : > { %v2344_v56 = vadd.f32 %v2343_v59, %v2243_v41  ;;  %v2382_v16 = vmul.f32 %v2243_v41, %v2243_v41  ;;  %v2412_v52 = vadd.f32 %v2411_v22, %v2381_v30  ;;  %v2246_v49 = vadd.f32 %v2245_v17, %v5034_v45 }
 0x262   : > { %v3511_v18 = vpop.f32.mrb[120].mxu1  ;;  %v3017_v27 = vpack.c.bf16 %v2254_v46, %v2251_v61  ;;  %v2385_v33 = vmul.f32 %v2254_v46, %v2254_v46 }
 0x263   : > { %v3512_v50 = vpop.f32.mrb[121].mxu1  ;;  %v2413_v23 = vadd.f32 %v2412_v52, %v2382_v16  ;;  %v2345_v28 = vadd.f32 %v2344_v56, %v2246_v49  ;;  %v2383_v13 = vmul.f32 %v2246_v49, %v2246_v49  ;;  %v3012_v14 = vpack.c.bf16 %v2246_v49, %v2243_v41 }
 0x264   : > { %v3513_v60 = vadd.f32 %v3512_v50, %v3511_v18  ;;  %v3514_v1 = vpop.f32.mrb[122].mxu1  ;;  %3088 = vst [vmem:[%s5078_s26 + $0x28] sm:$0xff] %v3017_v27  }
 0x265   : > { %v3515_v3 = vpop.f32.mrb[123].mxu1  ;;  %v2346_v62 = vadd.f32 %v2345_v28, %v2251_v61  ;;  %v2414_v55 = vadd.f32 %v2413_v23, %v2383_v13  ;;  %3087 = vst [vmem:[%s5078_s26 + $0x20] sm:$0xff] %v3012_v14   ;;  %v3601_v37 = vpop.f32.mrb[124].mxu0 }
 0x266   : > { %v3516_v29 = vadd.f32 %v3515_v3, %v3514_v1  ;;  %v5106_v20 = vadd.f32 %v3513_v60, %v5001_v34  ;;  %v2267_v45 = vadd.f32 %v3601_v37, %v5067_v2  ;;  %v2258_v11 = vpop.f32.mrb[125].mxu0 }
 0x267   : > { %v2415_v26 = vadd.f32 %v2414_v55, %v2384_v38  ;;  %v2259_v57 = vadd.f32 %v2258_v11, %v5055_v43  ;;  %v2347_v51 = vadd.f32 %v2346_v62, %v2254_v46  ;;  %v3602_v5 = vpop.f32.mrb[126].mxu0 }
 0x268   : > { %v5111_v12 = vadd.f32 %v3516_v29, %v5004_v36  ;;  %v2270_v34 = vadd.f32 %v3602_v5, %v5071_v54  ;;  %v2261_v7 = vpop.f32.mrb[127].mxu0  ;;  %v2388_v25 = vmul.f32 %v2267_v45, %v2267_v45 }
 0x269   : > { %v2348_v19 = vadd.f32 %v2347_v51, %v2259_v57  ;;  %v2386_v21 = vmul.f32 %v2259_v57, %v2259_v57  ;;  %v2416_v15 = vadd.f32 %v2415_v26, %v2385_v33  ;;  %v2262_v2 = vadd.f32 %v2261_v7, %v5058_v35 }
 0x26a   : > { %v3517_v10 = vpop.f32.mrb[124].mxu1  ;;  %v3027_v61 = vpack.c.bf16 %v2270_v34, %v2267_v45  ;;  %v2389_v16 = vmul.f32 %v2270_v34, %v2270_v34 }
 0x26b   : > { %v3518_v53 = vpop.f32.mrb[125].mxu1  ;;  %v2417_v24 = vadd.f32 %v2416_v15, %v2386_v21  ;;  %v2349_v43 = vadd.f32 %v2348_v19, %v2262_v2  ;;  %v2387_v22 = vmul.f32 %v2262_v2, %v2262_v2  ;;  %v3022_v41 = vpack.c.bf16 %v2262_v2, %v2259_v57 }
 0x26c   : > { %v3519_v36 = vadd.f32 %v3518_v53, %v3517_v10  ;;  %v3520_v58 = vpop.f32.mrb[126].mxu1  ;;  %3090 = vst [vmem:[%s5078_s26 + $0x38] sm:$0xff] %v3027_v61  }
 0x26d   : > { %v3521_v30 = vpop.f32.mrb[127].mxu1  ;;  %v2350_v18 = vadd.f32 %v2349_v43, %v2267_v45  ;;  %v2418_v46 = vadd.f32 %v2417_v24, %v2387_v22  ;;  %3089 = vst [vmem:[%s5078_s26 + $0x30] sm:$0xff] %v3022_v41   ;;  %v3605_v17 = vpop.f32.mrb[128].mxu0 }
 0x26e   : > { %v3522_v59 = vadd.f32 %v3521_v30, %v3520_v58  ;;  %v2138_v54 = vadd.f32 %v3519_v36, %v5013_v63  ;;  %v2283_v50 = vadd.f32 %v3605_v17, %v5094_v44  ;;  %v2274_v35 = vpop.f32.mrb[129].mxu0 }
 0x26f   : > { %v2419_v52 = vadd.f32 %v2418_v46, %v2388_v25  ;;  %v2275_v49 = vadd.f32 %v2274_v35, %v5082_v31  ;;  %v2351_v60 = vadd.f32 %v2350_v18, %v2270_v34  ;;  %v3606_v1 = vpop.f32.mrb[130].mxu0 }
 0x270   : > { %v2141_v56 = vadd.f32 %v3522_v59, %v5016_v47  ;;  %v2286_v63 = vadd.f32 %v3606_v1, %v5099_v40  ;;  %v2277_v23 = vpop.f32.mrb[131].mxu0  ;;  %v2392_v33 = vmul.f32 %v2283_v50, %v2283_v50 }
 0x271   : > { %v2352_v28 = vadd.f32 %v2351_v60, %v2275_v49  ;;  %v2390_v13 = vmul.f32 %v2275_v49, %v2275_v49  ;;  %v2420_v14 = vadd.f32 %v2419_v52, %v2389_v16  ;;  %v2278_v44 = vadd.f32 %v2277_v23, %v5087_v4 }
 0x272   : > { %v3523_v27 = vpop.f32.mrb[128].mxu1  ;;  %v3037_v38 = vpack.c.bf16 %v2286_v63, %v2283_v50  ;;  %v2393_v34 = vmul.f32 %v2286_v63, %v2286_v63 }
 0x273   : > { %v3524_v3 = vpop.f32.mrb[129].mxu1  ;;  %v2421_v62 = vadd.f32 %v2420_v14, %v2390_v13  ;;  %v2353_v31 = vadd.f32 %v2352_v28, %v2278_v44  ;;  %v2391_v37 = vmul.f32 %v2278_v44, %v2278_v44  ;;  %v3032_v45 = vpack.c.bf16 %v2278_v44, %v2275_v49 }
 0x274   : > { %v3525_v29 = vadd.f32 %v3524_v3, %v3523_v27  ;;  %v3526_v47 = vpop.f32.mrb[130].mxu1  ;;  %3092 = vst [vmem:[%s5078_s26 + $0x48] sm:$0xff] %v3037_v38  }
 0x275   : > { %v3527_v55 = vpop.f32.mrb[131].mxu1  ;;  %v2354_v26 = vadd.f32 %v2353_v31, %v2283_v50  ;;  %v2422_v57 = vadd.f32 %v2421_v62, %v2391_v37  ;;  %3091 = vst [vmem:[%s5078_s26 + $0x40] sm:$0xff] %v3032_v45   ;;  %v3609_v51 = vpop.f32.mrb[132].mxu0 }
 0x276   : > { %v3528_v11 = vadd.f32 %v3527_v55, %v3526_v47  ;;  %v2146_v40 = vadd.f32 %v3525_v29, %v5025_v39  ;;  %v2299_v5 = vadd.f32 %v3609_v51, %v2138_v54  ;;  %v2290_v10 = vpop.f32.mrb[133].mxu0 }
 0x277   : > { %v2423_v7 = vadd.f32 %v2422_v57, %v2392_v33  ;;  %v2291_v53 = vadd.f32 %v2290_v10, %v5106_v20  ;;  %v2355_v19 = vadd.f32 %v2354_v26, %v2286_v63  ;;  %v3610_v21 = vpop.f32.mrb[134].mxu0 }
 0x278   : > { %v2149_v4 = vadd.f32 %v3528_v11, %v5028_v48  ;;  %v2302_v2 = vadd.f32 %v3610_v21, %v2141_v56  ;;  %v2293_v36 = vpop.f32.mrb[135].mxu0  ;;  %v2396_v17 = vmul.f32 %v2299_v5, %v2299_v5 }
 0x279   : > { %v2356_v58 = vadd.f32 %v2355_v19, %v2291_v53  ;;  %v2394_v61 = vmul.f32 %v2291_v53, %v2291_v53  ;;  %v2424_v24 = vadd.f32 %v2423_v7, %v2393_v34  ;;  %v2294_v30 = vadd.f32 %v2293_v36, %v5111_v12 }
 0x27a   : > { %v3529_v15 = vpop.f32.mrb[132].mxu1  ;;  %v3047_v48 = vpack.c.bf16 %v2302_v2, %v2299_v5  ;;  %v2397_v49 = vmul.f32 %v2302_v2, %v2302_v2 }
 0x27b   : > { %v3530_v39 = vpop.f32.mrb[133].mxu1  ;;  %v2425_v41 = vadd.f32 %v2424_v24, %v2394_v61  ;;  %v2357_v54 = vadd.f32 %v2356_v58, %v2294_v30  ;;  %v2395_v20 = vmul.f32 %v2294_v30, %v2294_v30  ;;  %v3042_v25 = vpack.c.bf16 %v2294_v30, %v2291_v53 }
 0x27c   : > { %v3531_v43 = vadd.f32 %v3530_v39, %v3529_v15  ;;  %v3532_v22 = vpop.f32.mrb[134].mxu1  ;;  %3094 = vst [vmem:[%s5078_s26 + $0x58] sm:$0xff] %v3047_v48  }
 0x27d   : > { %v3533_v59 = vpop.f32.mrb[135].mxu1  ;;  %v2358_v50 = vadd.f32 %v2357_v54, %v2299_v5  ;;  %v2426_v35 = vadd.f32 %v2425_v41, %v2395_v20  ;;  %3093 = vst [vmem:[%s5078_s26 + $0x50] sm:$0xff] %v3042_v25   ;;  %v3613_v56 = vpop.f32.mrb[136].mxu0 }
 0x27e   : > { %v3534_v18 = vadd.f32 %v3533_v59, %v3532_v22  ;;  %v2154_v46 = vadd.f32 %v3531_v43, %v5037_v8  ;;  %v2306_v52 = vpop.f32.mrb[137].mxu0 }
 0x27f   : > { %v2427_v60 = vadd.f32 %v2426_v35, %v2396_v17  ;;  %v2307_v1 = vadd.f32 %v2306_v52, %v2146_v40  ;;  %v2359_v27 = vadd.f32 %v2358_v50, %v2302_v2  ;;  %v3614_v63 = vpop.f32.mrb[138].mxu0 }
 0x280   : > { %v2315_v16 = vadd.f32 %v3613_v56, %v2154_v46  ;;  %v2157_v12 = vadd.f32 %v3534_v18, %v5040_v0  ;;  %v2309_v28 = vpop.f32.mrb[139].mxu0 }
 0x281   : > { %v2360_v8 = vadd.f32 %v2359_v27, %v2307_v1  ;;  %v2398_v14 = vmul.f32 %v2307_v1, %v2307_v1  ;;  %v2428_v44 = vadd.f32 %v2427_v60, %v2397_v49  ;;  %v2310_v29 = vadd.f32 %v2309_v28, %v2149_v4 }
 0x282   : > { %v3535_v23 = vpop.f32.mrb[136].mxu1  ;;  %v2318_v3 = vadd.f32 %v3614_v63, %v2157_v12  ;;  %v2400_v33 = vmul.f32 %v2315_v16, %v2315_v16 }
 0x283   : > { %v3536_v13 = vpop.f32.mrb[137].mxu1  ;;  %v2429_v55 = vadd.f32 %v2428_v44, %v2398_v14  ;;  %v2361_v31 = vadd.f32 %v2360_v8, %v2310_v29  ;;  %v2399_v37 = vmul.f32 %v2310_v29, %v2310_v29  ;;  %v3052_v45 = vpack.c.bf16 %v2310_v29, %v2307_v1 }
 0x284   : > { %v3537_v47 = vadd.f32 %v3536_v13, %v3535_v23  ;;  %v3538_v38 = vpop.f32.mrb[138].mxu1  ;;  %v3057_v62 = vpack.c.bf16 %v2318_v3, %v2315_v16  ;;  %v2401_v4 = vmul.f32 %v2318_v3, %v2318_v3 }
 0x285   : > { %v3539_v0 = vpop.f32.mrb[139].mxu1  ;;  %v2362_v26 = vadd.f32 %v2361_v31, %v2315_v16  ;;  %v2430_v57 = vadd.f32 %v2429_v55, %v2399_v37  ;;  %3095 = vst [vmem:[%s5078_s26 + $0x60] sm:$0xff] %v3052_v45   ;;  %v3617_v51 = vpop.f32.mrb[140].mxu0 }
 0x286   : > { %3096 = vst [vmem:[%s5078_s26 + $0x68] sm:$0xff] %v3057_v62   ;;  %v3540_v11 = vadd.f32 %v3539_v0, %v3538_v38  ;;  %v2162_v40 = vadd.f32 %v3537_v47, %v5049_v42  ;;  %v2322_v5 = vpop.f32.mrb[141].mxu0 }
 0x287   : > { %v2431_v34 = vadd.f32 %v2430_v57, %v2400_v33  ;;  %v2363_v53 = vadd.f32 %v2362_v26, %v2318_v3  ;;  %v3618_v19 = vpop.f32.mrb[142].mxu0 }
 0x288   : > { %v2165_v10 = vadd.f32 %v3540_v11, %v5052_v9  ;;  %v2323_v7 = vadd.f32 %v2322_v5, %v2162_v40  ;;  %v2325_v15 = vpop.f32.mrb[143].mxu0 }
 0x289   : > { %v2432_v42 = vadd.f32 %v2431_v34, %v2401_v4 }
 0x28a   : > { %v3541_v21 = vpop.f32.mrb[140].mxu1  ;;  %v2364_v36 = vadd.f32 %v2363_v53, %v2323_v7  ;;  %v2402_v39 = vmul.f32 %v2323_v7, %v2323_v7  ;;  %v2326_v58 = vadd.f32 %v2325_v15, %v2165_v10 }
 0x28b   : > { %v3542_v2 = vpop.f32.mrb[141].mxu1 }
 0x28c   : > { %v3543_v61 = vadd.f32 %v3542_v2, %v3541_v21  ;;  %v3544_v24 = vpop.f32.mrb[142].mxu1  ;;  %v2433_v30 = vadd.f32 %v2432_v42, %v2402_v39  ;;  %v2365_v9 = vadd.f32 %v2364_v36, %v2326_v58  ;;  %v2403_v22 = vmul.f32 %v2326_v58, %v2326_v58 }
 0x28d   : > { %v3545_v43 = vpop.f32.mrb[143].mxu1  ;;  %v3062_v48 = vpack.c.bf16 %v2326_v58, %v2323_v7 }
 0x28e   : > { %v2170_v41 = vadd.f32 %v3543_v61, %v5061_v32  ;;  %v3546_v59 = vadd.f32 %v3545_v43, %v3544_v24  ;;  %v2434_v54 = vadd.f32 %v2433_v30, %v2403_v22 }
 0x28f   : > { %3097 = vst [vmem:[%s5078_s26 + $0x70] sm:$0xff] %v3062_v48  }
 0x290   : > { %v2331_v20 = vadd.f32 %v3617_v51, %v2170_v41  ;;  %v2173_v25 = vadd.f32 %v3546_v59, %v5064_v6 }
 0x292   : > { %v2404_v18 = vmul.f32 %v2331_v20, %v2331_v20  ;;  %v2334_v46 = vadd.f32 %v3618_v19, %v2173_v25  ;;  %v2366_v17 = vadd.f32 %v2365_v9, %v2331_v20 }
 0x294   : > { %v2405_v32 = vmul.f32 %v2334_v46, %v2334_v46  ;;  %v3067_v50 = vpack.c.bf16 %v2334_v46, %v2331_v20  ;;  %v2367_v35 = vadd.f32 %v2366_v17, %v2334_v46  ;;  %v2435_v6 = vadd.f32 %v2434_v54, %v2404_v18 }
 0x296   : > { %3098 = vst [vmem:[%s5078_s26 + $0x78] sm:$0xff] %v3067_v50   ;;  %v2368_v56 = vrot.slane %v2367_v35, 4  ;;  %v2436_v16 = vadd.f32 %v2435_v6, %v2405_v32 }
 0x297   : > { %3885 = shalt.err (!%p3882_p6)
}
 0x298   : > { %s3886_s11 = scalar_lea.hbm %s5146_s6, 2048  ;;  %s3890_s9 = scalar_lea.hbm %s5228_s3, 4096 }
 0x299   : > { %p3887_p12 = scmp.ne.s32.totalorder %s5146_s6, %s3886_s11  ;;  %p3891_p11 = scmp.lt.u32.totalorder %s5146_s6, %s5228_s3 }
 0x29a   : > { %p3892_p7 = scmp.lt.u32.totalorder %s3890_s9, %s3886_s11  ;;  %p3894_p8 = scmp.lt.u32.totalorder %s3886_s11, %s5146_s6 }
 0x29b   : > { %p3888_p13 = pnand %p3887_p12, %p5255_p4 }
 0x29c   : > { %p3893_p3 = por %p3892_p7, %p3891_p11 }
 0x29d   : > { %p3889_p1 = pneg %p3888_p13 }
 0x29e   : > { %p3895_p5 = por %p3894_p8, %p3893_p3 }
 0x2a0   : > { %p3896_p10 = pnand %p3895_p5, %p3889_p1 }
 0x2a2   : > { %3899 = shalt.err (!%p3896_p10)
}
 0x2a3   : > { %s3983_s26 = smov 64   ;;  %s3984_s29 = smov 4   ;;  %v2369_v52 = vadd.f32 %v2368_v56, %v2367_v35  ;;  %v2437_v12 = vrot.slane %v2436_v16, 4  ;;  %vm2445_vm5 = vcmask 1041408  }
 0x2a4   : > { %3645 = dma.vmem_to_hbm [thread:$0]  (%p5255_p4), %s5148_s23, 2048, %s5146_s6, %s2609_s5, %s3983_s26, %s3983_s26, %s3984_s29  }
 0x2a5   : > { %v2370_v49 = vrot.slane %v2369_v52, 2  ;;  %v2438_v60 = vadd.f32 %v2437_v12, %v2436_v16  ;;  %s2777_s25 = sshll.u32 %s4186_s1, 3  ;;  %s2888_s20 = sshll.u32 %s4032_s19, 7 }
 0x2a6   : > { %s253_s10 = scalar_lea.vmem [#allocation9], %s2777_s25  ;;  %s5181_s5 = scalar_lea.hbm %s5229_s4, %s2888_s20 }
 0x2a7   : > { %v2371_v1 = vadd.f32 %v2370_v49, %v2369_v52  ;;  %v2439_v27 = vrot.slane %v2438_v60, 2  ;;  %s2643_s12 = sshll.u32 %s253_s10, 4  ;;  %s2614_s19 = scalar_lea.sflag [#allocation10], %s4186_s1  ;;  %s5183_s12 = int_to_ptr.vmem [resolvable:$true] %s2643_s12 }
 0x2a8   : > { %s3900_s13 = scalar_lea.vmem %s5183_s12, 128  ;;  %s3985_s8 = smov [#allocation9]  }
 0x2a9   : > { %v2372_v63 = vrot.slane %v2371_v1, 1  ;;  %v2440_v23 = vadd.f32 %v2439_v27, %v2438_v60  ;;  %p3901_p2 = scmp.ne.s32.totalorder %s5183_s12, %s3900_s13  ;;  %s3904_s11 = sshll.u32 %s3985_s8, 4  ;;  %s3905_s11 = int_to_ptr.vmem [resolvable:$false] %s3904_s11 }
 0x2aa   : > { %s3906_s14 = scalar_lea.vmem %s3905_s11, 256  ;;  %p3907_p6 = scmp.lt.s32.totalorder %s5183_s12, %s3905_s11 }
 0x2ab   : > { %v2441_v3 = vrot.slane %v2440_v23, 1  ;;  %v2373_v28 = vadd.f32 %v2372_v63, %v2371_v1  ;;  %p3902_p0 = pnand %p3901_p2, %p5255_p4  ;;  %p3908_p12 = scmp.lt.s32.totalorder %s3906_s14, %s3900_s13 }
 0x2ad   : > { %v2442_v13 = vadd.f32 %v2441_v3, %v2440_v23  ;;  %p3903_p9 = pneg %p3902_p0  ;;  %p3909_p13 = por %p3908_p12, %p3907_p6 }
 0x2af   : > { %v2444_v8 = vsel %vm594_vm0, %v2373_v28, %v2442_v13  ;;  %p3910_p1 = pnand %p3909_p13, %p3903_p9 }
 0x2b0   : > { %v2446_v14 = vsel %vm2445_vm5, %v2444_v8, 0.0 }
 0x2b1   : > { %2447 = vst [vmem:[%s253_s10] sm:$0xff] %v2446_v14 }
 0x2b2   : > { %3913 = shalt.err (!%p3910_p1)
}
 0x2b3   : > { %s3914_s1 = scalar_lea.hbm %s5181_s5, 128  ;;  %s3918_s30 = scalar_lea.hbm %s5229_s4, 256 }
 0x2b4   : > { %p3915_p11 = scmp.ne.s32.totalorder %s5181_s5, %s3914_s1  ;;  %p3919_p8 = scmp.lt.u32.totalorder %s5181_s5, %s5229_s4 }
 0x2b5   : > { %p3920_p5 = scmp.lt.u32.totalorder %s3918_s30, %s3914_s1  ;;  %p3922_p2 = scmp.lt.u32.totalorder %s3914_s1, %s5181_s5 }
 0x2b6   : > { %p3916_p7 = pnand %p3915_p11, %p5255_p4 }
 0x2b7   : > { %p3921_p10 = por %p3920_p5, %p3919_p8 }
 0x2b8   : > { %p3917_p3 = pneg %p3916_p7 }
 0x2b9   : > { %p3923_p0 = por %p3922_p2, %p3921_p10 }
 0x2bb   : > { %p3924_p9 = pnand %p3923_p0, %p3917_p3 }
 0x2bd   : > { %3927 = shalt.err (!%p3924_p9)
}
 0x2be   : > { %3646 = dma.vmem_to_hbm [thread:$0]  (%p5255_p4), %s5183_s12, 128, %s5181_s5, %s2614_s19  }
 0x2bf PF: > { %s2655_s29 = sand.u32 1, %s3962_s15   ;;  %p5256_p6 = scmp.ne.s32.totalorder %s5240_s28, 0 }
 0x2c0   : > { %p5257_p12 = scmp.ge.s32.totalorder %s3974_s18, 2  ;;  %s2656_s25 = scalar_lea.sflag [#allocation4], %s2655_s29 }
 0x2c2   : > { %p3661_p13 = pnand %p5257_p12, %p5256_p6 }
 0x2c4   : > { %3953 = dma.done.wait (!%p3661_p13), %s2656_s25, 2048  }
 0x2c5   : > { %3955 = vsyncadd (!%p3661_p13), %s2656_s25, 4294965248  ;;  %s2665_s20 = scalar_lea.sflag [#allocation10], %s2655_s29 }
 0x2c6   : > { %3957 = dma.done.wait (!%p3661_p13), %s2665_s20, 128  }
 0x2c7   : > { %3959 = vsyncadd (!%p3661_p13), %s2665_s20, 4294967168  ;;  %p22_p4 = scmp.ge.s32.totalorder %s4036_s21, 4   ;;  %s5258_s15 = smov %s3966_s16 }
 0x2c8   : > { %s5259_s16 = smov %s3970_s17  ;;  %s5260_s17 = smov %s4048_s24 }
 0x2c9   : > { %s5261_s18 = smov %s4036_s21  ;;  %24 = sbr.rel (!%p22_p4) target bundleno = 10 (0xa), region = 102 }
 0x2d0   :  { %2670 = vsyncpa [#allocation3], 1 }
 0x2d1   :  { %2672 = vsyncpa [#allocation3 + $0x1], 1 }
 0x2d2   :  { %2673 = vsyncpa [#allocation6], 1 }
 0x2d3   :  { %2674 = vsyncpa [#allocation4], 1 }
 0x2d4   :  { %2676 = vsyncpa [#allocation4 + $0x1], 1 }
 0x2d5   :  { %2677 = vsyncpa [#allocation10], 1 }
 0x2d6   :  { %2679 = vsyncpa [#allocation10 + $0x1], 1 }

// kernel: basic_block_forward.3
= control target key start
LH: loop header
LB: loop body
LE: loop exit
PB: predicated region body
PF: predicated region fallthrough
CT: control target
= control target key end

     0   :  { %9 = vsyncpa [#allocation3], 0  ;;  %s4761_s0 = inlined_call_operand.hbm [shape: bf16[2,18,18,128], index: 0, kind: input, shape index: {}]   ;;  %s4762_s1 = inlined_call_operand.hbm [shape: bf16[1152,128], index: 1, kind: input, shape index: {}]   ;;  %s4763_s2 = inlined_call_operand.hbm [shape: bf16[2,16,16,128], index: 2, kind: output, shape index: {0}]   ;;  %s4764_s3 = inlined_call_operand.hbm [shape: f32[2,8,128], index: 3, kind: output, shape index: {1}]  }
   0x1   :  { %11 = vsyncpa [#allocation3 + $0x1], 0 }
   0x2   :  { %12 = vsyncpa [#allocation6], 0 }
   0x3   :  { %13 = vsyncpa [#allocation4], 0 }
   0x4   :  { %15 = vsyncpa [#allocation4 + $0x1], 0 }
   0x5   :  { %16 = vsyncpa [#allocation9], 0 }
   0x6   :  { %18 = vsyncpa [#allocation9 + $0x1], 0  ;;  %s3731_s12 = smov 0   ;;  %s3733_s13 = smov 0  }
   0x7   :  { %s3735_s14 = smov 0   ;;  %s3737_s15 = smov 0  }
   0x8 LB: > { %s3752_s16 = sadd.s32 4294967295, %s3701_s15   ;;  %s2539_s17 = sadd.s32 4294967294, %s3701_s15   ;;  %s3701_s15 = sphi %s3737_s15, %s4784_s15   ;;  %s3697_s14 = sphi %s3735_s14, %s4783_s14   ;;  %s3693_s13 = sphi %s3733_s13, %s4782_s13   ;;  %s3689_s12 = sphi %s3731_s12, %s4781_s12  }
   0x9   : > { %p44_p0 = scmp.ne.s32.totalorder %s3693_s13, %s3689_s12  ;;  %p4765_p1 = scmp.eq.s32.totalorder %s3752_s16, 0 }
   0xa   : > { %p95_p3 = scmp.eq.s32.totalorder %s2539_s17, 1  ;;  %p2540_p5 = scmp.ge.s32.totalorder %s3701_s15, 1 }
   0xb   : > { %p3761_p4 = por %p4765_p1, %p44_p0  ;;  %p128_p7 = scmp.lt.s32.totalorder %s3701_s15, 3 }
   0xc   : > { %p3766_p6 = por %p95_p3, %p44_p0  ;;  %s3703_s21 = smov [#allocation5]  }
   0xd   : > { %s4768_s18 = scalar_select %p3761_p4, 1, 0 }
   0xe   : > { %s4769_s19 = scalar_select %p3766_p6, 1, 0 }
   0xf   : > { %p3771_p8 = pnand %p2540_p5, %p128_p7  ;;  %s140_s22 = sshll.u32 %s3703_s21, 4  ;;  %s3775_s22 = int_to_ptr.vmem [resolvable:$true] %s140_s22 }
  0x10   : > { %s3787_s24 = sadd.s32 1, %s3701_s15   ;;  %s31_s25 = sadd.s32 1, %s3697_s14 }
  0x11   : > { %s4770_s20 = scalar_select %p3771_p8, 1, 0 }
  0x12   : > { %p3372_p9 = pneg %p3771_p8  ;;  %s28_s26 = ssub.s32 %s3701_s15, %s3787_s24 }
  0x13   : > { %s3541_s29 = scalar_lea.hbm %s4762_s1, 9216 }
  0x14   : > { %p3782_p11 = pnand %p3372_p9, %p4765_p1  ;;  %p3542_p12 = scmp.ne.s32.totalorder %s4762_s1, %s3541_s29 }
  0x15   : > { %p3548_p5 = scmp.lt.u32.totalorder %s3541_s29, %s4762_s1 }
  0x16   : > { %p3543_p13 = pneg %p3782_p11 }
  0x18   : > { %p3544_p0 = pnand %p3543_p13, %p3542_p12 }
  0x1a   : > { %p3545_p3 = pneg %p3544_p0 }
  0x1c   : > { %p3550_p7 = pnand %p3548_p5, %p3545_p3 }
  0x1e   : > { %3553 = shalt.err (!%p3550_p7)
}
  0x1f   : > { %s3554_s7 = scalar_lea.vmem %s3775_s22, 9216  ;;  %p3562_p2 = scmp.lt.s32.totalorder %s3775_s22, %s3775_s22 }
  0x20   : > { %p3555_p9 = scmp.ne.s32.totalorder %s3775_s22, %s3554_s7  ;;  %p3563_p6 = scmp.lt.s32.totalorder %s3554_s7, %s3554_s7 }
  0x22   : > { %p3557_p10 = pnand %p3555_p9, %p3543_p13  ;;  %p3564_p4 = por %p3563_p6, %p3562_p2 }
  0x24   : > { %p3558_p1 = pneg %p3557_p10 }
  0x26   : > { %p3565_p8 = pnand %p3564_p4, %p3558_p1 }
  0x28   : > { %3568 = shalt.err (!%p3565_p8)
}
  0x29   : > { %s3704_s8 = smov 64   ;;  %s3705_s9 = smov 4  }
  0x2a   : > { %3375 = dma.hbm_to_vmem [thread:$0]  (!%p3782_p11), %s4762_s1, 9216, %s3775_s22, [#allocation6], %s3704_s8, %s3704_s8, %s3705_s9  }
  0x2b   : > { %p29_p1 = scmp.eq.s32.totalorder %s28_s26, 0  ;;  %p38_p2 = scmp.ne.s32.totalorder %s3697_s14, %s3693_s13 }
  0x2c   : > { %p39_p4 = scmp.eq.s32.totalorder %s3701_s15, 0  ;;  %p3388_p6 = scmp.lt.s32.totalorder %s3701_s15, 2 }
  0x2d   : > { %s3821_s17 = scalar_select %p29_p1, %s3697_s14, %s31_s25  }
  0x2e   : > { %p40_p8 = por %p39_p4, %p38_p2  ;;  %p4772_p10 = scmp.eq.s32.totalorder %s3752_s16, 1 }
  0x2f   : > { %s154_s23 = sand.u32 1, %s3697_s14   ;;  %s3360_s27 = smul.u32 3456, %s3701_s15 }
  0x30   : > { %p3825_p12 = por %p4772_p10, %p38_p2  ;;  %s3359_s28 = smul.u32 216, %s154_s23 }
  0x31   : > { %p3831_p13 = pnand %p3388_p6, %p40_p8  ;;  %s3838_s25 = scalar_lea.hbm %s4761_s0, %s3360_s27 }
  0x32   : > { %s158_s30 = scalar_lea.vmem [#allocation2], %s3359_s28  ;;  %s3842_s5 = scalar_lea.sflag [#allocation3], %s154_s23 }
  0x33   : > { %s165_s4 = sshll.u32 %s158_s30, 4  ;;  %s3569_s6 = scalar_lea.hbm %s3838_s25, 3456  ;;  %s3840_s4 = int_to_ptr.vmem [resolvable:$true] %s165_s4 }
  0x34   : > { %p3570_p11 = scmp.ne.s32.totalorder %s3838_s25, %s3569_s6  ;;  %p3571_p0 = pneg %p3831_p13 }
  0x35   : > { %s3574_s11 = scalar_lea.hbm %s4761_s0, 6912  ;;  %p3575_p7 = scmp.lt.u32.totalorder %s3838_s25, %s4761_s0 }
  0x36   : > { %p3572_p3 = pnand %p3571_p0, %p3570_p11  ;;  %p3576_p9 = scmp.lt.u32.totalorder %s3574_s11, %s3569_s6 }
  0x37   : > { %p3578_p2 = scmp.lt.u32.totalorder %s3569_s6, %s3838_s25 }
  0x38   : > { %p3573_p5 = pneg %p3572_p3  ;;  %p3577_p1 = por %p3576_p9, %p3575_p7 }
  0x3a   : > { %p3579_p4 = por %p3578_p2, %p3577_p1 }
  0x3c   : > { %p3580_p6 = pnand %p3579_p4, %p3573_p5 }
  0x3e   : > { %3583 = shalt.err (!%p3580_p6)
}
  0x3f   : > { %s3584_s23 = scalar_lea.vmem %s3840_s4, 3456  ;;  %s3706_s28 = smov [#allocation2]  }
  0x40   : > { %p3585_p8 = scmp.ne.s32.totalorder %s3840_s4, %s3584_s23  ;;  %s3589_s26 = sshll.u32 %s3706_s28, 4  ;;  %s3590_s26 = int_to_ptr.vmem [resolvable:$false] %s3589_s26 }
  0x41   : > { %s3591_s30 = scalar_lea.vmem %s3590_s26, 6912  ;;  %p3592_p3 = scmp.lt.s32.totalorder %s3840_s4, %s3590_s26 }
  0x42   : > { %p3587_p10 = pnand %p3585_p8, %p3571_p0  ;;  %p3593_p7 = scmp.lt.s32.totalorder %s3591_s30, %s3584_s23 }
  0x44   : > { %p3588_p11 = pneg %p3587_p10  ;;  %p3594_p9 = por %p3593_p7, %p3592_p3 }
  0x46   : > { %p3595_p1 = pnand %p3594_p9, %p3588_p11 }
  0x48   : > { %3598 = shalt.err (!%p3595_p1)
}
  0x49   : > { %3379 = dma.hbm_to_vmem [thread:$0]  (!%p3831_p13), %s3838_s25, 3456, %s3840_s4, %s3842_s5, %s3704_s8, %s3704_s8, %s3705_s9  }
  0x4a   : > { %p4775_p0 = scmp.ne.s32.totalorder %s4770_s20, 0 }
  0x4b   : > { %s3876_s6 = sand.u32 (!%p4775_p0), 1, %s3693_s13   ;;  %p4776_p5 = scmp.ne.s32.totalorder (!%p4775_p0), %s4768_s18, 0 }
  0x4c   : > { %177 = sbr.rel (%p4775_p0) target bundleno = 665 (0x299), region = 28  ;;  %s180_s10 = scalar_lea.sflag (!%p4775_p0), [#allocation3], %s3876_s6 }
  0x4d   : > { %s3361_s7 = smul.u32 (!%p4775_p0), 216, %s3876_s6 }
  0x4f   : > { %s3880_s11 = scalar_lea.vmem (!%p4775_p0), [#allocation2], %s3361_s7 }
  0x53   : > { %3672 = dma.done.wait (%p4776_p5), %s180_s10, 3456  }
  0x54   : > { %3674 = vsyncadd (%p4776_p5), %s180_s10, 4294963840  ;;  %p4777_p13 = scmp.eq.s32.totalorder %s3752_s16, 0 }
  0x56   : > { %3676 = dma.done.wait (%p4777_p13), [#allocation6], 9216   ;;  %p4778_p2 = pmov %p4777_p13 }
  0x57   : > { %v3428_v0 = vld [vmem:[#allocation5 + $0x40] sm:$0xff]   ;;  %v3430_v2 = vld [vmem:[#allocation5 + $0x48] sm:$0xff]   ;;  %v3432_v4 = vld [vmem:[#allocation5 + $0x50] sm:$0xff]   ;;  %vm414_vm0 = vsmask.f32 7424  ;;  %vm623_vm1 = vcmask 1046528  }
  0x58   : > { %3678 = vsyncadd (%p4778_p2), [#allocation6], 4294958080  ;;  %v3429_v1 = vld [vmem:[#allocation5] sm:$0xff]   ;;  %2823 = vmatprep.subr.bf16.mxu0 %v3428_v0  ;;  %3343 = vmatprep.subr.bf16.mxu1 %v3428_v0  ;;  %v3431_v3 = vld [vmem:[#allocation5 + $0x8] sm:$0xff]   ;;  %s2546_s18 = sshll.u32 %s3876_s6, 7  ;;  %s2727_s8 = sshll.u32 %s3752_s16, 11 }
  0x59   : > { %2824 = vmatpush3.bf16.msra.mxu0 %v3429_v1  ;;  %3351 = vmatpush3.bf16.msra.mxu1 %v3429_v1  ;;  %v3433_v5 = vld [vmem:[#allocation5 + $0x10] sm:$0xff]   ;;  %v3434_v6 = vld [vmem:[#allocation5 + $0x58] sm:$0xff]   ;;  %v3436_v8 = vld [vmem:[#allocation5 + $0x60] sm:$0xff]   ;;  %s4621_s20 = scalar_lea.vmem [#allocation7], %s2546_s18  ;;  %s4683_s4 = scalar_lea.hbm %s4763_s2, %s2727_s8 }
  0x5a   : > { %2825 = vmatprep.subr.bf16.mxu0 %v3430_v2  ;;  %3344 = vmatprep.subr.bf16.mxu1 %v3430_v2  ;;  %v3435_v7 = vld [vmem:[#allocation5 + $0x18] sm:$0xff]   ;;  %v3437_v9 = vld [vmem:[#allocation5 + $0x20] sm:$0xff]   ;;  %v3438_v10 = vld [vmem:[#allocation5 + $0x68] sm:$0xff]   ;;  %s2411_s9 = sshll.u32 %s4621_s20, 4  ;;  %s2393_s5 = scalar_lea.sflag [#allocation4], %s3876_s6  ;;  %s4685_s9 = int_to_ptr.vmem [resolvable:$true] %s2411_s9 }
  0x5b   : > { %v3891_v11 = vld [vmem:[%s3880_s11] sm:$0xff]   ;;  %v3894_v12 = vld [vmem:[%s3880_s11 + $0x8] ss:$0 sps:$4 sm:$0x11]   ;;  %v3446_v13 = vld [vmem:[%s3880_s11 + $0x90] sm:$0xff]   ;;  %s3599_s27 = scalar_lea.vmem %s4685_s9, 2048 }
  0x5c   : > { %v3439_v14 = vld [vmem:[#allocation5 + $0x28] sm:$0xff]   ;;  %v416_v15 = vshrl.u32 %v3891_v11, 16  ;;  %v418_v16 = vshll.u32 %v3891_v11, 16  ;;  %v423_v17 = vshll.u32 %v3894_v12, 16  ;;  %v3440_v18 = vld [vmem:[#allocation5 + $0x70] sm:$0xff]   ;;  %v560_v20 = vshrl.u32 %v3446_v13, 16  ;;  %p3600_p4 = scmp.ne.s32.totalorder %s4685_s9, %s3599_s27 }
  0x5d   : > { %2826 = vmatpush3.bf16.msra.mxu0 %v3431_v3  ;;  %3352 = vmatpush3.bf16.msra.mxu1 %v3431_v3  ;;  %v3447_v19 = vld [vmem:[%s3880_s11 + $0x98] ss:$0 sps:$4 sm:$0x11]   ;;  %v562_v21 = vshll.u32 %v3446_v13, 16  ;;  %v3441_v24 = vld [vmem:[#allocation5 + $0x30] sm:$0xff]   ;;  %v3442_v28 = vld [vmem:[#allocation5 + $0x78] sm:$0xff]  }
  0x5e   : > { %2827 = vmatprep.subr.bf16.mxu0 %v3432_v4  ;;  %3345 = vmatprep.subr.bf16.mxu1 %v3432_v4  ;;  %v420_v22 = vrot.slane %v418_v16, 1  ;;  %v425_v23 = vrot.slane %v423_v17, 1  ;;  %v567_v26 = vshll.u32 %v3447_v19, 16  ;;  %v3443_v31 = vld [vmem:[#allocation5 + $0x38] sm:$0xff]   ;;  %v3448_v34 = vld [vmem:[#allocation5 + $0xc0] sm:$0xff]   ;;  %v3452_v48 = vld [vmem:[#allocation5 + $0xc8] sm:$0xff]   ;;  %p3601_p6 = pnand %p3600_p4, %p3825_p12 }
  0x5f   : > { %v564_v25 = vrot.slane %v562_v21, 1  ;;  %v3449_v35 = vld [vmem:[#allocation5 + $0x140] sm:$0xff]   ;;  %v3919_v43 = vld [vmem:[%s3880_s11 + $0xa4] ss:$0 sps:$4 sm:$0x11]   ;;  %v3460_v62 = vld [vmem:[#allocation5 + $0xd8] sm:$0xff]  }
  0x60   : > { %v421_v27 = vor.u32 %v420_v22, %v416_v15  ;;  %v569_v30 = vrot.slane %v567_v26, 1  ;;  %v3906_v36 = vld [vmem:[%s3880_s11 + $0xc] sm:$0xff]   ;;  %v3909_v37 = vld [vmem:[%s3880_s11 + $0x14] ss:$0 sps:$4 sm:$0x11]   ;;  %v3912_v38 = vld [vmem:[%s3880_s11 + $0x9c] sm:$0xff]   ;;  %p3602_p8 = pneg %p3601_p6 }
  0x61   : > { %2828 = vmatpush3.bf16.msra.mxu0 %v3433_v5  ;;  %3353 = vmatpush3.bf16.msra.mxu1 %v3433_v5  ;;  %v565_v29 = vor.u32 %v564_v25, %v560_v20  ;;  %v3450_v39 = vld [vmem:[#allocation5 + $0x80] sm:$0xff]   ;;  %v428_v40 = vshrl.u32 %v3906_v36, 16  ;;  %v430_v41 = vshll.u32 %v3906_v36, 16  ;;  %v435_v42 = vshll.u32 %v3909_v37, 16  ;;  %v3453_v53 = vld [vmem:[#allocation5 + $0x88] sm:$0xff]   ;;  %v3458_v59 = vld [vmem:[#allocation5 + $0xd0] sm:$0xff]  }
  0x62   : > { %2829 = vmatprep.subr.bf16.mxu0 %v3434_v6  ;;  %3346 = vmatprep.subr.bf16.mxu1 %v3434_v6  ;;  %v426_v32 = vsel %vm414_vm0, %v421_v27, %v425_v23  ;;  %v572_v44 = vshrl.u32 %v3912_v38, 16  ;;  %v574_v45 = vshll.u32 %v3912_v38, 16  ;;  %v3451_v46 = vld [vmem:[#allocation5 + $0x100] sm:$0xff]   ;;  %v579_v51 = vshll.u32 %v3919_v43, 16  ;;  %v3461_v57 = vld [vmem:[#allocation5 + $0x148] sm:$0xff]   ;;  %v3459_v60 = vld [vmem:[#allocation5 + $0x90] sm:$0xff]  }
  0x63   : > { %1348 = vmatprep.mubr.bf16.mxu0 %v426_v32  ;;  %v3903_v33 = vsel %vm414_vm0, %v565_v29, %v569_v30  ;;  %v432_v47 = vrot.slane %v430_v41, 1  ;;  %v437_v49 = vrot.slane %v435_v42, 1  ;;  %v3463_v61 = vld [vmem:[#allocation5 + $0x108] sm:$0xff]   ;;  %v3943_v4 = vld [vmem:[%s3880_s11 + $0xa8] sm:$0xff]   ;;  %v3468_v16 = vld [vmem:[#allocation5 + $0xe0] sm:$0xff]   ;;  %s3707_s22 = smov [#allocation7]  }
  0x64   : > { %1444 = vmatprep.mubr.bf16.mxu1 %v3903_v33  ;;  %v576_v50 = vrot.slane %v574_v45, 1  ;;  %v581_v55 = vrot.slane %v579_v51, 1  ;;  %v3934_v63 = vld [vmem:[%s3880_s11 + $0x18] sm:$0xff]   ;;  %v3937_v0 = vld [vmem:[%s3880_s11 + $0x20] ss:$0 sps:$4 sm:$0x11]  }
  0x65   : > { %2830 = vmatpush3.bf16.msra.mxu0 %v3435_v7  ;;  %3354 = vmatpush3.bf16.msra.mxu1 %v3435_v7  ;;  %v433_v52 = vor.u32 %v432_v47, %v428_v40  ;;  %v440_v1 = vshrl.u32 %v3934_v63, 16  ;;  %v442_v2 = vshll.u32 %v3934_v63, 16  ;;  %v447_v3 = vshll.u32 %v3937_v0, 16  ;;  %v3946_v5 = vld [vmem:[%s3880_s11 + $0xb0] ss:$0 sps:$4 sm:$0x11]  }
  0x66   : > { %2831 = vmatprep.subr.bf16.mxu0 %v3436_v8  ;;  %3347 = vmatprep.subr.bf16.mxu1 %v3436_v8  ;;  %v577_v54 = vor.u32 %v576_v50, %v572_v44  ;;  %v584_v8 = vshrl.u32 %v3943_v4, 16  ;;  %v3470_v21 = vld [vmem:[#allocation5 + $0xe8] sm:$0xff]   ;;  %v3961_v23 = vld [vmem:[%s3880_s11 + $0x2c] ss:$0 sps:$4 sm:$0x11]   ;;  %v625_v45 = vrot.slane %v3894_v12, 1 }
  0x67   : > { %v3926_v56 = vsel %vm414_vm0, %v433_v52, %v437_v49  ;;  %v444_v6 = vrot.slane %v442_v2, 1  ;;  %v449_v7 = vrot.slane %v447_v3, 1  ;;  %v3957_v22 = vld [vmem:[%s3880_s11 + $0x24] sm:$0xff]   ;;  %v459_v29 = vshll.u32 %v3961_v23, 16  ;;  %v3485_v3 = vld [vmem:[#allocation5 + $0x180] sm:$0xff]   ;;  %s3603_s23 = sshll.u32 %s3707_s22, 4  ;;  %s3604_s23 = int_to_ptr.vmem [resolvable:$false] %s3603_s23 }
  0x68   : > { %v3930_v58 = vsel %vm414_vm0, %v577_v54, %v581_v55  ;;  %v452_v26 = vshrl.u32 %v3957_v22, 16  ;;  %v454_v27 = vshll.u32 %v3957_v22, 16  ;;  %v3974_v30 = vld [vmem:[%s3880_s11 + $0xbc] ss:$0 sps:$4 sm:$0x11]   ;;  %v3477_v42 = vld [vmem:[#allocation5 + $0x150] sm:$0xff]   ;;  %p3606_p10 = scmp.lt.s32.totalorder %s4685_s9, %s3604_s23 }
  0x69   : > { %2832 = vmatpush3.bf16.msra.mxu0 %v3437_v9  ;;  %3355 = vmatpush3.bf16.msra.mxu1 %v3437_v9  ;;  %v586_v9 = vshll.u32 %v3943_v4, 16  ;;  %v603_v41 = vshll.u32 %v3974_v30, 16  ;;  %v3479_v49 = vld [vmem:[#allocation5 + $0x110] sm:$0xff]   ;;  %v624_v50 = vrot.slane %v3891_v11, 1  ;;  %v627_v12 = vrot.slane %v3906_v36, 1  ;;  %v3994_v55 = vld [vmem:[%s3880_s11 + $0x30] sm:$0xff]  }
  0x6a   : > { %2833 = vmatprep.subr.bf16.mxu0 %v3438_v10  ;;  %3348 = vmatprep.subr.bf16.mxu1 %v3438_v10  ;;  %v3462_v10 = vld [vmem:[#allocation5 + $0x98] sm:$0xff]   ;;  %v3478_v52 = vld [vmem:[#allocation5 + $0xb0] sm:$0xff]   ;;  %v628_v54 = vrot.slane %v3909_v37, 1  ;;  %s3605_s28 = scalar_lea.vmem %s3604_s23, 4096 }
  0x6b   : > { %v588_v15 = vrot.slane %v586_v9, 1  ;;  %v605_v47 = vrot.slane %v603_v41, 1  ;;  %v626_v9 = vsel %vm623_vm1, %v624_v50, %v625_v45  ;;  %v631_v45 = vrot.slane %v3937_v0, 1  ;;  %p3607_p11 = scmp.lt.s32.totalorder %s3605_s28, %s3599_s27 }
  0x6d   : > { %2834 = vmatpush3.bf16.msra.mxu0 %v3439_v14  ;;  %3356 = vmatpush3.bf16.msra.mxu1 %v3439_v14  ;;  %v445_v14 = vor.u32 %v444_v6, %v440_v1  ;;  %v589_v20 = vor.u32 %v588_v15, %v584_v8  ;;  %v3486_v6 = vld [vmem:[#allocation5 + $0x158] sm:$0xff]   ;;  %p3608_p3 = por %p3607_p11, %p3606_p10 }
  0x6e   : > { %2835 = vmatprep.subr.bf16.mxu0 %v3440_v18  ;;  %3349 = vmatprep.subr.bf16.mxu1 %v3440_v18  ;;  %v3469_v18 = vld [vmem:[#allocation5 + $0xa0] sm:$0xff]  }
  0x6f   : > { %v3954_v19 = vsel %vm414_vm0, %v445_v14, %v449_v7  ;;  %v3487_v7 = vld [vmem:[#allocation5 + $0x118] sm:$0xff]   ;;  %p3609_p7 = pnand %p3608_p3, %p3602_p8 }
  0x71   : > { %2836 = vmatpush3.bf16.msra.mxu0 %v3441_v24  ;;  %3357 = vmatpush3.bf16.msra.mxu1 %v3441_v24  ;;  %v3964_v24 = vld [vmem:[%s3880_s11 + $0xb4] sm:$0xff]  }
  0x72   : > { %2837 = vmatprep.subr.bf16.mxu0 %v3442_v28  ;;  %3350 = vmatprep.subr.bf16.mxu1 %v3442_v28  ;;  %v3471_v28 = vld [vmem:[#allocation5 + $0xa8] sm:$0xff]   ;;  %v598_v32 = vshll.u32 %v3964_v24, 16 }
  0x74   : > { %v600_v40 = vrot.slane %v598_v32, 1 }
  0x75   : > { %2838 = vmatpush3.bf16.msra.mxu0 %v3443_v31  ;;  %3358 = vmatpush3.bf16.msra.mxu1 %v3443_v31  ;;  %v596_v31 = vshrl.u32 %v3964_v24, 16 }
  0x76   : > { %2935 = vmatprep.subr.bf16.mxu1 %v3448_v34  ;;  %3047 = vmatprep.subr.bf16.mxu0 %v3449_v35  ;;  %v456_v34 = vrot.slane %v454_v27, 1  ;;  %v3476_v35 = vld [vmem:[#allocation5 + $0xf0] sm:$0xff]  }
  0x78   : > { %1349 = vmatmul.mubr.bf16.vlgmr.msra.gmra.mrb[0].mxu0 %v3891_v11  ;;  %1445 = vmatmul.mubr.bf16.vlgmr.msra.gmra.mrb[0].mxu1 %v3446_v13  ;;  %v591_v13 = vshll.u32 %v3946_v5, 16  ;;  %v457_v44 = vor.u32 %v456_v34, %v452_v26  ;;  %v3481_v11 = vld [vmem:[#allocation5 + $0xb8] sm:$0xff]  }
  0x79   : > { %2936 = vmatpush3.bf16.msra.mxu1 %v3450_v39  ;;  %3048 = vmatpush3.bf16.msra.mxu0 %v3451_v46  ;;  %v461_v39 = vrot.slane %v459_v29, 1  ;;  %v601_v46 = vor.u32 %v600_v40, %v596_v31  ;;  %v3493_v31 = vld [vmem:[#allocation5 + $0x1c8] sm:$0xff]  }
  0x7a   : > { %2937 = vmatprep.subr.bf16.mxu1 %v3452_v48  ;;  %1356 = vmatprep.mubr.bf16.mxu0 %v3926_v56  ;;  %v593_v17 = vrot.slane %v591_v13, 1  ;;  %v4011_v13 = vld [vmem:[%s3880_s11 + $0x44] ss:$0 sps:$4 sm:$0x11]  }
  0x7b   : > { %1452 = vmatprep.mubr.bf16.mxu1 %v3930_v58  ;;  %3049 = vmatprep.subr.bf16.mxu0 %v3461_v57  ;;  %v3983_v48 = vsel %vm414_vm0, %v457_v44, %v461_v39  ;;  %v3988_v51 = vsel %vm414_vm0, %v601_v46, %v605_v47  ;;  %v3997_v57 = vld [vmem:[%s3880_s11 + $0x38] ss:$0 sps:$4 sm:$0x11]   ;;  %v4043_v47 = vld [vmem:[%s3880_s11 + $0x5c] ss:$0 sps:$4 sm:$0x11]  }
  0x7c   : > { %v3967_v25 = vsel %vm414_vm0, %v589_v20, %v593_v17  ;;  %v471_v37 = vshll.u32 %v3997_v57, 16  ;;  %v4020_v17 = vld [vmem:[%s3880_s11 + $0x48] sm:$0xff]   ;;  %v3492_v20 = vld [vmem:[#allocation5 + $0x160] sm:$0xff]   ;;  %v3495_v40 = vld [vmem:[#allocation5 + $0x188] sm:$0xff]   ;;  %v507_v0 = vshll.u32 %v4043_v47, 16 }
  0x7d   : > { %2938 = vmatpush3.bf16.msra.mxu1 %v3453_v53  ;;  %3050 = vmatpush3.bf16.msra.mxu0 %v3463_v61  ;;  %v3480_v53 = vld [vmem:[#allocation5 + $0xf8] sm:$0xff]   ;;  %v466_v61 = vshll.u32 %v3994_v55, 16  ;;  %v488_v27 = vshrl.u32 %v4020_v17, 16 }
  0x7e   : > { %2939 = vmatprep.subr.bf16.mxu1 %v3458_v59  ;;  %3051 = vmatprep.subr.bf16.mxu0 %v3477_v42  ;;  %v630_v59 = vrot.slane %v3934_v63, 1  ;;  %v473_v2 = vrot.slane %v471_v37, 1  ;;  %v4035_v42 = vsel %vm623_vm1, %v627_v12, %v628_v54  ;;  %v4039_v46 = vld [vmem:[%s3880_s11 + $0x54] sm:$0xff]  }
  0x7f   : > { %v468_v1 = vrot.slane %v466_v61, 1  ;;  %v502_v12 = vshll.u32 %v4039_v46, 16  ;;  %v3502_v61 = vld [vmem:[#allocation5 + $0x1d0] sm:$0xff]  }
  0x80   : > { %1357 = vmatmul.mubr.bf16.gmra.mrb[4].mxu0 %v3906_v36  ;;  %1453 = vmatmul.mubr.bf16.gmra.mrb[4].mxu1 %v3912_v38 }
  0x81   : > { %2940 = vmatpush3.bf16.msra.mxu1 %v3459_v60  ;;  %1364 = vmatprep.mubr.bf16.mxu0 %v3954_v19  ;;  %v464_v60 = vshrl.u32 %v3994_v55, 16  ;;  %v504_v54 = vrot.slane %v502_v12, 1  ;;  %v4102_v12 = vld [vmem:[%s3880_s11 + $0x80] ss:$0 sps:$4 sm:$0x11]  }
  0x82   : > { %2941 = vmatprep.subr.bf16.mxu1 %v3460_v62  ;;  %1460 = vmatprep.mubr.bf16.mxu1 %v3967_v25  ;;  %v3484_v62 = vld [vmem:[#allocation5 + $0x1c0] sm:$0xff]  }
  0x83   : > { %3052 = vmatpush3.bf16.msra.mxu0 %v3479_v49  ;;  %v469_v8 = vor.u32 %v468_v1, %v464_v60  ;;  %v3498_v49 = vld [vmem:[#allocation5 + $0x168] sm:$0xff]   ;;  %v4059_v60 = vld [vmem:[%s3880_s11 + $0x68] ss:$0 sps:$4 sm:$0x11]  }
  0x84   : > { %3053 = vmatprep.subr.bf16.mxu0 %v3486_v6 }
  0x85   : > { %2942 = vmatpush3.bf16.msra.mxu1 %v3462_v10  ;;  %v4008_v10 = vld [vmem:[%s3880_s11 + $0x3c] sm:$0xff]  }
  0x86   : > { %2943 = vmatprep.subr.bf16.mxu1 %v3468_v16  ;;  %v476_v14 = vshrl.u32 %v4008_v10, 16  ;;  %v478_v15 = vshll.u32 %v4008_v10, 16  ;;  %v483_v16 = vshll.u32 %v4011_v13, 16 }
  0x87   : > { %3054 = vmatpush3.bf16.msra.mxu0 %v3487_v7 }
  0x88   : > { %1365 = vmatmul.mubr.bf16.gmra.mrb[8].mxu0 %v3934_v63  ;;  %1461 = vmatmul.mubr.bf16.gmra.mrb[8].mxu1 %v3943_v4  ;;  %v485_v26 = vrot.slane %v483_v16, 1  ;;  %v633_v16 = vrot.slane %v3957_v22, 1 }
  0x89   : > { %2944 = vmatpush3.bf16.msra.mxu1 %v3469_v18  ;;  %1372 = vmatprep.mubr.bf16.mxu0 %v3983_v48  ;;  %v4024_v18 = vld [vmem:[%s3880_s11 + $0x50] ss:$0 sps:$4 sm:$0x11]  }
  0x8a   : > { %2945 = vmatprep.subr.bf16.mxu1 %v3470_v21  ;;  %1468 = vmatprep.mubr.bf16.mxu1 %v3988_v51  ;;  %v480_v21 = vrot.slane %v478_v15, 1  ;;  %v495_v29 = vshll.u32 %v4024_v18, 16  ;;  %v3506_v15 = vld [vmem:[#allocation5 + $0x170] sm:$0xff]  }
  0x8b   : > { %3055 = vmatprep.subr.bf16.mxu0 %v3492_v20  ;;  %v4078_v20 = vld [vmem:[%s3880_s11 + $0x74] ss:$0 sps:$4 sm:$0x11]  }
  0x8c   : > { %v481_v32 = vor.u32 %v480_v21, %v476_v14  ;;  %v497_v39 = vrot.slane %v495_v29, 1  ;;  %v4073_v14 = vld [vmem:[%s3880_s11 + $0x6c] sm:$0xff]  }
  0x8d   : > { %2946 = vmatpush3.bf16.msra.mxu1 %v3471_v28  ;;  %v490_v28 = vshll.u32 %v4020_v17, 16  ;;  %v3507_v21 = vld [vmem:[#allocation5 + $0x130] sm:$0xff]   ;;  %v3510_v29 = vld [vmem:[#allocation5 + $0x1d8] sm:$0xff]  }
  0x8e   : > { %2947 = vmatprep.subr.bf16.mxu1 %v3476_v35  ;;  %v3494_v35 = vld [vmem:[#allocation5 + $0x120] sm:$0xff]   ;;  %v4032_v41 = vsel %vm414_vm0, %v481_v32, %v485_v26  ;;  %v524_v32 = vshrl.u32 %v4073_v14, 16 }
  0x8f   : > { %v492_v34 = vrot.slane %v490_v28, 1  ;;  %3056 = vmatpush3.bf16.msra.mxu0 %v3494_v35  ;;  %v526_v28 = vshll.u32 %v4073_v14, 16  ;;  %v531_v35 = vshll.u32 %v4078_v20, 16 }
  0x90   : > { %1373 = vmatmul.mubr.bf16.gmra.mrb[12].mxu0 %v3957_v22  ;;  %1469 = vmatmul.mubr.bf16.gmra.mrb[12].mxu1 %v3964_v24 }
  0x91   : > { %2948 = vmatpush3.bf16.msra.mxu1 %v3478_v52  ;;  %1509 = vmatprep.mubr.bf16.mxu1 %v3906_v36  ;;  %v4014_v36 = vsel %vm414_vm0, %v469_v8, %v473_v2  ;;  %v493_v44 = vor.u32 %v492_v34, %v488_v27  ;;  %v500_v52 = vshrl.u32 %v4039_v46, 16  ;;  %v3503_v2 = vld [vmem:[#allocation5 + $0x190] sm:$0xff]   ;;  %v4090_v34 = vld [vmem:[%s3880_s11 + $0x78] sm:$0xff]  }
  0x92   : > { %2949 = vmatprep.subr.bf16.mxu1 %v3480_v53  ;;  %1380 = vmatprep.mubr.bf16.mxu0 %v4014_v36  ;;  %v3499_v53 = vld [vmem:[#allocation5 + $0x128] sm:$0xff]  }
  0x93   : > { %v4046_v50 = vsel %vm414_vm0, %v493_v44, %v497_v39  ;;  %3057 = vmatprep.subr.bf16.mxu0 %v3498_v49  ;;  %v505_v37 = vor.u32 %v504_v54, %v500_v52  ;;  %v3512_v39 = vld [vmem:[#allocation5 + $0x178] sm:$0xff]   ;;  %v528_v44 = vrot.slane %v526_v28, 1  ;;  %v636_v49 = vrot.slane %v3994_v55, 1 }
  0x94   : > { %3058 = vmatpush3.bf16.msra.mxu0 %v3499_v53  ;;  %v637_v52 = vrot.slane %v3997_v57, 1  ;;  %v533_v53 = vrot.slane %v531_v35, 1  ;;  %v538_v54 = vshll.u32 %v4090_v34, 16  ;;  %v3518_v57 = vld [vmem:[#allocation5 + $0x1a0] sm:$0xff]  }
  0x95   : > { %2950 = vmatpush3.bf16.msra.mxu1 %v3481_v11  ;;  %v4055_v11 = vld [vmem:[%s3880_s11 + $0x60] sm:$0xff]   ;;  %3059 = vmatprep.subr.bf16.mxu0 %v3506_v15 }
  0x96   : > { %3159 = vmatprep.subr.bf16.mxu1 %v3484_v62  ;;  %v509_v62 = vrot.slane %v507_v0, 1  ;;  %v514_v1 = vshll.u32 %v4055_v11, 16  ;;  %v512_v6 = vshrl.u32 %v4055_v11, 16  ;;  %v529_v0 = vor.u32 %v528_v44, %v524_v32  ;;  %v3519_v15 = vld [vmem:[#allocation5 + $0x1e8] sm:$0xff]  }
  0x98   : > { %1510 = vmatmul.mubr.bf16.vlgmr.msra.gmra.mrb[16].mxu1 %v626_v9  ;;  %1381 = vmatmul.mubr.bf16.gmra.mrb[16].mxu0 %v3994_v55  ;;  %v4069_v7 = vsel %vm414_vm0, %v505_v37, %v509_v62  ;;  %v516_v8 = vrot.slane %v514_v1, 1  ;;  %v519_v9 = vshll.u32 %v4059_v60, 16  ;;  %v4106_v37 = vld [vmem:[#allocation5 + $0x200] sm:$0xff]   ;;  %v4109_v62 = vsel %vm623_vm1, %v636_v49, %v637_v52  ;;  %v3527_v52 = vld [vmem:[#allocation5 + $0x1b8] sm:$0xff]  }
  0x99   : > { %3160 = vmatpush3.bf16.msra.mxu1 %v3485_v3  ;;  %1517 = vmatprep.mubr.bf16.mxu1 %v3934_v63  ;;  %v4065_v3 = vsel %vm623_vm1, %v630_v59, %v631_v45  ;;  %v634_v59 = vrot.slane %v3961_v23, 1  ;;  %v3511_v23 = vld [vmem:[#allocation5 + $0x198] sm:$0xff]   ;;  %v536_v1 = vshrl.u32 %v4090_v34, 16 }
  0x9a   : > { %3161 = vmatprep.subr.bf16.mxu1 %v3493_v31  ;;  %1388 = vmatprep.mubr.bf16.mxu0 %v4032_v41  ;;  %v517_v26 = vor.u32 %v516_v8, %v512_v6  ;;  %v521_v27 = vrot.slane %v519_v9, 1  ;;  %v3513_v45 = vld [vmem:[#allocation5 + $0x138] sm:$0xff]   ;;  %v4118_v8 = vsel %vm414_vm0, %v529_v0, %v533_v53  ;;  %v540_v9 = vrot.slane %v538_v54, 1 }
  0x9b   : > { %3060 = vmatpush3.bf16.msra.mxu0 %v3507_v21  ;;  %v4086_v31 = vsel %vm623_vm1, %v633_v16, %v634_v59  ;;  %v4114_v6 = vld [vmem:[%s3880_s11 + $0x84] sm:$0xff]   ;;  %v639_v16 = vrot.slane %v4008_v10, 1  ;;  %v4123_v59 = vld [vmem:[%s3880_s11 + $0x8c] ss:$0 sps:$4 sm:$0x11]   ;;  %v640_v21 = vrot.slane %v4011_v13, 1 }
  0x9c   : > { %3061 = vmatprep.subr.bf16.mxu0 %v3512_v39  ;;  %v541_v28 = vor.u32 %v540_v9, %v536_v1  ;;  %v550_v32 = vshll.u32 %v4114_v6, 16  ;;  %v3525_v39 = vld [vmem:[#allocation5 + $0x1f8] sm:$0xff]   ;;  %v548_v44 = vshrl.u32 %v4114_v6, 16  ;;  %v555_v13 = vshll.u32 %v4123_v59, 16 }
  0x9d   : > { %3162 = vmatpush3.bf16.msra.mxu1 %v3495_v40  ;;  %v4094_v40 = vsel %vm414_vm0, %v517_v26, %v521_v27  ;;  %v3521_v26 = vld [vmem:[#allocation5 + $0x1a8] sm:$0xff]   ;;  %v3522_v27 = vld [vmem:[#allocation5 + $0x1f0] sm:$0xff]   ;;  %v4131_v35 = vsel %vm623_vm1, %v639_v16, %v640_v21  ;;  %v642_v0 = vrot.slane %v4020_v17, 1  ;;  %v643_v53 = vrot.slane %v4024_v18, 1 }
  0x9e   : > { %3163 = vmatprep.subr.bf16.mxu1 %v3502_v61  ;;  %v3516_v61 = vld [vmem:[#allocation5 + $0x1e0] sm:$0xff]   ;;  %v552_v49 = vrot.slane %v550_v32, 1  ;;  %v646_v18 = vrot.slane %v4043_v47, 1  ;;  %v649_v16 = vrot.slane %v4059_v60, 1  ;;  %v3520_v47 = vld [vmem:[#allocation5 + $0x208] sm:$0xff]  }
  0x9f   : > { %3062 = vmatpush3.bf16.msra.mxu0 %v3513_v45  ;;  %v4145_v1 = vsel %vm623_vm1, %v642_v0, %v643_v53  ;;  %v3530_v32 = vld [vmem:[#allocation5 + $0x228] sm:$0xff]  }
  0xa0   : > { %1518 = vmatmul.mubr.bf16.gmra.mrb[20].mxu1 %v4035_v42  ;;  %1389 = vmatmul.mubr.bf16.gmra.mrb[20].mxu0 %v4008_v10  ;;  %v553_v54 = vor.u32 %v552_v49, %v548_v44  ;;  %v3531_v44 = vld [vmem:[#allocation5 + $0x230] sm:$0xff]   ;;  %v3532_v49 = vld [vmem:[#allocation5 + $0x238] sm:$0xff]  }
  0xa1   : > { %1525 = vmatprep.mubr.bf16.mxu1 %v3957_v22  ;;  %1396 = vmatprep.mubr.bf16.mxu0 %v4046_v50 }
  0xa2   : > { %3164 = vmatpush3.bf16.msra.mxu1 %v3503_v2  ;;  %v543_v2 = vshll.u32 %v4102_v12, 16  ;;  %3295 = vmatprep.subr.bf16.mxu0 %v4106_v37 }
  0xa3   : > { %3165 = vmatprep.subr.bf16.mxu1 %v3510_v29 }
  0xa4   : > { %v545_v29 = vrot.slane %v543_v2, 1  ;;  %v645_v2 = vrot.slane %v4039_v46, 1 }
  0xa6   : > { %3166 = vmatpush3.bf16.msra.mxu1 %v3511_v23  ;;  %v3524_v23 = vld [vmem:[#allocation5 + $0x1b0] sm:$0xff]   ;;  %v4136_v45 = vsel %vm414_vm0, %v541_v28, %v545_v29  ;;  %v4157_v9 = vsel %vm623_vm1, %v645_v2, %v646_v18  ;;  %v3526_v28 = vld [vmem:[#allocation5 + $0x218] sm:$0xff]   ;;  %v666_v18 = vrot.slane %v3943_v4, 1 }
  0xa7   : > { %3167 = vmatprep.subr.bf16.mxu1 %v3516_v61  ;;  %v557_v61 = vrot.slane %v555_v13, 1 }
  0xa8   : > { %1526 = vmatmul.mubr.bf16.gmra.mrb[24].mxu1 %v4065_v3  ;;  %1397 = vmatmul.mubr.bf16.gmra.mrb[24].mxu0 %v4020_v17 }
  0xa9   : > { %1533 = vmatprep.mubr.bf16.mxu1 %v3994_v55  ;;  %1404 = vmatprep.mubr.bf16.mxu0 %v4069_v7 }
  0xaa   : > { %3168 = vmatpush3.bf16.msra.mxu1 %v3518_v57  ;;  %v4148_v57 = vsel %vm414_vm0, %v553_v54, %v557_v61  ;;  %v663_v54 = vrot.slane %v3912_v38, 1  ;;  %v664_v61 = vrot.slane %v3919_v43, 1  ;;  %v4227_v43 = vld [vmem:[%s3880_s11 + $0xc0] sm:$0xff]  }
  0xab   : > { %3169 = vmatprep.subr.bf16.mxu1 %v3519_v15  ;;  %v648_v15 = vrot.slane %v4055_v11, 1 }
  0xac   : > { %v4215_v2 = vsel %vm623_vm1, %v663_v54, %v664_v61 }
  0xad   : > { %v4166_v21 = vsel %vm623_vm1, %v648_v15, %v649_v16  ;;  %v667_v15 = vrot.slane %v3946_v5, 1  ;;  %v669_v16 = vrot.slane %v3964_v24, 1  ;;  %v700_v5 = vshll.u32 %v4227_v43, 16 }
  0xae   : > { %3170 = vmatpush3.bf16.msra.mxu1 %v3521_v26  ;;  %v651_v26 = vrot.slane %v4073_v14, 1 }
  0xaf   : > { %3171 = vmatprep.subr.bf16.mxu1 %v3522_v27  ;;  %v652_v27 = vrot.slane %v4078_v20, 1  ;;  %v655_v20 = vrot.slane %v4102_v12, 1  ;;  %v657_v12 = vrot.slane %v4114_v6, 1 }
  0xb0   : > { %1534 = vmatmul.mubr.bf16.gmra.mrb[28].mxu1 %v4086_v31  ;;  %1405 = vmatmul.mubr.bf16.gmra.mrb[28].mxu0 %v4039_v46 }
  0xb1   : > { %1541 = vmatprep.mubr.bf16.mxu1 %v4008_v10  ;;  %1412 = vmatprep.mubr.bf16.mxu0 %v4094_v40  ;;  %v4176_v60 = vsel %vm623_vm1, %v651_v26, %v652_v27 }
  0xb2   : > { %3172 = vmatpush3.bf16.msra.mxu1 %v3524_v23  ;;  %v4190_v23 = vld [vmem:[%s3880_s11 + $0x90] sm:$0xff]  }
  0xb3   : > { %3173 = vmatprep.subr.bf16.mxu1 %v3525_v39  ;;  %v658_v39 = vrot.slane %v4123_v59, 1  ;;  %v3537_v59 = vld [vmem:[%s3880_s11 + $0x98] ss:$0 sps:$4 sm:$0x11]  }
  0xb4   : > { %v661_v0 = vrot.slane %v3537_v59, 1 }
  0xb5   : > { %v4197_v13 = vsel %vm623_vm1, %v657_v12, %v658_v39 }
  0xb6   : > { %3174 = vmatpush3.bf16.msra.mxu1 %v3527_v52  ;;  %v660_v52 = vrot.slane %v4190_v23, 1 }
  0xb8   : > { %1542 = vmatmul.mubr.bf16.gmra.mrb[32].mxu1 %v4109_v62  ;;  %1413 = vmatmul.mubr.bf16.gmra.mrb[32].mxu0 %v4055_v11  ;;  %v4206_v53 = vsel %vm623_vm1, %v660_v52, %v661_v0 }
  0xb9   : > { %1549 = vmatprep.mubr.bf16.mxu1 %v4020_v17  ;;  %1420 = vmatprep.mubr.bf16.mxu0 %v4118_v8 }
  0xc0   : > { %1550 = vmatmul.mubr.bf16.gmra.mrb[36].mxu1 %v4131_v35  ;;  %1421 = vmatmul.mubr.bf16.gmra.mrb[36].mxu0 %v4073_v14 }
  0xc1   : > { %1557 = vmatprep.mubr.bf16.mxu1 %v4039_v46  ;;  %1428 = vmatprep.mubr.bf16.mxu0 %v4136_v45 }
  0xc8   : > { %1558 = vmatmul.mubr.bf16.gmra.mrb[40].mxu1 %v4145_v1  ;;  %1429 = vmatmul.mubr.bf16.gmra.mrb[40].mxu0 %v4090_v34 }
  0xc9   : > { %1565 = vmatprep.mubr.bf16.mxu1 %v4055_v11  ;;  %1436 = vmatprep.mubr.bf16.mxu0 %v4148_v57 }
  0xd0   : > { %1566 = vmatmul.mubr.bf16.gmra.mrb[44].mxu1 %v4157_v9  ;;  %1437 = vmatmul.mubr.bf16.gmra.mrb[44].mxu0 %v4114_v6 }
  0xd1   : > { %1573 = vmatprep.mubr.bf16.mxu1 %v4073_v14  ;;  %1670 = vmatprep.mubr.bf16.mxu0 %v4035_v42  ;;  %v3523_v42 = vld [vmem:[#allocation5 + $0x210] sm:$0xff]  }
  0xd8   : > { %1574 = vmatmul.mubr.bf16.gmra.mrb[48].mxu1 %v4166_v21  ;;  %1671 = vmatmul.mubr.bf16.vlgmr.msra.gmra.mrb[48].mxu0 %v3926_v56  ;;  %v654_v56 = vrot.slane %v4090_v34, 1 }
  0xd9   : > { %1581 = vmatprep.mubr.bf16.mxu1 %v4090_v34  ;;  %3296 = vmatpush3.bf16.msra.mxu0 %v4106_v37  ;;  %v3529_v37 = vld [vmem:[#allocation5 + $0x220] sm:$0xff]  }
  0xda   : > { %1678 = vmatprep.mubr.bf16.mxu0 %v4065_v3  ;;  %3297 = vmatprep.subr.bf16.mxu0 %v3520_v47  ;;  %v4185_v29 = vsel %vm623_vm1, %v654_v56, %v655_v20 }
  0xdd   : > { %3298 = vmatpush3.bf16.msra.mxu0 %v3520_v47  ;;  %v670_v47 = vrot.slane %v3974_v30, 1  ;;  %v702_v30 = vrot.slane %v700_v5, 1 }
  0xde   : > { %3299 = vmatprep.subr.bf16.mxu0 %v3523_v42 }
  0xe0   : > { %1582 = vmatmul.mubr.bf16.gmra.mrb[52].mxu1 %v4176_v60  ;;  %1679 = vmatmul.mubr.bf16.gmra.mrb[52].mxu0 %v3954_v19 }
  0xe1   : > { %1589 = vmatprep.mubr.bf16.mxu1 %v4114_v6  ;;  %1686 = vmatprep.mubr.bf16.mxu0 %v4086_v31 }
  0xe2   : > { %3300 = vmatpush3.bf16.msra.mxu0 %v3523_v42 }
  0xe3   : > { %3301 = vmatprep.subr.bf16.mxu0 %v3526_v28 }
  0xe6   : > { %3302 = vmatpush3.bf16.msra.mxu0 %v3526_v28 }
  0xe7   : > { %3303 = vmatprep.subr.bf16.mxu0 %v3529_v37 }
  0xe8   : > { %1590 = vmatmul.mubr.bf16.gmra.mrb[56].mxu1 %v4185_v29  ;;  %1687 = vmatmul.mubr.bf16.gmra.mrb[56].mxu0 %v3983_v48 }
  0xe9   : > { %1597 = vmatprep.mubr.bf16.mxu1 %v4190_v23  ;;  %1694 = vmatprep.mubr.bf16.mxu0 %v4109_v62 }
  0xea   : > { %3304 = vmatpush3.bf16.msra.mxu0 %v3529_v37 }
  0xeb   : > { %3305 = vmatprep.subr.bf16.mxu0 %v3530_v32 }
  0xee   : > { %3306 = vmatpush3.bf16.msra.mxu0 %v3530_v32 }
  0xef   : > { %3307 = vmatprep.subr.bf16.mxu0 %v3531_v44 }
  0xf0   : > { %1598 = vmatmul.mubr.bf16.gmra.mrb[60].mxu1 %v4197_v13  ;;  %1695 = vmatmul.mubr.bf16.gmra.mrb[60].mxu0 %v4014_v36 }
  0xf1   : > { %1605 = vmatprep.mubr.bf16.mxu1 %v3912_v38  ;;  %1702 = vmatprep.mubr.bf16.mxu0 %v4131_v35  ;;  %v4224_v38 = vsel %vm623_vm1, %v666_v18, %v667_v15 }
  0xf2   : > { %3308 = vmatpush3.bf16.msra.mxu0 %v3531_v44 }
  0xf3   : > { %3309 = vmatprep.subr.bf16.mxu0 %v3532_v49 }
  0xf6   : > { %3310 = vmatpush3.bf16.msra.mxu0 %v3532_v49 }
  0xf8   : > { %1606 = vmatmul.mubr.bf16.gmra.mrb[64].mxu1 %v4206_v53  ;;  %1703 = vmatmul.mubr.bf16.gmra.mrb[64].mxu0 %v4032_v41 }
  0xf9   : > { %1613 = vmatprep.mubr.bf16.mxu1 %v3943_v4  ;;  %1710 = vmatprep.mubr.bf16.mxu0 %v4145_v1  ;;  %v4236_v4 = vsel %vm623_vm1, %v669_v16, %v670_v47 }
 0x100   : > { %1614 = vmatmul.mubr.bf16.gmra.mrb[68].mxu1 %v4215_v2  ;;  %1711 = vmatmul.mubr.bf16.gmra.mrb[68].mxu0 %v4046_v50 }
 0x101   : > { %1621 = vmatprep.mubr.bf16.mxu1 %v3964_v24  ;;  %1718 = vmatprep.mubr.bf16.mxu0 %v4157_v9  ;;  %v698_v24 = vshrl.u32 %v4227_v43, 16 }
 0x108   : > { %1622 = vmatmul.mubr.bf16.gmra.mrb[72].mxu1 %v4224_v38  ;;  %1719 = vmatmul.mubr.bf16.gmra.mrb[72].mxu0 %v4069_v7 }
 0x109   : > { %1629 = vmatprep.mubr.bf16.mxu1 %v4227_v43  ;;  %1726 = vmatprep.mubr.bf16.mxu0 %v4166_v21 }
 0x110   : > { %1630 = vmatmul.mubr.bf16.gmra.mrb[76].mxu1 %v4236_v4  ;;  %1727 = vmatmul.mubr.bf16.gmra.mrb[76].mxu0 %v4094_v40 }
 0x111   : > { %1831 = vmatprep.mubr.bf16.mxu1 %v3954_v19  ;;  %1734 = vmatprep.mubr.bf16.mxu0 %v4176_v60  ;;  %v710_v19 = vrot.slane %v4227_v43, 1 }
 0x118   : > { %1832 = vmatmul.mubr.bf16.vlgmr.msra.gmra.mrb[80].mxu1 %v3934_v63  ;;  %1735 = vmatmul.mubr.bf16.gmra.mrb[80].mxu0 %v4118_v8  ;;  %v3533_v63 = vld [vmem:[%s3880_s11 + $0xc8] ss:$0 sps:$4 sm:$0x11]  }
 0x119   : > { %1839 = vmatprep.mubr.bf16.mxu1 %v3983_v48  ;;  %1742 = vmatprep.mubr.bf16.mxu0 %v4185_v29  ;;  %v705_v48 = vshll.u32 %v3533_v63, 16 }
 0x120   : > { %1840 = vmatmul.mubr.bf16.gmra.mrb[84].mxu1 %v3957_v22  ;;  %1743 = vmatmul.mubr.bf16.gmra.mrb[84].mxu0 %v4136_v45  ;;  %v711_v22 = vrot.slane %v3533_v63, 1 }
 0x121   : > { %1847 = vmatprep.mubr.bf16.mxu1 %v4014_v36  ;;  %1750 = vmatprep.mubr.bf16.mxu0 %v4197_v13  ;;  %v707_v36 = vrot.slane %v705_v48, 1 }
 0x128   : > { %1848 = vmatmul.mubr.bf16.gmra.mrb[88].mxu1 %v3994_v55  ;;  %1751 = vmatmul.mubr.bf16.gmra.mrb[88].mxu0 %v4148_v57  ;;  %v4271_v55 = vsel %vm623_vm1, %v710_v19, %v711_v22 }
 0x129   : > { %1855 = vmatprep.mubr.bf16.mxu1 %v4032_v41  ;;  %1758 = vmatprep.mubr.bf16.mxu0 %v4206_v53 }
 0x130   : > { %1856 = vmatmul.mubr.bf16.gmra.mrb[92].mxu1 %v4008_v10  ;;  %1759 = vmatmul.mubr.bf16.gmra.mrb[92].mxu0 %v3903_v33  ;;  %v703_v10 = vor.u32 %v702_v30, %v698_v24 }
 0x131   : > { %1863 = vmatprep.mubr.bf16.mxu1 %v4046_v50  ;;  %1766 = vmatprep.mubr.bf16.mxu0 %v4215_v2 }
 0x132   : > { %v4282_v28 = vsel %vm414_vm0, %v703_v10, %v707_v36 }
 0x138   : > { %1864 = vmatmul.mubr.bf16.gmra.mrb[96].mxu1 %v4020_v17  ;;  %1767 = vmatmul.mubr.bf16.gmra.mrb[96].mxu0 %v3930_v58 }
 0x139   : > { %1871 = vmatprep.mubr.bf16.mxu1 %v4069_v7  ;;  %1774 = vmatprep.mubr.bf16.mxu0 %v4224_v38 }
 0x140   : > { %1872 = vmatmul.mubr.bf16.gmra.mrb[100].mxu1 %v4039_v46  ;;  %1775 = vmatmul.mubr.bf16.gmra.mrb[100].mxu0 %v3967_v25 }
 0x141   : > { %1879 = vmatprep.mubr.bf16.mxu1 %v4094_v40  ;;  %1782 = vmatprep.mubr.bf16.mxu0 %v4236_v4 }
 0x148   : > { %1880 = vmatmul.mubr.bf16.gmra.mrb[104].mxu1 %v4055_v11  ;;  %1783 = vmatmul.mubr.bf16.gmra.mrb[104].mxu0 %v3988_v51 }
 0x149   : > { %1887 = vmatprep.mubr.bf16.mxu1 %v4118_v8  ;;  %1790 = vmatprep.mubr.bf16.mxu0 %v4271_v55 }
 0x14b   : > { %v2839_v17 = vpop.f32.mrb[0].mxu0  ;;  %v2911_v41 = vpop.f32.mrb[0].mxu1 }
 0x14c   : > { %v2840_v46 = vpop.f32.mrb[1].mxu0  ;;  %v2912_v50 = vpop.f32.mrb[1].mxu1 }
 0x14d   : > { %v4277_v7 = vadd.f32 %v2840_v46, %v2839_v17  ;;  %v4279_v40 = vadd.f32 %v2912_v50, %v2911_v41  ;;  %v2842_v26 = vpop.f32.mrb[2].mxu0  ;;  %v2914_v27 = vpop.f32.mrb[2].mxu1 }
 0x14e   : > { %v2843_v42 = vpop.f32.mrb[3].mxu0  ;;  %v2915_v11 = vpop.f32.mrb[3].mxu1 }
 0x14f   : > { %v4284_v8 = vadd.f32 %v2843_v42, %v2842_v26  ;;  %v4286_v56 = vadd.f32 %v2915_v11, %v2914_v27 }
 0x150   : > { %1888 = vmatmul.mubr.bf16.gmra.mrb[108].mxu1 %v4073_v14  ;;  %1791 = vmatmul.mubr.bf16.gmra.mrb[108].mxu0 %v4282_v28 }
 0x151   : > { %1895 = vmatprep.mubr.bf16.mxu1 %v4136_v45  ;;  %3311 = vmatprep.mubr.bf16.mxu0 %v4065_v3 }
 0x153   : > { %v2845_v20 = vpop.f32.mrb[4].mxu0  ;;  %v2917_v37 = vpop.f32.mrb[4].mxu1 }
 0x154   : > { %v2846_v32 = vpop.f32.mrb[5].mxu0  ;;  %v2918_v12 = vpop.f32.mrb[5].mxu1 }
 0x155   : > { %v4292_v39 = vadd.f32 %v2846_v32, %v2845_v20  ;;  %v4294_v44 = vadd.f32 %v2918_v12, %v2917_v37  ;;  %v2848_v49 = vpop.f32.mrb[6].mxu0  ;;  %v2920_v52 = vpop.f32.mrb[6].mxu1 }
 0x156   : > { %v2849_v59 = vpop.f32.mrb[7].mxu0  ;;  %v2921_v0 = vpop.f32.mrb[7].mxu1 }
 0x157   : > { %v4296_v54 = vadd.f32 %v2849_v59, %v2848_v49  ;;  %v4298_v14 = vadd.f32 %v2921_v0, %v2920_v52 }
 0x158   : > { %1896 = vmatmul.mubr.bf16.gmra.mrb[112].mxu1 %v4090_v34  ;;  %3312 = vmatmul.mubr.bf16.vlgmr.msra.gmra.mrb[112].mxu0 %v4086_v31 }
 0x159   : > { %1903 = vmatprep.mubr.bf16.mxu1 %v4148_v57  ;;  %3315 = vmatprep.mubr.bf16.mxu0 %v4109_v62 }
 0x15b   : > { %v2851_v3 = vpop.f32.mrb[8].mxu0  ;;  %v2923_v45 = vpop.f32.mrb[8].mxu1 }
 0x15c   : > { %v2852_v61 = vpop.f32.mrb[9].mxu0  ;;  %v2924_v18 = vpop.f32.mrb[9].mxu1 }
 0x15d   : > { %v4304_v15 = vadd.f32 %v2852_v61, %v2851_v3  ;;  %v4306_v16 = vadd.f32 %v2924_v18, %v2923_v45  ;;  %v2854_v47 = vpop.f32.mrb[10].mxu0  ;;  %v2926_v63 = vpop.f32.mrb[10].mxu1 }
 0x15e   : > { %v2855_v5 = vpop.f32.mrb[11].mxu0  ;;  %v2927_v19 = vpop.f32.mrb[11].mxu1 }
 0x15f   : > { %v4308_v22 = vadd.f32 %v2855_v5, %v2854_v47  ;;  %v4310_v34 = vadd.f32 %v2927_v19, %v2926_v63  ;;  %v3535_v5 = vld [vmem:[%s3880_s11 + $0xd4] ss:$0 sps:$4 sm:$0x11]  }
 0x160   : > { %1904 = vmatmul.mubr.bf16.gmra.mrb[116].mxu1 %v4114_v6  ;;  %3316 = vmatmul.mubr.bf16.gmra.mrb[116].mxu0 %v4131_v35 }
 0x161   : > { %1911 = vmatprep.mubr.bf16.mxu1 %v3903_v33  ;;  %3319 = vmatprep.mubr.bf16.mxu0 %v4145_v1 }
 0x163   : > { %v2857_v31 = vpop.f32.mrb[12].mxu0  ;;  %v2929_v62 = vpop.f32.mrb[12].mxu1 }
 0x164   : > { %v2858_v57 = vpop.f32.mrb[13].mxu0  ;;  %v2930_v24 = vpop.f32.mrb[13].mxu1 }
 0x165   : > { %v4316_v30 = vadd.f32 %v2858_v57, %v2857_v31  ;;  %v4318_v48 = vadd.f32 %v2930_v24, %v2929_v62  ;;  %v2860_v10 = vpop.f32.mrb[14].mxu0  ;;  %v2932_v36 = vpop.f32.mrb[14].mxu1 }
 0x166   : > { %v2861_v17 = vpop.f32.mrb[15].mxu0  ;;  %v2933_v41 = vpop.f32.mrb[15].mxu1 }
 0x167   : > { %v4320_v46 = vadd.f32 %v2861_v17, %v2860_v10  ;;  %v4322_v6 = vadd.f32 %v2933_v41, %v2932_v36 }
 0x168   : > { %1912 = vmatmul.mubr.bf16.gmra.mrb[120].mxu1 %v4190_v23  ;;  %3320 = vmatmul.mubr.bf16.gmra.mrb[120].mxu0 %v4157_v9 }
 0x169   : > { %1919 = vmatprep.mubr.bf16.mxu1 %v3930_v58  ;;  %3323 = vmatprep.mubr.bf16.mxu0 %v4166_v21  ;;  %v3538_v58 = vld [vmem:[%s3880_s11 + $0x9c] sm:$0xff]  }
 0x16b   : > { %v2951_v33 = vpop.f32.mrb[16].mxu1  ;;  %v2863_v35 = vpop.f32.mrb[16].mxu0 }
 0x16c   : > { %v2952_v1 = vpop.f32.mrb[17].mxu1  ;;  %v2864_v50 = vpop.f32.mrb[17].mxu0 }
 0x16d   : > { %v2953_v26 = vadd.f32 %v2952_v1, %v2951_v33  ;;  %v2954_v27 = vpop.f32.mrb[18].mxu1  ;;  %v4328_v42 = vadd.f32 %v2864_v50, %v2863_v35  ;;  %v2866_v11 = vpop.f32.mrb[18].mxu0  ;;  %v3540_v50 = vld [vmem:[%s3880_s11 + $0xb4] sm:$0xff]  }
 0x16e   : > { %v2955_v20 = vpop.f32.mrb[19].mxu1  ;;  %v2867_v23 = vpop.f32.mrb[19].mxu0 }
 0x16f   : > { %v4331_v37 = vadd.f32 %v2953_v26, %v4277_v7  ;;  %v2956_v9 = vadd.f32 %v2955_v20, %v2954_v27  ;;  %v4333_v32 = vadd.f32 %v2867_v23, %v2866_v11 }
 0x170   : > { %1920 = vmatmul.mubr.bf16.gmra.mrb[124].mxu1 %v3538_v58  ;;  %3324 = vmatmul.mubr.bf16.gmra.mrb[124].mxu0 %v4176_v60 }
 0x171   : > { %v4337_v21 = vadd.f32 %v2956_v9, %v4284_v8  ;;  %1927 = vmatprep.mubr.bf16.mxu1 %v3967_v25  ;;  %3327 = vmatprep.mubr.bf16.mxu0 %v4185_v29  ;;  %v4345_v8 = vld [vmem:[%s3880_s11 + $0xcc] sm:$0xff]  }
 0x172   : > { %v3539_v29 = vld [vmem:[%s3880_s11 + $0xa8] sm:$0xff]   ;;  %v726_v19 = vshll.u32 %v4345_v8, 16 }
 0x173   : > { %v2957_v12 = vpop.f32.mrb[20].mxu1  ;;  %v2869_v7 = vpop.f32.mrb[20].mxu0 }
 0x174   : > { %v2958_v49 = vpop.f32.mrb[21].mxu1  ;;  %v2870_v52 = vpop.f32.mrb[21].mxu0  ;;  %v728_v41 = vrot.slane %v726_v19, 1 }
 0x175   : > { %v2959_v59 = vadd.f32 %v2958_v49, %v2957_v12  ;;  %v2960_v0 = vpop.f32.mrb[22].mxu1  ;;  %v4342_v3 = vadd.f32 %v2870_v52, %v2869_v7  ;;  %v2872_v45 = vpop.f32.mrb[22].mxu0 }
 0x176   : > { %v2961_v61 = vpop.f32.mrb[23].mxu1  ;;  %v2873_v25 = vpop.f32.mrb[23].mxu0 }
 0x177   : > { %v4348_v60 = vadd.f32 %v2959_v59, %v4292_v39  ;;  %v2962_v18 = vadd.f32 %v2961_v61, %v2960_v0  ;;  %v4350_v47 = vadd.f32 %v2873_v25, %v2872_v45  ;;  %v736_v45 = vrot.slane %v4345_v8, 1 }
 0x178   : > { %1928 = vmatmul.mubr.bf16.gmra.mrb[128].mxu1 %v3539_v29  ;;  %3328 = vmatmul.mubr.bf16.gmra.mrb[128].mxu0 %v4197_v13  ;;  %v724_v13 = vshrl.u32 %v4345_v8, 16  ;;  %v737_v61 = vrot.slane %v3535_v5, 1 }
 0x179   : > { %v4354_v63 = vadd.f32 %v2962_v18, %v4296_v54  ;;  %1935 = vmatprep.mubr.bf16.mxu1 %v3988_v51  ;;  %3331 = vmatprep.mubr.bf16.mxu0 %v4206_v53  ;;  %v731_v51 = vshll.u32 %v3535_v5, 16 }
 0x17a   : > { %v729_v27 = vor.u32 %v728_v41, %v724_v13 }
 0x17b   : > { %v2963_v39 = vpop.f32.mrb[24].mxu1  ;;  %v2875_v31 = vpop.f32.mrb[24].mxu0  ;;  %v733_v11 = vrot.slane %v731_v51, 1 }
 0x17c   : > { %v2964_v62 = vpop.f32.mrb[25].mxu1  ;;  %v2876_v57 = vpop.f32.mrb[25].mxu0 }
 0x17d   : > { %v2965_v24 = vadd.f32 %v2964_v62, %v2963_v39  ;;  %v2966_v10 = vpop.f32.mrb[26].mxu1  ;;  %v4361_v36 = vadd.f32 %v2876_v57, %v2875_v31  ;;  %v2878_v54 = vpop.f32.mrb[26].mxu0 }
 0x17e   : > { %v2967_v17 = vpop.f32.mrb[27].mxu1  ;;  %v2879_v33 = vpop.f32.mrb[27].mxu0 }
 0x17f   : > { %v4365_v53 = vadd.f32 %v2965_v24, %v4304_v15  ;;  %v2968_v35 = vadd.f32 %v2967_v17, %v2966_v10  ;;  %v4367_v1 = vadd.f32 %v2879_v33, %v2878_v54 }
 0x180   : > { %1936 = vmatmul.mubr.bf16.gmra.mrb[132].mxu1 %v3540_v50  ;;  %3332 = vmatmul.mubr.bf16.gmra.mrb[132].mxu0 %v4215_v2 }
 0x181   : > { %v4371_v26 = vadd.f32 %v2968_v35, %v4308_v22  ;;  %1943 = vmatprep.mubr.bf16.mxu1 %v4282_v28  ;;  %3335 = vmatprep.mubr.bf16.mxu0 %v4224_v38  ;;  %v734_v22 = vsel %vm414_vm0, %v729_v27, %v733_v11 }
 0x183   : > { %v2969_v20 = vpop.f32.mrb[28].mxu1  ;;  %v2881_v15 = vpop.f32.mrb[28].mxu0 }
 0x184   : > { %v2970_v23 = vpop.f32.mrb[29].mxu1  ;;  %v2882_v9 = vpop.f32.mrb[29].mxu0 }
 0x185   : > { %v2971_v58 = vadd.f32 %v2970_v23, %v2969_v20  ;;  %v2972_v12 = vpop.f32.mrb[30].mxu1  ;;  %v4376_v7 = vadd.f32 %v2882_v9, %v2881_v15  ;;  %v2884_v49 = vpop.f32.mrb[30].mxu0 }
 0x186   : > { %v2973_v52 = vpop.f32.mrb[31].mxu1  ;;  %v2885_v28 = vpop.f32.mrb[31].mxu0 }
 0x187   : > { %v4380_v2 = vadd.f32 %v2971_v58, %v4316_v30  ;;  %v2974_v59 = vadd.f32 %v2973_v52, %v2972_v12  ;;  %v4382_v38 = vadd.f32 %v2885_v28, %v2884_v49 }
 0x188   : > { %1944 = vmatmul.mubr.bf16.gmra.mrb[136].mxu1 %v4227_v43  ;;  %3336 = vmatmul.mubr.bf16.gmra.mrb[136].mxu0 %v4236_v4 }
 0x189   : > { %v4386_v0 = vadd.f32 %v2974_v59, %v4320_v46  ;;  %1951 = vmatprep.mubr.bf16.mxu1 %v734_v22  ;;  %3339 = vmatprep.mubr.bf16.mxu0 %v4271_v55  ;;  %v738_v46 = vsel %vm623_vm1, %v736_v45, %v737_v61 }
 0x18b   : > { %v2975_v25 = vpop.f32.mrb[32].mxu1  ;;  %v2887_v30 = vpop.f32.mrb[32].mxu0 }
 0x18c   : > { %v2976_v18 = vpop.f32.mrb[33].mxu1  ;;  %v2888_v29 = vpop.f32.mrb[33].mxu0 }
 0x18d   : > { %v2977_v19 = vadd.f32 %v2976_v18, %v2975_v25  ;;  %v2978_v39 = vpop.f32.mrb[34].mxu1  ;;  %v2889_v31 = vadd.f32 %v2888_v29, %v2887_v30  ;;  %v2890_v62 = vpop.f32.mrb[34].mxu0 }
 0x18e   : > { %v2979_v43 = vpop.f32.mrb[35].mxu1  ;;  %v2891_v4 = vpop.f32.mrb[35].mxu0 }
 0x18f   : > { %v4393_v57 = vadd.f32 %v2977_v19, %v4328_v42  ;;  %v2980_v24 = vadd.f32 %v2979_v43, %v2978_v39  ;;  %v2892_v55 = vadd.f32 %v2891_v4, %v2890_v62 }
 0x190   : > { %1952 = vmatmul.mubr.bf16.gmra.mrb[140].mxu1 %v4345_v8  ;;  %3340 = vmatmul.mubr.bf16.gmra.mrb[140].mxu0 %v738_v46 }
 0x191   : > { %v4397_v5 = vadd.f32 %v2980_v24, %v4333_v32 }
 0x193   : > { %v2981_v10 = vpop.f32.mrb[36].mxu1  ;;  %v2893_v54 = vpop.f32.mrb[36].mxu0 }
 0x194   : > { %v2982_v17 = vpop.f32.mrb[37].mxu1  ;;  %v2894_v13 = vpop.f32.mrb[37].mxu0 }
 0x195   : > { %v2983_v41 = vadd.f32 %v2982_v17, %v2981_v10  ;;  %v2984_v51 = vpop.f32.mrb[38].mxu1  ;;  %v2895_v33 = vadd.f32 %v2894_v13, %v2893_v54  ;;  %v2896_v35 = vpop.f32.mrb[38].mxu0 }
 0x196   : > { %v2985_v50 = vpop.f32.mrb[39].mxu1  ;;  %v2897_v27 = vpop.f32.mrb[39].mxu0 }
 0x197   : > { %v4400_v42 = vadd.f32 %v2983_v41, %v4342_v3  ;;  %v2986_v11 = vadd.f32 %v2985_v50, %v2984_v51  ;;  %v2898_v20 = vadd.f32 %v2897_v27, %v2896_v35 }
 0x199   : > { %v4403_v8 = vadd.f32 %v2986_v11, %v4350_v47 }
 0x19b   : > { %v2987_v32 = vpop.f32.mrb[40].mxu1  ;;  %v2899_v15 = vpop.f32.mrb[40].mxu0 }
 0x19c   : > { %v2988_v23 = vpop.f32.mrb[41].mxu1  ;;  %v2900_v9 = vpop.f32.mrb[41].mxu0 }
 0x19d   : > { %v2989_v58 = vadd.f32 %v2988_v23, %v2987_v32  ;;  %v2990_v12 = vpop.f32.mrb[42].mxu1  ;;  %v4405_v49 = vadd.f32 %v2900_v9, %v2899_v15  ;;  %v2902_v52 = vpop.f32.mrb[42].mxu0 }
 0x19e   : > { %v2991_v22 = vpop.f32.mrb[43].mxu1  ;;  %v2903_v3 = vpop.f32.mrb[43].mxu0 }
 0x19f   : > { %v4408_v28 = vadd.f32 %v2989_v58, %v4361_v36  ;;  %v2992_v59 = vadd.f32 %v2991_v22, %v2990_v12  ;;  %v2904_v45 = vadd.f32 %v2903_v3, %v2902_v52 }
 0x1a1   : > { %v4411_v61 = vadd.f32 %v2992_v59, %v4367_v1 }
 0x1a3   : > { %v2993_v47 = vpop.f32.mrb[44].mxu1  ;;  %v2905_v25 = vpop.f32.mrb[44].mxu0 }
 0x1a4   : > { %v2994_v30 = vpop.f32.mrb[45].mxu1  ;;  %v2906_v18 = vpop.f32.mrb[45].mxu0 }
 0x1a5   : > { %v2995_v29 = vadd.f32 %v2994_v30, %v2993_v47  ;;  %v2996_v19 = vpop.f32.mrb[46].mxu1  ;;  %v4413_v39 = vadd.f32 %v2906_v18, %v2905_v25  ;;  %v2908_v62 = vpop.f32.mrb[46].mxu0 }
 0x1a6   : > { %v2997_v43 = vpop.f32.mrb[47].mxu1  ;;  %v2909_v36 = vpop.f32.mrb[47].mxu0 }
 0x1a7   : > { %v4416_v46 = vadd.f32 %v2995_v29, %v4376_v7  ;;  %v2998_v4 = vadd.f32 %v2997_v43, %v2996_v19  ;;  %v4418_v24 = vadd.f32 %v2909_v36, %v2908_v62 }
 0x1a9   : > { %v4421_v1 = vadd.f32 %v2998_v4, %v4382_v38 }
 0x1ab   : > { %v2999_v10 = vpop.f32.mrb[48].mxu1  ;;  %v3063_v54 = vpop.f32.mrb[48].mxu0 }
 0x1ac   : > { %v3000_v17 = vpop.f32.mrb[49].mxu1  ;;  %v3064_v41 = vpop.f32.mrb[49].mxu0 }
 0x1ad   : > { %v3001_v13 = vadd.f32 %v3000_v17, %v2999_v10  ;;  %v3002_v51 = vpop.f32.mrb[50].mxu1  ;;  %v3065_v35 = vadd.f32 %v3064_v41, %v3063_v54  ;;  %v3066_v50 = vpop.f32.mrb[50].mxu0 }
 0x1ae   : > { %v3003_v27 = vpop.f32.mrb[51].mxu1  ;;  %v3067_v32 = vpop.f32.mrb[51].mxu0 }
 0x1af   : > { %v4423_v11 = vadd.f32 %v3001_v13, %v2889_v31  ;;  %v3004_v7 = vadd.f32 %v3003_v27, %v3002_v51  ;;  %v4426_v15 = vadd.f32 %v3065_v35, %v4331_v37  ;;  %v3068_v23 = vadd.f32 %v3067_v32, %v3066_v50 }
 0x1b1   : > { %v4428_v9 = vadd.f32 %v3004_v7, %v2892_v55  ;;  %v4431_v38 = vadd.f32 %v3068_v23, %v4337_v21 }
 0x1b3   : > { %v3005_v58 = vpop.f32.mrb[52].mxu1  ;;  %v3069_v12 = vpop.f32.mrb[52].mxu0 }
 0x1b4   : > { %v3006_v52 = vpop.f32.mrb[53].mxu1  ;;  %v3070_v3 = vpop.f32.mrb[53].mxu0 }
 0x1b5   : > { %v3007_v22 = vadd.f32 %v3006_v52, %v3005_v58  ;;  %v3008_v59 = vpop.f32.mrb[54].mxu1  ;;  %v3071_v47 = vadd.f32 %v3070_v3, %v3069_v12  ;;  %v3072_v31 = vpop.f32.mrb[54].mxu0 }
 0x1b6   : > { %v3009_v25 = vpop.f32.mrb[55].mxu1  ;;  %v3073_v37 = vpop.f32.mrb[55].mxu0 }
 0x1b7   : > { %v4433_v30 = vadd.f32 %v3007_v22, %v2895_v33  ;;  %v3010_v18 = vadd.f32 %v3009_v25, %v3008_v59  ;;  %v4436_v29 = vadd.f32 %v3071_v47, %v4348_v60  ;;  %v3074_v55 = vadd.f32 %v3073_v37, %v3072_v31 }
 0x1b9   : > { %v4438_v19 = vadd.f32 %v3010_v18, %v2898_v20  ;;  %v4441_v21 = vadd.f32 %v3074_v55, %v4354_v63 }
 0x1bb   : > { %v3011_v62 = vpop.f32.mrb[56].mxu1  ;;  %v3075_v43 = vpop.f32.mrb[56].mxu0 }
 0x1bc   : > { %v3012_v36 = vpop.f32.mrb[57].mxu1  ;;  %v3076_v10 = vpop.f32.mrb[57].mxu0 }
 0x1bd   : > { %v3013_v4 = vadd.f32 %v3012_v36, %v3011_v62  ;;  %v3014_v54 = vpop.f32.mrb[58].mxu1  ;;  %v3077_v17 = vadd.f32 %v3076_v10, %v3075_v43  ;;  %v3078_v33 = vpop.f32.mrb[58].mxu0 }
 0x1be   : > { %v3015_v13 = vpop.f32.mrb[59].mxu1  ;;  %v3079_v51 = vpop.f32.mrb[59].mxu0 }
 0x1bf   : > { %v4444_v41 = vadd.f32 %v3013_v4, %v4405_v49  ;;  %v3016_v60 = vadd.f32 %v3015_v13, %v3014_v54  ;;  %v4447_v20 = vadd.f32 %v3077_v17, %v4365_v53  ;;  %v3080_v35 = vadd.f32 %v3079_v51, %v3078_v33 }
 0x1c1   : > { %v4449_v63 = vadd.f32 %v3016_v60, %v2904_v45  ;;  %v4452_v50 = vadd.f32 %v3080_v35, %v4371_v26 }
 0x1c3   : > { %v3017_v27 = vpop.f32.mrb[60].mxu1  ;;  %v3081_v7 = vpop.f32.mrb[60].mxu0 }
 0x1c4   : > { %v3018_v32 = vpop.f32.mrb[61].mxu1  ;;  %v3082_v58 = vpop.f32.mrb[61].mxu0 }
 0x1c5   : > { %v3019_v23 = vadd.f32 %v3018_v32, %v3017_v27  ;;  %v3020_v12 = vpop.f32.mrb[62].mxu1  ;;  %v3083_v52 = vadd.f32 %v3082_v58, %v3081_v7  ;;  %v3084_v49 = vpop.f32.mrb[62].mxu0 }
 0x1c6   : > { %v3021_v22 = vpop.f32.mrb[63].mxu1  ;;  %v3085_v59 = vpop.f32.mrb[63].mxu0 }
 0x1c7   : > { %v4455_v3 = vadd.f32 %v3019_v23, %v4413_v39  ;;  %v3022_v53 = vadd.f32 %v3021_v22, %v3020_v12  ;;  %v4458_v45 = vadd.f32 %v3083_v52, %v4380_v2  ;;  %v3086_v47 = vadd.f32 %v3085_v59, %v3084_v49 }
 0x1c9   : > { %v4461_v26 = vadd.f32 %v3022_v53, %v4418_v24  ;;  %v4464_v31 = vadd.f32 %v3086_v47, %v4386_v0 }
 0x1cb   : > { %v3023_v25 = vpop.f32.mrb[64].mxu1  ;;  %v3087_v18 = vpop.f32.mrb[64].mxu0 }
 0x1cc   : > { %v3024_v37 = vpop.f32.mrb[65].mxu1  ;;  %v3088_v62 = vpop.f32.mrb[65].mxu0 }
 0x1cd   : > { %v3025_v55 = vadd.f32 %v3024_v37, %v3023_v25  ;;  %v3026_v43 = vpop.f32.mrb[66].mxu1  ;;  %v3089_v39 = vadd.f32 %v3088_v62, %v3087_v18  ;;  %v3090_v36 = vpop.f32.mrb[66].mxu0 }
 0x1ce   : > { %v3027_v4 = vpop.f32.mrb[67].mxu1  ;;  %v3091_v54 = vpop.f32.mrb[67].mxu0 }
 0x1cf   : > { %v4467_v10 = vadd.f32 %v3025_v55, %v4279_v40  ;;  %v3028_v2 = vadd.f32 %v3027_v4, %v3026_v43  ;;  %v4470_v24 = vadd.f32 %v3089_v39, %v4393_v57  ;;  %v3092_v17 = vadd.f32 %v3091_v54, %v3090_v36 }
 0x1d1   : > { %v4473_v0 = vadd.f32 %v3028_v2, %v4286_v56  ;;  %v4476_v33 = vadd.f32 %v3092_v17, %v4397_v5 }
 0x1d3   : > { %v3029_v13 = vpop.f32.mrb[68].mxu1  ;;  %v3093_v60 = vpop.f32.mrb[68].mxu0 }
 0x1d4   : > { %v3030_v51 = vpop.f32.mrb[69].mxu1  ;;  %v3094_v27 = vpop.f32.mrb[69].mxu0 }
 0x1d5   : > { %v3031_v35 = vadd.f32 %v3030_v51, %v3029_v13  ;;  %v3032_v7 = vpop.f32.mrb[70].mxu1  ;;  %v3095_v40 = vadd.f32 %v3094_v27, %v3093_v60  ;;  %v3096_v32 = vpop.f32.mrb[70].mxu0 }
 0x1d6   : > { %v3033_v23 = vpop.f32.mrb[71].mxu1  ;;  %v3097_v12 = vpop.f32.mrb[71].mxu0 }
 0x1d7   : > { %v4479_v58 = vadd.f32 %v3031_v35, %v4294_v44  ;;  %v3034_v57 = vadd.f32 %v3033_v23, %v3032_v7  ;;  %v4482_v56 = vadd.f32 %v3095_v40, %v4400_v42  ;;  %v3098_v52 = vadd.f32 %v3097_v12, %v3096_v32 }
 0x1d9   : > { %v4485_v5 = vadd.f32 %v3034_v57, %v4298_v14  ;;  %v4488_v49 = vadd.f32 %v3098_v52, %v4403_v8 }
 0x1db   : > { %v3035_v22 = vpop.f32.mrb[72].mxu1  ;;  %v3099_v53 = vpop.f32.mrb[72].mxu0 }
 0x1dc   : > { %v3036_v59 = vpop.f32.mrb[73].mxu1  ;;  %v3100_v25 = vpop.f32.mrb[73].mxu0 }
 0x1dd   : > { %v3037_v47 = vadd.f32 %v3036_v59, %v3035_v22  ;;  %v3038_v18 = vpop.f32.mrb[74].mxu1  ;;  %v3101_v44 = vadd.f32 %v3100_v25, %v3099_v53  ;;  %v3102_v37 = vpop.f32.mrb[74].mxu0 }
 0x1de   : > { %v3039_v55 = vpop.f32.mrb[75].mxu1  ;;  %v3103_v43 = vpop.f32.mrb[75].mxu0 }
 0x1df   : > { %v4491_v62 = vadd.f32 %v3037_v47, %v4306_v16  ;;  %v3040_v42 = vadd.f32 %v3039_v55, %v3038_v18  ;;  %v4494_v14 = vadd.f32 %v3101_v44, %v4408_v28  ;;  %v3104_v39 = vadd.f32 %v3103_v43, %v3102_v37 }
 0x1e1   : > { %v4497_v8 = vadd.f32 %v3040_v42, %v4310_v34  ;;  %v4500_v36 = vadd.f32 %v3104_v39, %v4411_v61 }
 0x1e3   : > { %v3041_v4 = vpop.f32.mrb[76].mxu1  ;;  %v3105_v2 = vpop.f32.mrb[76].mxu0 }
 0x1e4   : > { %v3042_v54 = vpop.f32.mrb[77].mxu1  ;;  %v3106_v13 = vpop.f32.mrb[77].mxu0 }
 0x1e5   : > { %v3043_v17 = vadd.f32 %v3042_v54, %v3041_v4  ;;  %v3044_v60 = vpop.f32.mrb[78].mxu1  ;;  %v3107_v16 = vadd.f32 %v3106_v13, %v3105_v2  ;;  %v3108_v51 = vpop.f32.mrb[78].mxu0 }
 0x1e6   : > { %v3045_v35 = vpop.f32.mrb[79].mxu1  ;;  %v3109_v7 = vpop.f32.mrb[79].mxu0 }
 0x1e7   : > { %v4503_v27 = vadd.f32 %v3043_v17, %v4318_v48  ;;  %v3046_v28 = vadd.f32 %v3045_v35, %v3044_v60  ;;  %v4506_v34 = vadd.f32 %v3107_v16, %v4416_v46  ;;  %v3110_v40 = vadd.f32 %v3109_v7, %v3108_v51 }
 0x1e9   : > { %v4509_v61 = vadd.f32 %v3046_v28, %v4322_v6  ;;  %v4512_v32 = vadd.f32 %v3110_v40, %v4421_v1 }
 0x1eb   : > { %v3175_v23 = vpop.f32.mrb[80].mxu1  ;;  %v3111_v57 = vpop.f32.mrb[80].mxu0 }
 0x1ec   : > { %v3176_v12 = vpop.f32.mrb[81].mxu1  ;;  %v3112_v52 = vpop.f32.mrb[81].mxu0 }
 0x1ed   : > { %v3177_v22 = vadd.f32 %v3176_v12, %v3175_v23  ;;  %v3178_v53 = vpop.f32.mrb[82].mxu1  ;;  %v3113_v48 = vadd.f32 %v3112_v52, %v3111_v57  ;;  %v3114_v59 = vpop.f32.mrb[82].mxu0 }
 0x1ee   : > { %v3179_v47 = vpop.f32.mrb[83].mxu1  ;;  %v3115_v25 = vpop.f32.mrb[83].mxu0 }
 0x1ef   : > { %v3180_v18 = vadd.f32 %v3179_v47, %v3178_v53  ;;  %v4515_v46 = vadd.f32 %v3177_v22, %v4426_v15  ;;  %v4518_v6 = vadd.f32 %v3113_v48, %v4423_v11  ;;  %v3116_v44 = vadd.f32 %v3115_v25, %v3114_v59 }
 0x1f1   : > { %v4521_v1 = vadd.f32 %v3180_v18, %v4431_v38  ;;  %v4524_v37 = vadd.f32 %v3116_v44, %v4428_v9 }
 0x1f3   : > { %v3181_v55 = vpop.f32.mrb[84].mxu1  ;;  %v3117_v42 = vpop.f32.mrb[84].mxu0 }
 0x1f4   : > { %v3182_v43 = vpop.f32.mrb[85].mxu1  ;;  %v3118_v39 = vpop.f32.mrb[85].mxu0 }
 0x1f5   : > { %v3183_v4 = vadd.f32 %v3182_v43, %v3181_v55  ;;  %v3184_v2 = vpop.f32.mrb[86].mxu1  ;;  %v3119_v54 = vadd.f32 %v3118_v39, %v3117_v42  ;;  %v3120_v17 = vpop.f32.mrb[86].mxu0 }
 0x1f6   : > { %v3185_v15 = vpop.f32.mrb[87].mxu1  ;;  %v3121_v13 = vpop.f32.mrb[87].mxu0 }
 0x1f7   : > { %v3186_v60 = vadd.f32 %v3185_v15, %v3184_v2  ;;  %v4527_v11 = vadd.f32 %v3183_v4, %v4436_v29  ;;  %v4530_v38 = vadd.f32 %v3119_v54, %v4433_v30  ;;  %v3122_v16 = vadd.f32 %v3121_v13, %v3120_v17 }
 0x1f9   : > { %v4533_v9 = vadd.f32 %v3186_v60, %v4441_v21  ;;  %v4536_v51 = vadd.f32 %v3122_v16, %v4438_v19 }
 0x1fb   : > { %v3187_v35 = vpop.f32.mrb[88].mxu1  ;;  %v3123_v28 = vpop.f32.mrb[88].mxu0 }
 0x1fc   : > { %v3188_v7 = vpop.f32.mrb[89].mxu1  ;;  %v3124_v40 = vpop.f32.mrb[89].mxu0 }
 0x1fd   : > { %v3189_v23 = vadd.f32 %v3188_v7, %v3187_v35  ;;  %v3190_v57 = vpop.f32.mrb[90].mxu1  ;;  %v3125_v12 = vadd.f32 %v3124_v40, %v3123_v28  ;;  %v3126_v52 = vpop.f32.mrb[90].mxu0 }
 0x1fe   : > { %v3191_v29 = vpop.f32.mrb[91].mxu1  ;;  %v3127_v22 = vpop.f32.mrb[91].mxu0 }
 0x1ff   : > { %v3192_v53 = vadd.f32 %v3191_v29, %v3190_v57  ;;  %v4539_v30 = vadd.f32 %v3189_v23, %v4447_v20  ;;  %v4542_v21 = vadd.f32 %v3125_v12, %v4444_v41  ;;  %v3128_v48 = vadd.f32 %v3127_v22, %v3126_v52 }
 0x201   : > { %v4545_v19 = vadd.f32 %v3192_v53, %v4452_v50  ;;  %v4548_v59 = vadd.f32 %v3128_v48, %v4449_v63 }
 0x203   : > { %v3193_v47 = vpop.f32.mrb[92].mxu1  ;;  %v3129_v25 = vpop.f32.mrb[92].mxu0 }
 0x204   : > { %v3194_v18 = vpop.f32.mrb[93].mxu1  ;;  %v3130_v44 = vpop.f32.mrb[93].mxu0 }
 0x205   : > { %v3195_v55 = vadd.f32 %v3194_v18, %v3193_v47  ;;  %v3196_v42 = vpop.f32.mrb[94].mxu1  ;;  %v3131_v43 = vadd.f32 %v3130_v44, %v3129_v25  ;;  %v3132_v39 = vpop.f32.mrb[94].mxu0 }
 0x206   : > { %v3197_v20 = vpop.f32.mrb[95].mxu1  ;;  %v3133_v4 = vpop.f32.mrb[95].mxu0 }
 0x207   : > { %v3198_v2 = vadd.f32 %v3197_v20, %v3196_v42  ;;  %v4551_v41 = vadd.f32 %v3195_v55, %v4458_v45  ;;  %v4554_v50 = vadd.f32 %v3131_v43, %v4455_v3  ;;  %v3134_v54 = vadd.f32 %v3133_v4, %v3132_v39 }
 0x209   : > { %v4557_v63 = vadd.f32 %v3198_v2, %v4464_v31  ;;  %v4560_v17 = vadd.f32 %v3134_v54, %v4461_v26 }
 0x20b   : > { %v3199_v15 = vpop.f32.mrb[96].mxu1  ;;  %v3135_v13 = vpop.f32.mrb[96].mxu0 }
 0x20c   : > { %v3200_v60 = vpop.f32.mrb[97].mxu1  ;;  %v3136_v16 = vpop.f32.mrb[97].mxu0 }
 0x20d   : > { %v3201_v35 = vadd.f32 %v3200_v60, %v3199_v15  ;;  %v3202_v28 = vpop.f32.mrb[98].mxu1  ;;  %v3137_v7 = vadd.f32 %v3136_v16, %v3135_v13  ;;  %v3138_v40 = vpop.f32.mrb[98].mxu0 }
 0x20e   : > { %v3203_v45 = vpop.f32.mrb[99].mxu1  ;;  %v3139_v23 = vpop.f32.mrb[99].mxu0 }
 0x20f   : > { %v3204_v57 = vadd.f32 %v3203_v45, %v3202_v28  ;;  %v4563_v3 = vadd.f32 %v3201_v35, %v4470_v24  ;;  %v4566_v31 = vadd.f32 %v3137_v7, %v4467_v10  ;;  %v3140_v12 = vadd.f32 %v3139_v23, %v3138_v40 }
 0x211   : > { %v4569_v26 = vadd.f32 %v3204_v57, %v4476_v33  ;;  %v4572_v52 = vadd.f32 %v3140_v12, %v4473_v0 }
 0x213   : > { %v3205_v29 = vpop.f32.mrb[100].mxu1  ;;  %v3141_v22 = vpop.f32.mrb[100].mxu0 }
 0x214   : > { %v3206_v53 = vpop.f32.mrb[101].mxu1  ;;  %v3142_v48 = vpop.f32.mrb[101].mxu0 }
 0x215   : > { %v3207_v47 = vadd.f32 %v3206_v53, %v3205_v29  ;;  %v3208_v25 = vpop.f32.mrb[102].mxu1  ;;  %v3143_v18 = vadd.f32 %v3142_v48, %v3141_v22  ;;  %v3144_v44 = vpop.f32.mrb[102].mxu0 }
 0x216   : > { %v3209_v24 = vpop.f32.mrb[103].mxu1  ;;  %v3145_v55 = vpop.f32.mrb[103].mxu0 }
 0x217   : > { %v3210_v42 = vadd.f32 %v3209_v24, %v3208_v25  ;;  %v4575_v10 = vadd.f32 %v3207_v47, %v4482_v56  ;;  %v4578_v33 = vadd.f32 %v3143_v18, %v4479_v58  ;;  %v3146_v43 = vadd.f32 %v3145_v55, %v3144_v44 }
 0x219   : > { %v4581_v0 = vadd.f32 %v3210_v42, %v4488_v49  ;;  %v4584_v39 = vadd.f32 %v3146_v43, %v4485_v5 }
 0x21b   : > { %v3211_v20 = vpop.f32.mrb[104].mxu1  ;;  %v3147_v4 = vpop.f32.mrb[104].mxu0 }
 0x21c   : > { %v3212_v2 = vpop.f32.mrb[105].mxu1  ;;  %v3148_v54 = vpop.f32.mrb[105].mxu0 }
 0x21d   : > { %v3213_v15 = vadd.f32 %v3212_v2, %v3211_v20  ;;  %v3214_v13 = vpop.f32.mrb[106].mxu1  ;;  %v3149_v60 = vadd.f32 %v3148_v54, %v3147_v4  ;;  %v3150_v16 = vpop.f32.mrb[106].mxu0 }
 0x21e   : > { %v3215_v56 = vpop.f32.mrb[107].mxu1  ;;  %v3151_v35 = vpop.f32.mrb[107].mxu0 }
 0x21f   : > { %v3216_v28 = vadd.f32 %v3215_v56, %v3214_v13  ;;  %v4587_v58 = vadd.f32 %v3213_v15, %v4494_v14  ;;  %v4590_v49 = vadd.f32 %v3149_v60, %v4491_v62  ;;  %v3152_v7 = vadd.f32 %v3151_v35, %v3150_v16 }
 0x221   : > { %v4593_v5 = vadd.f32 %v3216_v28, %v4500_v36  ;;  %v4596_v40 = vadd.f32 %v3152_v7, %v4497_v8 }
 0x223   : > { %v3217_v45 = vpop.f32.mrb[108].mxu1  ;;  %v3153_v23 = vpop.f32.mrb[108].mxu0 }
 0x224   : > { %v3218_v57 = vpop.f32.mrb[109].mxu1  ;;  %v3154_v12 = vpop.f32.mrb[109].mxu0 }
 0x225   : > { %v3219_v29 = vadd.f32 %v3218_v57, %v3217_v45  ;;  %v3220_v22 = vpop.f32.mrb[110].mxu1  ;;  %v3155_v53 = vadd.f32 %v3154_v12, %v3153_v23  ;;  %v3156_v48 = vpop.f32.mrb[110].mxu0 }
 0x226   : > { %v3221_v14 = vpop.f32.mrb[111].mxu1  ;;  %v3157_v47 = vpop.f32.mrb[111].mxu0 }
 0x227   : > { %v3222_v62 = vadd.f32 %v3221_v14, %v3220_v22  ;;  %v4599_v25 = vadd.f32 %v3219_v29, %v4506_v34  ;;  %v4602_v36 = vadd.f32 %v3155_v53, %v4503_v27  ;;  %v3158_v8 = vadd.f32 %v3157_v47, %v3156_v48 }
 0x229   : > { %v4605_v18 = vadd.f32 %v3222_v62, %v4512_v32  ;;  %v4608_v44 = vadd.f32 %v3158_v8, %v4509_v61 }
 0x22b   : > { %v3223_v24 = vpop.f32.mrb[112].mxu1  ;;  %v3313_v55 = vpop.f32.mrb[112].mxu0 }
 0x22c   : > { %v3224_v42 = vpop.f32.mrb[113].mxu1  ;;  %v2003_v43 = vadd.f32 %v3313_v55, %v4527_v11  ;;  %v1994_v4 = vpop.f32.mrb[113].mxu0 }
 0x22d   : > { %v3225_v20 = vadd.f32 %v3224_v42, %v3223_v24  ;;  %v3226_v2 = vpop.f32.mrb[114].mxu1  ;;  %v1995_v34 = vadd.f32 %v1994_v4, %v4515_v46  ;;  %v3314_v27 = vpop.f32.mrb[114].mxu0 }
 0x22e   : > { %v3227_v54 = vpop.f32.mrb[115].mxu1  ;;  %v2006_v15 = vadd.f32 %v3314_v27, %v4533_v9  ;;  %v1997_v13 = vpop.f32.mrb[115].mxu0  ;;  %v2160_v9 = vmul.f32 %v2003_v43, %v2003_v43 }
 0x22f   : > { %v3228_v32 = vadd.f32 %v3227_v54, %v3226_v2  ;;  %v4615_v61 = vadd.f32 %v3225_v20, %v4518_v6  ;;  %v1998_v60 = vadd.f32 %v1997_v13, %v4521_v1  ;;  %v2158_v56 = vmul.f32 %v1995_v34, %v1995_v34 }
 0x230   : > { %v2736_v16 = vpack.c.bf16 %v2006_v15, %v2003_v43  ;;  %v2161_v22 = vmul.f32 %v2006_v15, %v2006_v15 }
 0x231   : > { %v4619_v11 = vadd.f32 %v3228_v32, %v4524_v37  ;;  %v2121_v35 = vadd.f32 %v1998_v60, %v1995_v34  ;;  %v2159_v28 = vmul.f32 %v1998_v60, %v1998_v60  ;;  %v2731_v7 = vpack.c.bf16 %v1998_v60, %v1995_v34 }
 0x232   : > { %2808 = vst [vmem:[%s4621_s20 + $0x8] sm:$0xff] %v2736_v16  }
 0x233   : > { %v3229_v46 = vpop.f32.mrb[116].mxu1  ;;  %v2122_v45 = vadd.f32 %v2121_v35, %v2003_v43  ;;  %v2190_v6 = vadd.f32 %v2159_v28, %v2158_v56  ;;  %2732 = vst [vmem:[%s4621_s20] sm:$0xff] %v2731_v7   ;;  %v3317_v23 = vpop.f32.mrb[116].mxu0 }
 0x234   : > { %v3230_v1 = vpop.f32.mrb[117].mxu1  ;;  %v2019_v57 = vadd.f32 %v3317_v23, %v4551_v41  ;;  %v2010_v12 = vpop.f32.mrb[117].mxu0 }
 0x235   : > { %v3231_v37 = vadd.f32 %v3230_v1, %v3229_v46  ;;  %v3232_v29 = vpop.f32.mrb[118].mxu1  ;;  %v2191_v53 = vadd.f32 %v2190_v6, %v2160_v9  ;;  %v2011_v48 = vadd.f32 %v2010_v12, %v4539_v30  ;;  %v2123_v14 = vadd.f32 %v2122_v45, %v2006_v15  ;;  %v3318_v47 = vpop.f32.mrb[118].mxu0 }
 0x236   : > { %v3233_v62 = vpop.f32.mrb[119].mxu1  ;;  %v2022_v8 = vadd.f32 %v3318_v47, %v4557_v63  ;;  %v2013_v55 = vpop.f32.mrb[119].mxu0  ;;  %v2164_v32 = vmul.f32 %v2019_v57, %v2019_v57 }
 0x237   : > { %v3234_v24 = vadd.f32 %v3233_v62, %v3232_v29  ;;  %v4629_v42 = vadd.f32 %v3231_v37, %v4530_v38  ;;  %v2124_v41 = vadd.f32 %v2123_v14, %v2011_v48  ;;  %v2162_v43 = vmul.f32 %v2011_v48, %v2011_v48 }
 0x238   : > { %v2192_v20 = vadd.f32 %v2191_v53, %v2161_v22  ;;  %v2014_v4 = vadd.f32 %v2013_v55, %v4545_v19  ;;  %v2746_v2 = vpack.c.bf16 %v2022_v8, %v2019_v57  ;;  %v2165_v7 = vmul.f32 %v2022_v8, %v2022_v8 }
 0x239   : > { %v4633_v30 = vadd.f32 %v3234_v24, %v4536_v51 }
 0x23a   : > { %v2193_v34 = vadd.f32 %v2192_v20, %v2162_v43  ;;  %v2125_v27 = vadd.f32 %v2124_v41, %v2014_v4  ;;  %v2163_v54 = vmul.f32 %v2014_v4, %v2014_v4  ;;  %v2741_v15 = vpack.c.bf16 %v2014_v4, %v2011_v48  ;;  %2810 = vst [vmem:[%s4621_s20 + $0x18] sm:$0xff] %v2746_v2  }
 0x23b   : > { %v3235_v63 = vpop.f32.mrb[120].mxu1  ;;  %v3321_v60 = vpop.f32.mrb[120].mxu0 }
 0x23c   : > { %v2126_v13 = vadd.f32 %v2125_v27, %v2019_v57  ;;  %v2194_v38 = vadd.f32 %v2193_v34, %v2163_v54  ;;  %2809 = vst [vmem:[%s4621_s20 + $0x10] sm:$0xff] %v2741_v15   ;;  %v3236_v16 = vpop.f32.mrb[121].mxu1  ;;  %v2035_v56 = vadd.f32 %v3321_v60, %v4575_v10  ;;  %v2026_v19 = vpop.f32.mrb[121].mxu0 }
 0x23d   : > { %v3237_v35 = vadd.f32 %v3236_v16, %v3235_v63  ;;  %v3238_v28 = vpop.f32.mrb[122].mxu1  ;;  %v2027_v46 = vadd.f32 %v2026_v19, %v4563_v3  ;;  %v3322_v45 = vpop.f32.mrb[122].mxu0 }
 0x23e   : > { %v2195_v51 = vadd.f32 %v2194_v38, %v2164_v32  ;;  %v2127_v9 = vadd.f32 %v2126_v13, %v2022_v8  ;;  %v3239_v6 = vpop.f32.mrb[123].mxu1  ;;  %v2038_v23 = vadd.f32 %v3322_v45, %v4581_v0  ;;  %v2029_v57 = vpop.f32.mrb[123].mxu0  ;;  %v2168_v8 = vmul.f32 %v2035_v56, %v2035_v56 }
 0x23f   : > { %v3240_v1 = vadd.f32 %v3239_v6, %v3238_v28  ;;  %v4641_v37 = vadd.f32 %v3237_v35, %v4542_v21  ;;  %v2166_v12 = vmul.f32 %v2027_v46, %v2027_v46  ;;  %v2030_v22 = vadd.f32 %v2029_v57, %v4569_v26 }
 0x240   : > { %v2128_v10 = vadd.f32 %v2127_v9, %v2027_v46  ;;  %v2196_v29 = vadd.f32 %v2195_v51, %v2165_v7  ;;  %v2756_v53 = vpack.c.bf16 %v2038_v23, %v2035_v56  ;;  %v2169_v2 = vmul.f32 %v2038_v23, %v2038_v23 }
 0x241   : > { %v4645_v3 = vadd.f32 %v3240_v1, %v4548_v59  ;;  %v2167_v47 = vmul.f32 %v2030_v22, %v2030_v22  ;;  %v2751_v62 = vpack.c.bf16 %v2030_v22, %v2027_v46 }
 0x242   : > { %v2197_v48 = vadd.f32 %v2196_v29, %v2166_v12  ;;  %v2129_v14 = vadd.f32 %v2128_v10, %v2030_v22  ;;  %2812 = vst [vmem:[%s4621_s20 + $0x28] sm:$0xff] %v2756_v53  }
 0x243   : > { %v3241_v0 = vpop.f32.mrb[124].mxu1  ;;  %2811 = vst [vmem:[%s4621_s20 + $0x20] sm:$0xff] %v2751_v62   ;;  %v3325_v55 = vpop.f32.mrb[124].mxu0 }
 0x244   : > { %v2130_v24 = vadd.f32 %v2129_v14, %v2035_v56  ;;  %v2198_v21 = vadd.f32 %v2197_v48, %v2167_v47  ;;  %v3242_v41 = vpop.f32.mrb[125].mxu1  ;;  %v2051_v43 = vadd.f32 %v3325_v55, %v4599_v25  ;;  %v2042_v26 = vpop.f32.mrb[125].mxu0 }
 0x245   : > { %v3243_v20 = vadd.f32 %v3242_v41, %v3241_v0  ;;  %v3244_v4 = vpop.f32.mrb[126].mxu1  ;;  %v2043_v34 = vadd.f32 %v2042_v26, %v4587_v58  ;;  %v3326_v54 = vpop.f32.mrb[126].mxu0 }
 0x246   : > { %v2199_v59 = vadd.f32 %v2198_v21, %v2168_v8  ;;  %v2131_v27 = vadd.f32 %v2130_v24, %v2038_v23  ;;  %v3245_v15 = vpop.f32.mrb[127].mxu1  ;;  %v2054_v63 = vadd.f32 %v3326_v54, %v4605_v18  ;;  %v2045_v13 = vpop.f32.mrb[127].mxu0  ;;  %v2172_v18 = vmul.f32 %v2051_v43, %v2051_v43 }
 0x247   : > { %v3246_v32 = vadd.f32 %v3245_v15, %v3244_v4  ;;  %v1922_v38 = vadd.f32 %v3243_v20, %v4554_v50  ;;  %v2170_v25 = vmul.f32 %v2043_v34, %v2043_v34  ;;  %v2046_v56 = vadd.f32 %v2045_v13, %v4593_v5 }
 0x248   : > { %v2132_v60 = vadd.f32 %v2131_v27, %v2043_v34  ;;  %v2200_v16 = vadd.f32 %v2199_v59, %v2169_v2  ;;  %v2766_v35 = vpack.c.bf16 %v2054_v63, %v2051_v43  ;;  %v2173_v10 = vmul.f32 %v2054_v63, %v2054_v63 }
 0x249   : > { %v1925_v19 = vadd.f32 %v3246_v32, %v4560_v17  ;;  %v2171_v7 = vmul.f32 %v2046_v56, %v2046_v56  ;;  %v2761_v51 = vpack.c.bf16 %v2046_v56, %v2043_v34 }
 0x24a   : > { %v2201_v58 = vadd.f32 %v2200_v16, %v2170_v25  ;;  %v2133_v28 = vadd.f32 %v2132_v60, %v2046_v56  ;;  %2814 = vst [vmem:[%s4621_s20 + $0x38] sm:$0xff] %v2766_v35  }
 0x24b   : > { %v3247_v46 = vpop.f32.mrb[128].mxu1  ;;  %2813 = vst [vmem:[%s4621_s20 + $0x30] sm:$0xff] %v2761_v51   ;;  %v3329_v50 = vpop.f32.mrb[128].mxu0 }
 0x24c   : > { %v2134_v9 = vadd.f32 %v2133_v28, %v2051_v43  ;;  %v2202_v45 = vadd.f32 %v2201_v58, %v2171_v7  ;;  %v3248_v6 = vpop.f32.mrb[129].mxu1  ;;  %v2067_v23 = vadd.f32 %v3329_v50, %v4629_v42  ;;  %v2058_v57 = vpop.f32.mrb[129].mxu0 }
 0x24d   : > { %v3249_v1 = vadd.f32 %v3248_v6, %v3247_v46  ;;  %v3250_v5 = vpop.f32.mrb[130].mxu1  ;;  %v2059_v17 = vadd.f32 %v2058_v57, %v4615_v61  ;;  %v3330_v22 = vpop.f32.mrb[130].mxu0 }
 0x24e   : > { %v2203_v12 = vadd.f32 %v2202_v45, %v2172_v18  ;;  %v2135_v29 = vadd.f32 %v2134_v9, %v2054_v63  ;;  %v3251_v53 = vpop.f32.mrb[131].mxu1  ;;  %v2070_v48 = vadd.f32 %v3330_v22, %v4633_v30  ;;  %v2061_v47 = vpop.f32.mrb[131].mxu0  ;;  %v2176_v30 = vmul.f32 %v2067_v23, %v2067_v23 }
 0x24f   : > { %v3252_v14 = vadd.f32 %v3251_v53, %v3250_v5  ;;  %v1930_v62 = vadd.f32 %v3249_v1, %v4566_v31  ;;  %v2174_v42 = vmul.f32 %v2059_v17, %v2059_v17  ;;  %v2062_v24 = vadd.f32 %v2061_v47, %v4619_v11 }
 0x250   : > { %v2136_v0 = vadd.f32 %v2135_v29, %v2059_v17  ;;  %v2204_v8 = vadd.f32 %v2203_v12, %v2173_v10  ;;  %v2776_v21 = vpack.c.bf16 %v2070_v48, %v2067_v23  ;;  %v2177_v11 = vmul.f32 %v2070_v48, %v2070_v48 }
 0x251   : > { %v1933_v55 = vadd.f32 %v3252_v14, %v4572_v52  ;;  %v2175_v43 = vmul.f32 %v2062_v24, %v2062_v24  ;;  %v2771_v20 = vpack.c.bf16 %v2062_v24, %v2059_v17 }
 0x252   : > { %v2205_v61 = vadd.f32 %v2204_v8, %v2174_v42  ;;  %v2137_v41 = vadd.f32 %v2136_v0, %v2062_v24  ;;  %2816 = vst [vmem:[%s4621_s20 + $0x48] sm:$0xff] %v2776_v21  }
 0x253   : > { %v3253_v26 = vpop.f32.mrb[132].mxu1  ;;  %2815 = vst [vmem:[%s4621_s20 + $0x40] sm:$0xff] %v2771_v20   ;;  %v3333_v31 = vpop.f32.mrb[132].mxu0 }
 0x254   : > { %v2138_v4 = vadd.f32 %v2137_v41, %v2067_v23  ;;  %v2206_v2 = vadd.f32 %v2205_v61, %v2175_v43  ;;  %v3254_v59 = vpop.f32.mrb[133].mxu1  ;;  %v2083_v34 = vadd.f32 %v3333_v31, %v1922_v38  ;;  %v2074_v54 = vpop.f32.mrb[133].mxu0 }
 0x255   : > { %v3255_v27 = vadd.f32 %v3254_v59, %v3253_v26  ;;  %v3256_v15 = vpop.f32.mrb[134].mxu1  ;;  %v2075_v52 = vadd.f32 %v2074_v54, %v4641_v37  ;;  %v3334_v13 = vpop.f32.mrb[134].mxu0 }
 0x256   : > { %v2207_v63 = vadd.f32 %v2206_v2, %v2176_v30  ;;  %v2139_v32 = vadd.f32 %v2138_v4, %v2070_v48  ;;  %v3257_v60 = vpop.f32.mrb[135].mxu1  ;;  %v2086_v25 = vadd.f32 %v3334_v13, %v1925_v19  ;;  %v2077_v56 = vpop.f32.mrb[135].mxu0  ;;  %v2180_v19 = vmul.f32 %v2083_v34, %v2083_v34 }
 0x257   : > { %v3258_v16 = vadd.f32 %v3257_v60, %v3256_v15  ;;  %v1938_v35 = vadd.f32 %v3255_v27, %v4578_v33  ;;  %v2178_v28 = vmul.f32 %v2075_v52, %v2075_v52  ;;  %v2078_v7 = vadd.f32 %v2077_v56, %v4645_v3 }
 0x258   : > { %v2140_v58 = vadd.f32 %v2139_v32, %v2075_v52  ;;  %v2208_v38 = vadd.f32 %v2207_v63, %v2177_v11  ;;  %v2786_v51 = vpack.c.bf16 %v2086_v25, %v2083_v34  ;;  %v2181_v3 = vmul.f32 %v2086_v25, %v2086_v25 }
 0x259   : > { %v1941_v46 = vadd.f32 %v3258_v16, %v4584_v39  ;;  %v2179_v9 = vmul.f32 %v2078_v7, %v2078_v7  ;;  %v2781_v45 = vpack.c.bf16 %v2078_v7, %v2075_v52 }
 0x25a   : > { %v2209_v18 = vadd.f32 %v2208_v38, %v2178_v28  ;;  %v2141_v37 = vadd.f32 %v2140_v58, %v2078_v7  ;;  %2818 = vst [vmem:[%s4621_s20 + $0x58] sm:$0xff] %v2786_v51  }
 0x25b   : > { %v3259_v50 = vpop.f32.mrb[136].mxu1  ;;  %2817 = vst [vmem:[%s4621_s20 + $0x50] sm:$0xff] %v2781_v45   ;;  %v3337_v33 = vpop.f32.mrb[136].mxu0 }
 0x25c   : > { %v2142_v6 = vadd.f32 %v2141_v37, %v2083_v34  ;;  %v2210_v23 = vadd.f32 %v2209_v18, %v2179_v9  ;;  %v3260_v1 = vpop.f32.mrb[137].mxu1  ;;  %v2099_v57 = vadd.f32 %v3337_v33, %v1938_v35  ;;  %v2090_v10 = vpop.f32.mrb[137].mxu0 }
 0x25d   : > { %v3261_v5 = vadd.f32 %v3260_v1, %v3259_v50  ;;  %v3262_v12 = vpop.f32.mrb[138].mxu1  ;;  %v2091_v29 = vadd.f32 %v2090_v10, %v1930_v62  ;;  %v3338_v22 = vpop.f32.mrb[138].mxu0 }
 0x25e   : > { %v2211_v17 = vadd.f32 %v2210_v23, %v2180_v19  ;;  %v2143_v39 = vadd.f32 %v2142_v6, %v2086_v25  ;;  %v3263_v53 = vpop.f32.mrb[139].mxu1  ;;  %v2102_v48 = vadd.f32 %v3338_v22, %v1941_v46  ;;  %v2093_v47 = vpop.f32.mrb[139].mxu0  ;;  %v2184_v4 = vmul.f32 %v2099_v57, %v2099_v57 }
 0x25f   : > { %v3264_v14 = vadd.f32 %v3263_v53, %v3262_v12  ;;  %v1946_v0 = vadd.f32 %v3261_v5, %v4590_v49  ;;  %v2182_v8 = vmul.f32 %v2091_v29, %v2091_v29  ;;  %v2094_v21 = vadd.f32 %v2093_v47, %v1933_v55 }
 0x260   : > { %v2144_v42 = vadd.f32 %v2143_v39, %v2091_v29  ;;  %v2212_v24 = vadd.f32 %v2211_v17, %v2181_v3  ;;  %v2796_v61 = vpack.c.bf16 %v2102_v48, %v2099_v57  ;;  %v2185_v55 = vmul.f32 %v2102_v48, %v2102_v48 }
 0x261   : > { %v1949_v41 = vadd.f32 %v3264_v14, %v4596_v40  ;;  %v2183_v62 = vmul.f32 %v2094_v21, %v2094_v21  ;;  %v2791_v26 = vpack.c.bf16 %v2094_v21, %v2091_v29 }
 0x262   : > { %v2213_v43 = vadd.f32 %v2212_v24, %v2182_v8  ;;  %v2145_v20 = vadd.f32 %v2144_v42, %v2094_v21  ;;  %2820 = vst [vmem:[%s4621_s20 + $0x68] sm:$0xff] %v2796_v61  }
 0x263   : > { %v3265_v30 = vpop.f32.mrb[140].mxu1  ;;  %2819 = vst [vmem:[%s4621_s20 + $0x60] sm:$0xff] %v2791_v26   ;;  %v3341_v59 = vpop.f32.mrb[140].mxu0 }
 0x264   : > { %v2146_v2 = vadd.f32 %v2145_v20, %v2099_v57  ;;  %v2214_v31 = vadd.f32 %v2213_v43, %v2183_v62  ;;  %v3266_v49 = vpop.f32.mrb[141].mxu1  ;;  %v2106_v27 = vpop.f32.mrb[141].mxu0 }
 0x265   : > { %v3267_v34 = vadd.f32 %v3266_v49, %v3265_v30  ;;  %v3268_v54 = vpop.f32.mrb[142].mxu1  ;;  %v2107_v40 = vadd.f32 %v2106_v27, %v1946_v0  ;;  %v3342_v63 = vpop.f32.mrb[142].mxu0 }
 0x266   : > { %v2215_v15 = vadd.f32 %v2214_v31, %v2184_v4  ;;  %v2147_v11 = vadd.f32 %v2146_v2, %v2102_v48  ;;  %v3269_v52 = vpop.f32.mrb[143].mxu1  ;;  %v2109_v60 = vpop.f32.mrb[143].mxu0 }
 0x267   : > { %v1954_v32 = vadd.f32 %v3267_v34, %v4602_v36  ;;  %v3270_v13 = vadd.f32 %v3269_v52, %v3268_v54  ;;  %v2186_v16 = vmul.f32 %v2107_v40, %v2107_v40  ;;  %v2110_v35 = vadd.f32 %v2109_v60, %v1949_v41 }
 0x268   : > { %v2148_v25 = vadd.f32 %v2147_v11, %v2107_v40  ;;  %v2216_v56 = vadd.f32 %v2215_v15, %v2185_v55 }
 0x269   : > { %v2115_v58 = vadd.f32 %v3341_v59, %v1954_v32  ;;  %v1957_v28 = vadd.f32 %v3270_v13, %v4608_v44  ;;  %v2187_v51 = vmul.f32 %v2110_v35, %v2110_v35  ;;  %v2801_v46 = vpack.c.bf16 %v2110_v35, %v2107_v40 }
 0x26a   : > { %v2217_v38 = vadd.f32 %v2216_v56, %v2186_v16  ;;  %v2149_v7 = vadd.f32 %v2148_v25, %v2110_v35 }
 0x26b   : > { %v2188_v18 = vmul.f32 %v2115_v58, %v2115_v58  ;;  %v2118_v36 = vadd.f32 %v3342_v63, %v1957_v28  ;;  %2821 = vst [vmem:[%s4621_s20 + $0x70] sm:$0xff] %v2801_v46  }
 0x26c   : > { %v2150_v37 = vadd.f32 %v2149_v7, %v2115_v58  ;;  %v2218_v9 = vadd.f32 %v2217_v38, %v2187_v51 }
 0x26d   : > { %v2189_v44 = vmul.f32 %v2118_v36, %v2118_v36  ;;  %v2806_v45 = vpack.c.bf16 %v2118_v36, %v2115_v58 }
 0x26e   : > { %v2151_v50 = vadd.f32 %v2150_v37, %v2118_v36  ;;  %v2219_v19 = vadd.f32 %v2218_v9, %v2188_v18 }
 0x26f   : > { %2822 = vst [vmem:[%s4621_s20 + $0x78] sm:$0xff] %v2806_v45  }
 0x270   : > { %v2152_v6 = vrot.slane %v2151_v50, 4  ;;  %v2220_v23 = vadd.f32 %v2219_v19, %v2189_v44 }
 0x271   : > { %3612 = shalt.err (!%p3609_p7)
}
 0x272   : > { %s3613_s26 = scalar_lea.hbm %s4683_s4, 2048  ;;  %s3617_s10 = scalar_lea.hbm %s4763_s2, 4096 }
 0x273   : > { %p3614_p9 = scmp.ne.s32.totalorder %s4683_s4, %s3613_s26  ;;  %p3618_p5 = scmp.lt.u32.totalorder %s4683_s4, %s4763_s2 }
 0x274   : > { %p3619_p13 = scmp.lt.u32.totalorder %s3617_s10, %s3613_s26  ;;  %p3621_p4 = scmp.lt.u32.totalorder %s3613_s26, %s4683_s4 }
 0x275   : > { %p3615_p1 = pnand %p3614_p9, %p3825_p12 }
 0x276   : > { %p3620_p2 = por %p3619_p13, %p3618_p5 }
 0x277   : > { %p3616_p0 = pneg %p3615_p1 }
 0x278   : > { %p3622_p6 = por %p3621_p4, %p3620_p2 }
 0x27a   : > { %p3623_p8 = pnand %p3622_p6, %p3616_p0 }
 0x27c   : > { %3626 = shalt.err (!%p3623_p8)
}
 0x27d   : > { %s3708_s20 = smov 64   ;;  %s3709_s8 = smov 4   ;;  %v2153_v33 = vadd.f32 %v2152_v6, %v2151_v50  ;;  %v2221_v1 = vrot.slane %v2220_v23, 4  ;;  %vm2227_vm2 = vcmask 1040384   ;;  %vm2229_vm3 = vcmask 1041408  }
 0x27e   : > { %3368 = dma.vmem_to_hbm [thread:$0]  (%p3825_p12), %s4685_s9, 2048, %s4683_s4, %s2393_s5, %s3708_s20, %s3708_s20, %s3709_s8  }
 0x27f   : > { %v2154_v57 = vrot.slane %v2153_v33, 2  ;;  %v2222_v5 = vadd.f32 %v2221_v1, %v2220_v23  ;;  %s2547_s29 = sshll.u32 %s3876_s6, 3  ;;  %s2692_s25 = sshll.u32 %s3752_s16, 7 }
 0x280   : > { %s214_s27 = scalar_lea.vmem [#allocation8], %s2547_s29  ;;  %s4717_s5 = scalar_lea.hbm %s4764_s3, %s2692_s25 }
 0x281   : > { %v2155_v10 = vadd.f32 %v2154_v57, %v2153_v33  ;;  %v2223_v12 = vrot.slane %v2222_v5, 2  ;;  %s2427_s22 = sshll.u32 %s214_s27, 4  ;;  %s2398_s23 = scalar_lea.sflag [#allocation9], %s3876_s6  ;;  %s4719_s22 = int_to_ptr.vmem [resolvable:$true] %s2427_s22 }
 0x282   : > { %s3627_s16 = scalar_lea.vmem %s4719_s22, 128  ;;  %s3710_s28 = smov [#allocation8]  }
 0x283   : > { %v2156_v3 = vrot.slane %v2155_v10, 1  ;;  %v2224_v17 = vadd.f32 %v2223_v12, %v2222_v5  ;;  %p3628_p10 = scmp.ne.s32.totalorder %s4719_s22, %s3627_s16  ;;  %s3631_s26 = sshll.u32 %s3710_s28, 4  ;;  %s3632_s26 = int_to_ptr.vmem [resolvable:$false] %s3631_s26 }
 0x284   : > { %s3633_s30 = scalar_lea.vmem %s3632_s26, 256  ;;  %p3634_p7 = scmp.lt.s32.totalorder %s4719_s22, %s3632_s26 }
 0x285   : > { %v2225_v29 = vrot.slane %v2224_v17, 1  ;;  %v2157_v39 = vadd.f32 %v2156_v3, %v2155_v10  ;;  %p3629_p11 = pnand %p3628_p10, %p3825_p12  ;;  %p3635_p9 = scmp.lt.s32.totalorder %s3633_s30, %s3627_s16 }
 0x287   : > { %v2226_v22 = vadd.f32 %v2225_v29, %v2224_v17  ;;  %p3630_p3 = pneg %p3629_p11  ;;  %p3636_p1 = por %p3635_p9, %p3634_p7 }
 0x289   : > { %v2228_v53 = vsel %vm2227_vm2, %v2157_v39, %v2226_v22  ;;  %p3637_p0 = pnand %p3636_p1, %p3630_p3 }
 0x28a   : > { %v2230_v48 = vsel %vm2229_vm3, %v2228_v53, 0.0 }
 0x28b   : > { %2231 = vst [vmem:[%s214_s27] sm:$0xff] %v2230_v48 }
 0x28c   : > { %3640 = shalt.err (!%p3637_p0)
}
 0x28d   : > { %s3641_s6 = scalar_lea.hbm %s4717_s5, 128  ;;  %s3645_s11 = scalar_lea.hbm %s4764_s3, 256 }
 0x28e   : > { %p3642_p5 = scmp.ne.s32.totalorder %s4717_s5, %s3641_s6  ;;  %p3646_p4 = scmp.lt.u32.totalorder %s4717_s5, %s4764_s3 }
 0x28f   : > { %p3647_p6 = scmp.lt.u32.totalorder %s3645_s11, %s3641_s6  ;;  %p3649_p10 = scmp.lt.u32.totalorder %s3641_s6, %s4717_s5 }
 0x290   : > { %p3643_p13 = pnand %p3642_p5, %p3825_p12 }
 0x291   : > { %p3648_p8 = por %p3647_p6, %p3646_p4 }
 0x292   : > { %p3644_p2 = pneg %p3643_p13 }
 0x293   : > { %p3650_p11 = por %p3649_p10, %p3648_p8 }
 0x295   : > { %p3651_p3 = pnand %p3650_p11, %p3644_p2 }
 0x297   : > { %3654 = shalt.err (!%p3651_p3)
}
 0x298   : > { %3369 = dma.vmem_to_hbm [thread:$0]  (%p3825_p12), %s4719_s22, 128, %s4717_s5, %s2398_s23  }
 0x299 PF: > { %s2439_s8 = sand.u32 1, %s3689_s12   ;;  %p4779_p7 = scmp.ne.s32.totalorder %s4769_s19, 0 }
 0x29a   : > { %p4780_p9 = scmp.ge.s32.totalorder %s3701_s15, 2  ;;  %s2440_s29 = scalar_lea.sflag [#allocation4], %s2439_s8 }
 0x29c   : > { %p3381_p1 = pnand %p4780_p9, %p4779_p7 }
 0x29e   : > { %3680 = dma.done.wait (!%p3381_p1), %s2440_s29, 2048  }
 0x29f   : > { %3682 = vsyncadd (!%p3381_p1), %s2440_s29, 4294965248  ;;  %s2449_s25 = scalar_lea.sflag [#allocation9], %s2439_s8 }
 0x2a0   : > { %3684 = dma.done.wait (!%p3381_p1), %s2449_s25, 128  }
 0x2a1   : > { %3686 = vsyncadd (!%p3381_p1), %s2449_s25, 4294967168  ;;  %p21_p12 = scmp.ge.s32.totalorder %s3787_s24, 4   ;;  %s4781_s12 = smov %s3693_s13 }
 0x2a2   : > { %s4782_s13 = smov %s3697_s14  ;;  %s4783_s14 = smov %s3821_s17 }
 0x2a3   : > { %s4784_s15 = smov %s3787_s24  ;;  %23 = sbr.rel (!%p21_p12) target bundleno = 8 (0x8), region = 94 }
 0x2aa   :  { %2454 = vsyncpa [#allocation3], 1 }
 0x2ab   :  { %2456 = vsyncpa [#allocation3 + $0x1], 1 }
 0x2ac   :  { %2457 = vsyncpa [#allocation6], 1 }
 0x2ad   :  { %2458 = vsyncpa [#allocation4], 1 }
 0x2ae   :  { %2460 = vsyncpa [#allocation4 + $0x1], 1 }
 0x2af   :  { %2461 = vsyncpa [#allocation9], 1 }
 0x2b0   :  { %2463 = vsyncpa [#allocation9 + $0x1], 1 }

</bundles_post_ra>
